<compile_context>
chip_gen: v7x
topology: tpu7x:2x2x1
jax: 0.10.0
libtpu: 0.0.40
codegen_flags: <defaults>
</compile_context>

<pallas_src>
import functools

import jax
import jax.numpy as jnp
from jax.experimental import pallas as pl
from jax.experimental.pallas import tpu as pltpu

_LANES = 128


def _round_up(v, m):
    return (v + m - 1) // m * m


def _vmem_limit_bytes(est_bytes):
    """Exact double-buffer estimate x1.5, clamped to 3/4 of this chip's physical VMEM."""
    try:
        cap = int(getattr(pltpu.get_tpu_info(), "vmem_capacity_bytes", 64 << 20))
    except Exception:  # defensive: interpret mode / unknown chip
        cap = 64 << 20
    hi = (cap * 3) // 4          # ~48 MiB on v7x (64 MiB VMEM), ~96 MiB on v5e/v6e (128 MiB)
    return int(min(max(est_bytes * 3 // 2, 16 << 20), hi))


# -----------------------------------------------------------------------------
# Host-side parameter / data preparation (cheap, ~1x input bytes; NO im2col).
# -----------------------------------------------------------------------------
def _fold_bn(w, conv_bias, bn, eps=1e-5):
    """Fold inference-mode BN into a conv weight (..., Cin, Cout) and bias (Cout,)."""
    gamma, beta, mean, var = bn
    scale = gamma * jax.lax.rsqrt(var + eps)
    return w * scale, (conv_bias - mean) * scale + beta


def _prep_conv_weights(w_oihw, conv_bias, bn, cin_pad, cout_pad):
    """torch (Cout,Cin,KH,KW) -> BN-folded (KH*KW, cin_pad, cout_pad) bf16 weight and
    (1, cout_pad) f32 bias.  Zero padding keeps padded output lanes exactly zero."""
    cout, cin, kh, kw = w_oihw.shape
    w = jnp.transpose(w_oihw, (2, 3, 1, 0)).reshape(kh * kw, cin, cout)
    w, b = _fold_bn(w, conv_bias, bn)
    wp = jnp.zeros((kh * kw, cin_pad, cout_pad), jnp.float32).at[:, :cin, :cout].set(w)
    bp = jnp.zeros((1, cout_pad), jnp.float32).at[:, :cout].set(b.reshape(1, cout))
    return wp.astype(jnp.bfloat16), bp


def _phase_decompose(xp, s, ho, wo, kh, kw):
    """Rearrange the zero-padded input so strided conv taps are contiguous slices.

    xp: (N, Hp, Wp, C).  Returns (N, s*s, Hq, Wq, C) such that the tap (dy, dx) of a
    stride-s conv equals xph[:, (dy%s)*s + dx%s, dy//s:dy//s+ho, dx//s:dx//s+wo, :].
    Total size ~= xp itself (no im2col blow-up)."""
    hq = ho + (kh - 1) // s
    wq = wo + (kw - 1) // s
    phases = []
    for py in range(s):
        for px in range(s):
            ph = xp[:, py::s, px::s, :][:, :hq, :wq, :]
            ph = jnp.pad(ph, ((0, 0), (0, hq - ph.shape[1]),
                              (0, wq - ph.shape[2]), (0, 0)))
            phases.append(ph)
    return jnp.stack(phases, axis=1)          # (N, s*s, Hq, Wq, C)


# -----------------------------------------------------------------------------
# Fused kernels.  One grid step == one batch image; all intermediates live in VMEM,
# so HBM sees exactly one read of the input and one write of the branch output.
# -----------------------------------------------------------------------------
def _conv_acc(tap_fn, w_ref, kh, kw, m, cin, cp):
    """sum_{dy,dx} tap(dy,dx) @ w[dy*kw+dx]; bf16 MXU inputs, f32 accumulation."""
    acc = jnp.zeros((m, cp), jnp.float32)
    for dy in range(kh):
        for dx in range(kw):
            tap = tap_fn(dy, dx).astype(jnp.float32).reshape(m, cin)
            acc = acc + jnp.dot(tap.astype(jnp.bfloat16), w_ref[dy * kw + dx],
                                preferred_element_type=jnp.float32)
    return acc


def _down_branch_kernel(xph_ref, wt_ref, bt_ref, w1_ref, b1_ref, w2_ref, b2_ref,
                        out_ref, t1_ref, t2_ref, *, s, kt, ho, wo, cout):
    cin = wt_ref.shape[1]
    cp = w1_ref.shape[-1]
    m = ho * wo

    # --- TransitionModule: conv5x5 (stride s) + BN + ReLU (BN folded) -------------
    def trans_tap(dy, dx):
        return xph_ref[0, (dy % s) * s + (dx % s),
                       dy // s: dy // s + ho, dx // s: dx // s + wo, :]

    y0 = jnp.maximum(_conv_acc(trans_tap, wt_ref, kt, kt, m, cin, cp)
                     + bt_ref[...], 0.0)

    # Stash into a zero-halo VMEM scratch: it is conv1's input AND the BasicBlock
    # identity (no HBM round-trip, no separate residual stream).
    t1_ref[...] = jnp.zeros(t1_ref.shape, t1_ref.dtype)
    t1_ref[1:ho + 1, 1:wo + 1, :] = y0.reshape(ho, wo, cp)

    # --- BasicBlock conv1 + BN1 + ReLU ---------------------------------------------
    y1 = jnp.maximum(
        _conv_acc(lambda dy, dx: t1_ref[dy:dy + ho, dx:dx + wo, :],
                  w1_ref, 3, 3, m, cp, cp) + b1_ref[...], 0.0)

    t2_ref[...] = jnp.zeros(t2_ref.shape, t2_ref.dtype)
    t2_ref[1:ho + 1, 1:wo + 1, :] = y1.reshape(ho, wo, cp)

    # --- BasicBlock conv2 + BN2 + identity + ReLU ------------------------------------
    acc2 = _conv_acc(lambda dy, dx: t2_ref[dy:dy + ho, dx:dx + wo, :],
                     w2_ref, 3, 3, m, cp, cp) + b2_ref[...]
    identity = t1_ref[1:ho + 1, 1:wo + 1, :].reshape(m, cp)
    out = jnp.maximum(acc2 + identity, 0.0)

    # Store only the true output channels (no 128-lane padded HBM writeback / slice).
    out_ref[0] = out[:, :cout].reshape(ho, wo, cout).astype(out_ref.dtype)


def _up_branch_kernel(xp_ref, w1_ref, b1_ref, w2_ref, b2_ref, wt_ref, bt_ref,
                      out_ref, t_ref, *, ho, wo, c):
    cp = w2_ref.shape[-1]
    m = ho * wo

    # --- BasicBlock conv1 + BN1 + ReLU ---------------------------------------------
    y1 = jnp.maximum(
        _conv_acc(lambda dy, dx: xp_ref[0, dy:dy + ho, dx:dx + wo, :],
                  w1_ref, 3, 3, m, c, cp) + b1_ref[...], 0.0)
    t_ref[...] = jnp.zeros(t_ref.shape, t_ref.dtype)
    t_ref[1:ho + 1, 1:wo + 1, :] = y1.reshape(ho, wo, cp)

    # --- BasicBlock conv2 + BN2 + identity + ReLU (true c channels only) ------------
    acc2 = _conv_acc(lambda dy, dx: t_ref[dy:dy + ho, dx:dx + wo, :],
                     w2_ref, 3, 3, m, cp, cp)
    identity = xp_ref[0, 1:ho + 1, 1:wo + 1, :].astype(jnp.float32).reshape(m, c)
    bb = jnp.maximum(acc2[:, :c] + b2_ref[:, :c] + identity, 0.0)

    # --- TransitionModule: ConvTranspose(k=stride=k) + BN + ReLU --------------------
    # Per-pixel matmul to Cout*k*k columns; the pixel shuffle is a pure layout op
    # done outside the kernel.
    up = jnp.dot(bb.astype(jnp.bfloat16), wt_ref[...],
                 preferred_element_type=jnp.float32) + bt_ref[...]
    out_ref[0] = jnp.maximum(up, 0.0).reshape(ho, wo, wt_ref.shape[-1]).astype(out_ref.dtype)


# -----------------------------------------------------------------------------
# Module
# -----------------------------------------------------------------------------
def _bn_params(key, c):
    k1, k2, k3, k4 = jax.random.split(key, 4)
    gamma = (1.0 + 0.1 * jax.random.normal(k1, (c,))).astype(jnp.float32)
    beta = (0.1 * jax.random.normal(k2, (c,))).astype(jnp.float32)
    mean = (0.1 * jax.random.normal(k3, (c,))).astype(jnp.float32)
    var = (1.0 + 0.1 * jax.random.uniform(k4, (c,))).astype(jnp.float32)
    return gamma, beta, mean, var


class ActivationMapAdaptiveModulePallas:
    """Forward-pass equivalent of MUXConv's ActivationMapAdaptiveModule (inference BN)."""

    def __init__(self, input_channels, output_channels, input_size, output_size, key):
        self.ic, self.oc = input_channels, output_channels
        self.in_size, self.out_size = input_size, output_size
        keys = iter(jax.random.split(key, 16))
        nk = lambda: next(keys)

        if input_size >= output_size:
            if input_size % output_size != 0:
                raise Exception('Activation Map Size Mismatch!')
            self.stride = input_size // output_size
            # TransitionModule: Conv2d(ic, oc, 5, stride, pad=2, bias=True) + BN + ReLU
            self.t_w = (0.1 * jax.random.normal(
                nk(), (output_channels, input_channels, 5, 5))).astype(jnp.float32)
            self.t_b = (0.1 * jax.random.normal(nk(), (output_channels,))).astype(jnp.float32)
            self.t_bn = _bn_params(nk(), output_channels)
            bbc = output_channels
        else:
            if output_size % input_size != 0:
                raise Exception('Activation Map Size Mismatch!')
            self.k_up = output_size // input_size
            # TransitionModule: ConvTranspose2d(ic, oc, k, stride=k) + BN + ReLU
            self.t_w = (0.1 * jax.random.normal(
                nk(), (input_channels, output_channels, self.k_up, self.k_up))).astype(jnp.float32)
            self.t_b = (0.1 * jax.random.normal(nk(), (output_channels,))).astype(jnp.float32)
            self.t_bn = _bn_params(nk(), output_channels)
            bbc = input_channels

        # BasicBlock(bbc, bbc): two conv3x3 (bias=False), each followed by BN.
        self.bbc = bbc
        self.bb_w1 = (0.1 * jax.random.normal(nk(), (bbc, bbc, 3, 3))).astype(jnp.float32)
        self.bb_bn1 = _bn_params(nk(), bbc)
        self.bb_w2 = (0.1 * jax.random.normal(nk(), (bbc, bbc, 3, 3))).astype(jnp.float32)
        self.bb_bn2 = _bn_params(nk(), bbc)

    # ------------------- downsampling / same-size branch -------------------
    def _run_down(self, x):
        n, h, w, cin = x.shape
        s, kt = self.stride, 5
        ho = (h + 4 - kt) // s + 1
        wo = (w + 4 - kt) // s + 1
        cout = self.oc
        cp = _round_up(cout, _LANES)

        # bf16 cast + spatial pad + stride-phase rearrangement (~1x input bytes;
        # replaces the 25x/9x HBM im2col of the previous version).
        xp = jnp.pad(x.astype(jnp.bfloat16), ((0, 0), (2, 2), (2, 2), (0, 0)))
        xph = _phase_decompose(xp, s, ho, wo, kt, kt)
        hq, wq = xph.shape[2], xph.shape[3]

        zero = jnp.zeros((cout,), jnp.float32)
        wt, bt = _prep_conv_weights(self.t_w, self.t_b, self.t_bn, cin, cp)
        w1, b1 = _prep_conv_weights(self.bb_w1, zero, self.bb_bn1, cp, cp)
        w2, b2 = _prep_conv_weights(self.bb_w2, zero, self.bb_bn2, cp, cp)

        kernel = functools.partial(_down_branch_kernel, s=s, kt=kt,
                                   ho=ho, wo=wo, cout=cout)

        # Exact VMEM budget: 2x buffers for streamed input/output and the
        # constant-index weight blocks, 1x for the two f32 halo scratches.
        est = (2 * s * s * hq * wq * cin * 2
               + 2 * (wt.size + w1.size + w2.size) * 2
               + 2 * (bt.size + b1.size + b2.size) * 4
               + 2 * ho * wo * cout * 4
               + 2 * (ho + 2) * (wo + 2) * cp * 4)

        # TODO(synk): for very large feature maps / channel counts add spatial (row)
        # tiling with halos plus Cout/K grid axes (and single-buffered resident
        # weights) so per-image activations fit v7x's 64 MiB VMEM.
        return pl.pallas_call(
            kernel,
            out_shape=jax.ShapeDtypeStruct((n, ho, wo, cout), jnp.float32),
            grid_spec=pltpu.PrefetchScalarGridSpec(
                num_scalar_prefetch=0,
                grid=(n,),
                in_specs=[
                    pl.BlockSpec((1, s * s, hq, wq, cin),
                                 lambda i: (i, 0, 0, 0, 0)),
                    pl.BlockSpec((kt * kt, cin, cp), lambda i: (0, 0, 0)),
                    pl.BlockSpec((1, cp), lambda i: (0, 0)),
                    pl.BlockSpec((9, cp, cp), lambda i: (0, 0, 0)),
                    pl.BlockSpec((1, cp), lambda i: (0, 0)),
                    pl.BlockSpec((9, cp, cp), lambda i: (0, 0, 0)),
                    pl.BlockSpec((1, cp), lambda i: (0, 0)),
                ],
                out_specs=pl.BlockSpec((1, ho, wo, cout), lambda i: (i, 0, 0, 0)),
                scratch_shapes=[pltpu.VMEM((ho + 2, wo + 2, cp), jnp.float32),
                                pltpu.VMEM((ho + 2, wo + 2, cp), jnp.float32)],
            ),
            compiler_params=pltpu.CompilerParams(
                dimension_semantics=("parallel",),   # batch shards across TCs on v7x
                vmem_limit_bytes=_vmem_limit_bytes(est)),
        )(xph, wt, bt, w1, b1, w2, b2)

    # ------------------------- upsampling branch ---------------------------
    def _run_up(self, x):
        n, h, w, c = x.shape
        k, cout = self.k_up, self.oc
        cp = _round_up(c, _LANES)
        ckk = cout * k * k

        xp = jnp.pad(x.astype(jnp.bfloat16), ((0, 0), (1, 1), (1, 1), (0, 0)))
        zero = jnp.zeros((c,), jnp.float32)
        w1, b1 = _prep_conv_weights(self.bb_w1, zero, self.bb_bn1, c, cp)
        w2, b2 = _prep_conv_weights(self.bb_w2, zero, self.bb_bn2, cp, cp)

        # ConvTranspose2d(c, cout, k, stride=k, pad=0) == per-pixel matmul to
        # cout*k*k columns with BN folded per output channel.
        gamma, beta, mean, var = self.t_bn
        scale = gamma * jax.lax.rsqrt(var + 1e-5)
        wt = (self.t_w.reshape(c, ckk) * jnp.repeat(scale, k * k)).astype(jnp.bfloat16)
        bt = (jnp.repeat((self.t_b - mean) * scale + beta, k * k)).reshape(1, ckk)

        kernel = functools.partial(_up_branch_kernel, ho=h, wo=w, c=c)
        est = (2 * (h + 2) * (w + 2) * c * 2
               + 2 * (w1.size + w2.size + wt.size) * 2
               + 2 * (b1.size + b2.size + bt.size) * 4
               + 2 * h * w * ckk * 4
               + (h + 2) * (w + 2) * cp * 4)

        out = pl.pallas_call(
            kernel,
            out_shape=jax.ShapeDtypeStruct((n, h, w, ckk), jnp.float32),
            grid_spec=pltpu.PrefetchScalarGridSpec(
                num_scalar_prefetch=0,
                grid=(n,),
                in_specs=[
                    pl.BlockSpec((1, h + 2, w + 2, c), lambda i: (i, 0, 0, 0)),
                    pl.BlockSpec((9, c, cp), lambda i: (0, 0, 0)),
                    pl.BlockSpec((1, cp), lambda i: (0, 0)),
                    pl.BlockSpec((9, cp, cp), lambda i: (0, 0, 0)),
                    pl.BlockSpec((1, cp), lambda i: (0, 0)),
                    pl.BlockSpec((c, ckk), lambda i: (0, 0)),
                    pl.BlockSpec((1, ckk), lambda i: (0, 0)),
                ],
                out_specs=pl.BlockSpec((1, h, w, ckk), lambda i: (i, 0, 0, 0)),
                scratch_shapes=[pltpu.VMEM((h + 2, w + 2, cp), jnp.float32)],
            ),
            compiler_params=pltpu.CompilerParams(
                dimension_semantics=("parallel",),
                vmem_limit_bytes=_vmem_limit_bytes(est)),
        )(xp, w1, b1, w2, b2, wt, bt)

        # Pixel shuffle (pure layout op) -> (N, H*k, W*k, Cout).
        out = out.reshape(n, h, w, cout, k, k)
        return jnp.transpose(out, (0, 1, 4, 2, 5, 3)).reshape(n, h * k, w * k, cout)

    def __call__(self, x_nhwc):
        if self.in_size >= self.out_size:
            return self._run_down(x_nhwc)
        return self._run_up(x_nhwc)


if __name__ == "__main__":
    key = jax.random.PRNGKey(0)
    kx, kp = jax.random.split(key)

    # Small shapes consistent with the module: downsampling branch (16 -> 8).
    N, Cin, Cout, Hin, Hout = 2, 4, 8, 16, 8
    x_nchw = jax.random.normal(kx, (N, Cin, Hin, Hin), dtype=jnp.float32)
    x_nhwc = jnp.transpose(x_nchw, (0, 2, 3, 1))        # kernels run NHWC

    module = ActivationMapAdaptiveModulePallas(Cin, Cout, Hin, Hout, kp)
    fwd = jax.jit(lambda x: jnp.transpose(module(x), (0, 3, 1, 2)))   # back to NCHW
    y_nchw = fwd(x_nhwc)
    jax.block_until_ready(y_nchw)

    assert y_nchw.shape == (N, Cout, Hout, Hout), y_nchw.shape
    assert bool(jnp.all(jnp.isfinite(y_nchw)))
    assert bool(jnp.all(y_nchw >= 0.0))                 # final ReLU
    print("KERNEL_OK")
</pallas_src>

<mosaic_0001>
module attributes {stable_mosaic.version = 11 : i64} {
  func.func @_down_branch_kernel(%arg0: i32, %arg1: memref<1x4x10x10x4xbf16, #tpu.memory_space<vmem>>, %arg2: memref<25x4x128xbf16, #tpu.memory_space<vmem>>, %arg3: memref<1x128xf32, #tpu.memory_space<vmem>>, %arg4: memref<9x128x128xbf16, #tpu.memory_space<vmem>>, %arg5: memref<1x128xf32, #tpu.memory_space<vmem>>, %arg6: memref<9x128x128xbf16, #tpu.memory_space<vmem>>, %arg7: memref<1x128xf32, #tpu.memory_space<vmem>>, %arg8: memref<1x8x8x8xf32, #tpu.memory_space<vmem>>, %arg9: memref<10x10x128xf32, #tpu.memory_space<vmem>>, %arg10: memref<10x10x128xf32, #tpu.memory_space<vmem>>) attributes {dimension_semantics = [#tpu.dimension_semantics<parallel>], iteration_bounds = array<i64: 2>, scalar_prefetch = 0 : i64, scratch_operands = 2 : i64, tpu.core_type = #tpu.core_type<tc>, window_params = [{transform_indices = @transform_0, window_bounds = array<i64: 1, 4, 10, 10, 4>}, {pipeline_mode = #tpu.pipeline_mode<synchronous>, transform_indices = @transform_1, window_bounds = array<i64: 25, 4, 128>}, {pipeline_mode = #tpu.pipeline_mode<synchronous>, transform_indices = @transform_2, window_bounds = array<i64: 1, 128>}, {pipeline_mode = #tpu.pipeline_mode<synchronous>, transform_indices = @transform_3, window_bounds = array<i64: 9, 128, 128>}, {pipeline_mode = #tpu.pipeline_mode<synchronous>, transform_indices = @transform_4, window_bounds = array<i64: 1, 128>}, {pipeline_mode = #tpu.pipeline_mode<synchronous>, transform_indices = @transform_5, window_bounds = array<i64: 9, 128, 128>}, {pipeline_mode = #tpu.pipeline_mode<synchronous>, transform_indices = @transform_6, window_bounds = array<i64: 1, 128>}, {transform_indices = @transform_7, window_bounds = array<i64: 1, 8, 8, 8>}]} {
    %cst = arith.constant 0.000000e+00 : f32
    %0 = vector.broadcast %cst : f32 to vector<64x128xf32>
    %c0 = arith.constant 0 : index
    %c0_0 = arith.constant 0 : index
    %c0_1 = arith.constant 0 : index
    %c0_2 = arith.constant 0 : index
    %c0_3 = arith.constant 0 : index
    %1 = vector.load %arg1[%c0, %c0_0, %c0_1, %c0_2, %c0_3] : memref<1x4x10x10x4xbf16, #tpu.memory_space<vmem>>, vector<1x1x8x8x4xbf16>
    %2 = vector.shape_cast %1 : vector<1x1x8x8x4xbf16> to vector<8x8x4xbf16>
    %3 = arith.extf %2 : vector<8x8x4xbf16> to vector<8x8x4xf32>
    %4 = vector.shape_cast %3 : vector<8x8x4xf32> to vector<64x4xf32>
    %5 = arith.truncf %4 : vector<64x4xf32> to vector<64x4xbf16>
    %c0_4 = arith.constant 0 : index
    %c0_5 = arith.constant 0 : index
    %c0_6 = arith.constant 0 : index
    %6 = vector.load %arg2[%c0_4, %c0_5, %c0_6] : memref<25x4x128xbf16, #tpu.memory_space<vmem>>, vector<1x4x128xbf16>
    %7 = vector.shape_cast %6 : vector<1x4x128xbf16> to vector<4x128xbf16>
    %cst_7 = arith.constant dense<0.000000e+00> : vector<64x128xf32>
    %8 = tpu.matmul %5, %7, %cst_7 {dimension_numbers = #tpu.dot_dimension_numbers<[1], [0], [0], [1], [0, 0, 1, 1], [], []>} : vector<64x4xbf16>, vector<4x128xbf16>, vector<64x128xf32> -> vector<64x128xf32>
    %9 = arith.addf %0, %8 : vector<64x128xf32>
    %c0_8 = arith.constant 0 : index
    %c1 = arith.constant 1 : index
    %c0_9 = arith.constant 0 : index
    %c0_10 = arith.constant 0 : index
    %c0_11 = arith.constant 0 : index
    %10 = vector.load %arg1[%c0_8, %c1, %c0_9, %c0_10, %c0_11] : memref<1x4x10x10x4xbf16, #tpu.memory_space<vmem>>, vector<1x1x8x8x4xbf16>
    %11 = vector.shape_cast %10 : vector<1x1x8x8x4xbf16> to vector<8x8x4xbf16>
    %12 = arith.extf %11 : vector<8x8x4xbf16> to vector<8x8x4xf32>
    %13 = vector.shape_cast %12 : vector<8x8x4xf32> to vector<64x4xf32>
    %14 = arith.truncf %13 : vector<64x4xf32> to vector<64x4xbf16>
    %c1_12 = arith.constant 1 : index
    %c0_13 = arith.constant 0 : index
    %c0_14 = arith.constant 0 : index
    %15 = vector.load %arg2[%c1_12, %c0_13, %c0_14] : memref<25x4x128xbf16, #tpu.memory_space<vmem>>, vector<1x4x128xbf16>
    %16 = vector.shape_cast %15 : vector<1x4x128xbf16> to vector<4x128xbf16>
    %cst_15 = arith.constant dense<0.000000e+00> : vector<64x128xf32>
    %17 = tpu.matmul %14, %16, %cst_15 {dimension_numbers = #tpu.dot_dimension_numbers<[1], [0], [0], [1], [0, 0, 1, 1], [], []>} : vector<64x4xbf16>, vector<4x128xbf16>, vector<64x128xf32> -> vector<64x128xf32>
    %18 = arith.addf %9, %17 : vector<64x128xf32>
    %c0_16 = arith.constant 0 : index
    %c0_17 = arith.constant 0 : index
    %c0_18 = arith.constant 0 : index
    %c1_19 = arith.constant 1 : index
    %c0_20 = arith.constant 0 : index
    %19 = vector.load %arg1[%c0_16, %c0_17, %c0_18, %c1_19, %c0_20] : memref<1x4x10x10x4xbf16, #tpu.memory_space<vmem>>, vector<1x1x8x8x4xbf16>
    %20 = vector.shape_cast %19 : vector<1x1x8x8x4xbf16> to vector<8x8x4xbf16>
    %21 = arith.extf %20 : vector<8x8x4xbf16> to vector<8x8x4xf32>
    %22 = vector.shape_cast %21 : vector<8x8x4xf32> to vector<64x4xf32>
    %23 = arith.truncf %22 : vector<64x4xf32> to vector<64x4xbf16>
    %c2 = arith.constant 2 : index
    %c0_21 = arith.constant 0 : index
    %c0_22 = arith.constant 0 : index
    %24 = vector.load %arg2[%c2, %c0_21, %c0_22] : memref<25x4x128xbf16, #tpu.memory_space<vmem>>, vector<1x4x128xbf16>
    %25 = vector.shape_cast %24 : vector<1x4x128xbf16> to vector<4x128xbf16>
    %cst_23 = arith.constant dense<0.000000e+00> : vector<64x128xf32>
    %26 = tpu.matmul %23, %25, %cst_23 {dimension_numbers = #tpu.dot_dimension_numbers<[1], [0], [0], [1], [0, 0, 1, 1], [], []>} : vector<64x4xbf16>, vector<4x128xbf16>, vector<64x128xf32> -> vector<64x128xf32>
    %27 = arith.addf %18, %26 : vector<64x128xf32>
    %c0_24 = arith.constant 0 : index
    %c1_25 = arith.constant 1 : index
    %c0_26 = arith.constant 0 : index
    %c1_27 = arith.constant 1 : index
    %c0_28 = arith.constant 0 : index
    %28 = vector.load %arg1[%c0_24, %c1_25, %c0_26, %c1_27, %c0_28] : memref<1x4x10x10x4xbf16, #tpu.memory_space<vmem>>, vector<1x1x8x8x4xbf16>
    %29 = vector.shape_cast %28 : vector<1x1x8x8x4xbf16> to vector<8x8x4xbf16>
    %30 = arith.extf %29 : vector<8x8x4xbf16> to vector<8x8x4xf32>
    %31 = vector.shape_cast %30 : vector<8x8x4xf32> to vector<64x4xf32>
    %32 = arith.truncf %31 : vector<64x4xf32> to vector<64x4xbf16>
    %c3 = arith.constant 3 : index
    %c0_29 = arith.constant 0 : index
    %c0_30 = arith.constant 0 : index
    %33 = vector.load %arg2[%c3, %c0_29, %c0_30] : memref<25x4x128xbf16, #tpu.memory_space<vmem>>, vector<1x4x128xbf16>
    %34 = vector.shape_cast %33 : vector<1x4x128xbf16> to vector<4x128xbf16>
    %cst_31 = arith.constant dense<0.000000e+00> : vector<64x128xf32>
    %35 = tpu.matmul %32, %34, %cst_31 {dimension_numbers = #tpu.dot_dimension_numbers<[1], [0], [0], [1], [0, 0, 1, 1], [], []>} : vector<64x4xbf16>, vector<4x128xbf16>, vector<64x128xf32> -> vector<64x128xf32>
    %36 = arith.addf %27, %35 : vector<64x128xf32>
    %c0_32 = arith.constant 0 : index
    %c0_33 = arith.constant 0 : index
    %c0_34 = arith.constant 0 : index
    %c2_35 = arith.constant 2 : index
    %c0_36 = arith.constant 0 : index
    %37 = vector.load %arg1[%c0_32, %c0_33, %c0_34, %c2_35, %c0_36] : memref<1x4x10x10x4xbf16, #tpu.memory_space<vmem>>, vector<1x1x8x8x4xbf16>
    %38 = vector.shape_cast %37 : vector<1x1x8x8x4xbf16> to vector<8x8x4xbf16>
    %39 = arith.extf %38 : vector<8x8x4xbf16> to vector<8x8x4xf32>
    %40 = vector.shape_cast %39 : vector<8x8x4xf32> to vector<64x4xf32>
    %41 = arith.truncf %40 : vector<64x4xf32> to vector<64x4xbf16>
    %c4 = arith.constant 4 : index
    %c0_37 = arith.constant 0 : index
    %c0_38 = arith.constant 0 : index
    %42 = vector.load %arg2[%c4, %c0_37, %c0_38] : memref<25x4x128xbf16, #tpu.memory_space<vmem>>, vector<1x4x128xbf16>
    %43 = vector.shape_cast %42 : vector<1x4x128xbf16> to vector<4x128xbf16>
    %cst_39 = arith.constant dense<0.000000e+00> : vector<64x128xf32>
    %44 = tpu.matmul %41, %43, %cst_39 {dimension_numbers = #tpu.dot_dimension_numbers<[1], [0], [0], [1], [0, 0, 1, 1], [], []>} : vector<64x4xbf16>, vector<4x128xbf16>, vector<64x128xf32> -> vector<64x128xf32>
    %45 = arith.addf %36, %44 : vector<64x128xf32>
    %c0_40 = arith.constant 0 : index
    %c2_41 = arith.constant 2 : index
    %c0_42 = arith.constant 0 : index
    %c0_43 = arith.constant 0 : index
    %c0_44 = arith.constant 0 : index
    %46 = vector.load %arg1[%c0_40, %c2_41, %c0_42, %c0_43, %c0_44] : memref<1x4x10x10x4xbf16, #tpu.memory_space<vmem>>, vector<1x1x8x8x4xbf16>
    %47 = vector.shape_cast %46 : vector<1x1x8x8x4xbf16> to vector<8x8x4xbf16>
    %48 = arith.extf %47 : vector<8x8x4xbf16> to vector<8x8x4xf32>
    %49 = vector.shape_cast %48 : vector<8x8x4xf32> to vector<64x4xf32>
    %50 = arith.truncf %49 : vector<64x4xf32> to vector<64x4xbf16>
    %c5 = arith.constant 5 : index
    %c0_45 = arith.constant 0 : index
    %c0_46 = arith.constant 0 : index
    %51 = vector.load %arg2[%c5, %c0_45, %c0_46] : memref<25x4x128xbf16, #tpu.memory_space<vmem>>, vector<1x4x128xbf16>
    %52 = vector.shape_cast %51 : vector<1x4x128xbf16> to vector<4x128xbf16>
    %cst_47 = arith.constant dense<0.000000e+00> : vector<64x128xf32>
    %53 = tpu.matmul %50, %52, %cst_47 {dimension_numbers = #tpu.dot_dimension_numbers<[1], [0], [0], [1], [0, 0, 1, 1], [], []>} : vector<64x4xbf16>, vector<4x128xbf16>, vector<64x128xf32> -> vector<64x128xf32>
    %54 = arith.addf %45, %53 : vector<64x128xf32>
    %c0_48 = arith.constant 0 : index
    %c3_49 = arith.constant 3 : index
    %c0_50 = arith.constant 0 : index
    %c0_51 = arith.constant 0 : index
    %c0_52 = arith.constant 0 : index
    %55 = vector.load %arg1[%c0_48, %c3_49, %c0_50, %c0_51, %c0_52] : memref<1x4x10x10x4xbf16, #tpu.memory_space<vmem>>, vector<1x1x8x8x4xbf16>
    %56 = vector.shape_cast %55 : vector<1x1x8x8x4xbf16> to vector<8x8x4xbf16>
    %57 = arith.extf %56 : vector<8x8x4xbf16> to vector<8x8x4xf32>
    %58 = vector.shape_cast %57 : vector<8x8x4xf32> to vector<64x4xf32>
    %59 = arith.truncf %58 : vector<64x4xf32> to vector<64x4xbf16>
    %c6 = arith.constant 6 : index
    %c0_53 = arith.constant 0 : index
    %c0_54 = arith.constant 0 : index
    %60 = vector.load %arg2[%c6, %c0_53, %c0_54] : memref<25x4x128xbf16, #tpu.memory_space<vmem>>, vector<1x4x128xbf16>
    %61 = vector.shape_cast %60 : vector<1x4x128xbf16> to vector<4x128xbf16>
    %cst_55 = arith.constant dense<0.000000e+00> : vector<64x128xf32>
    %62 = tpu.matmul %59, %61, %cst_55 {dimension_numbers = #tpu.dot_dimension_numbers<[1], [0], [0], [1], [0, 0, 1, 1], [], []>} : vector<64x4xbf16>, vector<4x128xbf16>, vector<64x128xf32> -> vector<64x128xf32>
    %63 = arith.addf %54, %62 : vector<64x128xf32>
    %c0_56 = arith.constant 0 : index
    %c2_57 = arith.constant 2 : index
    %c0_58 = arith.constant 0 : index
    %c1_59 = arith.constant 1 : index
    %c0_60 = arith.constant 0 : index
    %64 = vector.load %arg1[%c0_56, %c2_57, %c0_58, %c1_59, %c0_60] : memref<1x4x10x10x4xbf16, #tpu.memory_space<vmem>>, vector<1x1x8x8x4xbf16>
    %65 = vector.shape_cast %64 : vector<1x1x8x8x4xbf16> to vector<8x8x4xbf16>
    %66 = arith.extf %65 : vector<8x8x4xbf16> to vector<8x8x4xf32>
    %67 = vector.shape_cast %66 : vector<8x8x4xf32> to vector<64x4xf32>
    %68 = arith.truncf %67 : vector<64x4xf32> to vector<64x4xbf16>
    %c7 = arith.constant 7 : index
    %c0_61 = arith.constant 0 : index
    %c0_62 = arith.constant 0 : index
    %69 = vector.load %arg2[%c7, %c0_61, %c0_62] : memref<25x4x128xbf16, #tpu.memory_space<vmem>>, vector<1x4x128xbf16>
    %70 = vector.shape_cast %69 : vector<1x4x128xbf16> to vector<4x128xbf16>
    %cst_63 = arith.constant dense<0.000000e+00> : vector<64x128xf32>
    %71 = tpu.matmul %68, %70, %cst_63 {dimension_numbers = #tpu.dot_dimension_numbers<[1], [0], [0], [1], [0, 0, 1, 1], [], []>} : vector<64x4xbf16>, vector<4x128xbf16>, vector<64x128xf32> -> vector<64x128xf32>
    %72 = arith.addf %63, %71 : vector<64x128xf32>
    %c0_64 = arith.constant 0 : index
    %c3_65 = arith.constant 3 : index
    %c0_66 = arith.constant 0 : index
    %c1_67 = arith.constant 1 : index
    %c0_68 = arith.constant 0 : index
    %73 = vector.load %arg1[%c0_64, %c3_65, %c0_66, %c1_67, %c0_68] : memref<1x4x10x10x4xbf16, #tpu.memory_space<vmem>>, vector<1x1x8x8x4xbf16>
    %74 = vector.shape_cast %73 : vector<1x1x8x8x4xbf16> to vector<8x8x4xbf16>
    %75 = arith.extf %74 : vector<8x8x4xbf16> to vector<8x8x4xf32>
    %76 = vector.shape_cast %75 : vector<8x8x4xf32> to vector<64x4xf32>
    %77 = arith.truncf %76 : vector<64x4xf32> to vector<64x4xbf16>
    %c8 = arith.constant 8 : index
    %c0_69 = arith.constant 0 : index
    %c0_70 = arith.constant 0 : index
    %78 = vector.load %arg2[%c8, %c0_69, %c0_70] : memref<25x4x128xbf16, #tpu.memory_space<vmem>>, vector<1x4x128xbf16>
    %79 = vector.shape_cast %78 : vector<1x4x128xbf16> to vector<4x128xbf16>
    %cst_71 = arith.constant dense<0.000000e+00> : vector<64x128xf32>
    %80 = tpu.matmul %77, %79, %cst_71 {dimension_numbers = #tpu.dot_dimension_numbers<[1], [0], [0], [1], [0, 0, 1, 1], [], []>} : vector<64x4xbf16>, vector<4x128xbf16>, vector<64x128xf32> -> vector<64x128xf32>
    %81 = arith.addf %72, %80 : vector<64x128xf32>
    %c0_72 = arith.constant 0 : index
    %c2_73 = arith.constant 2 : index
    %c0_74 = arith.constant 0 : index
    %c2_75 = arith.constant 2 : index
    %c0_76 = arith.constant 0 : index
    %82 = vector.load %arg1[%c0_72, %c2_73, %c0_74, %c2_75, %c0_76] : memref<1x4x10x10x4xbf16, #tpu.memory_space<vmem>>, vector<1x1x8x8x4xbf16>
    %83 = vector.shape_cast %82 : vector<1x1x8x8x4xbf16> to vector<8x8x4xbf16>
    %84 = arith.extf %83 : vector<8x8x4xbf16> to vector<8x8x4xf32>
    %85 = vector.shape_cast %84 : vector<8x8x4xf32> to vector<64x4xf32>
    %86 = arith.truncf %85 : vector<64x4xf32> to vector<64x4xbf16>
    %c9 = arith.constant 9 : index
    %c0_77 = arith.constant 0 : index
    %c0_78 = arith.constant 0 : index
    %87 = vector.load %arg2[%c9, %c0_77, %c0_78] : memref<25x4x128xbf16, #tpu.memory_space<vmem>>, vector<1x4x128xbf16>
    %88 = vector.shape_cast %87 : vector<1x4x128xbf16> to vector<4x128xbf16>
    %cst_79 = arith.constant dense<0.000000e+00> : vector<64x128xf32>
    %89 = tpu.matmul %86, %88, %cst_79 {dimension_numbers = #tpu.dot_dimension_numbers<[1], [0], [0], [1], [0, 0, 1, 1], [], []>} : vector<64x4xbf16>, vector<4x128xbf16>, vector<64x128xf32> -> vector<64x128xf32>
    %90 = arith.addf %81, %89 : vector<64x128xf32>
    %c0_80 = arith.constant 0 : index
    %c0_81 = arith.constant 0 : index
    %c1_82 = arith.constant 1 : index
    %c0_83 = arith.constant 0 : index
    %c0_84 = arith.constant 0 : index
    %91 = vector.load %arg1[%c0_80, %c0_81, %c1_82, %c0_83, %c0_84] : memref<1x4x10x10x4xbf16, #tpu.memory_space<vmem>>, vector<1x1x8x8x4xbf16>
    %92 = vector.shape_cast %91 : vector<1x1x8x8x4xbf16> to vector<8x8x4xbf16>
    %93 = arith.extf %92 : vector<8x8x4xbf16> to vector<8x8x4xf32>
    %94 = vector.shape_cast %93 : vector<8x8x4xf32> to vector<64x4xf32>
    %95 = arith.truncf %94 : vector<64x4xf32> to vector<64x4xbf16>
    %c10 = arith.constant 10 : index
    %c0_85 = arith.constant 0 : index
    %c0_86 = arith.constant 0 : index
    %96 = vector.load %arg2[%c10, %c0_85, %c0_86] : memref<25x4x128xbf16, #tpu.memory_space<vmem>>, vector<1x4x128xbf16>
    %97 = vector.shape_cast %96 : vector<1x4x128xbf16> to vector<4x128xbf16>
    %cst_87 = arith.constant dense<0.000000e+00> : vector<64x128xf32>
    %98 = tpu.matmul %95, %97, %cst_87 {dimension_numbers = #tpu.dot_dimension_numbers<[1], [0], [0], [1], [0, 0, 1, 1], [], []>} : vector<64x4xbf16>, vector<4x128xbf16>, vector<64x128xf32> -> vector<64x128xf32>
    %99 = arith.addf %90, %98 : vector<64x128xf32>
    %c0_88 = arith.constant 0 : index
    %c1_89 = arith.constant 1 : index
    %c1_90 = arith.constant 1 : index
    %c0_91 = arith.constant 0 : index
    %c0_92 = arith.constant 0 : index
    %100 = vector.load %arg1[%c0_88, %c1_89, %c1_90, %c0_91, %c0_92] : memref<1x4x10x10x4xbf16, #tpu.memory_space<vmem>>, vector<1x1x8x8x4xbf16>
    %101 = vector.shape_cast %100 : vector<1x1x8x8x4xbf16> to vector<8x8x4xbf16>
    %102 = arith.extf %101 : vector<8x8x4xbf16> to vector<8x8x4xf32>
    %103 = vector.shape_cast %102 : vector<8x8x4xf32> to vector<64x4xf32>
    %104 = arith.truncf %103 : vector<64x4xf32> to vector<64x4xbf16>
    %c11 = arith.constant 11 : index
    %c0_93 = arith.constant 0 : index
    %c0_94 = arith.constant 0 : index
    %105 = vector.load %arg2[%c11, %c0_93, %c0_94] : memref<25x4x128xbf16, #tpu.memory_space<vmem>>, vector<1x4x128xbf16>
    %106 = vector.shape_cast %105 : vector<1x4x128xbf16> to vector<4x128xbf16>
    %cst_95 = arith.constant dense<0.000000e+00> : vector<64x128xf32>
    %107 = tpu.matmul %104, %106, %cst_95 {dimension_numbers = #tpu.dot_dimension_numbers<[1], [0], [0], [1], [0, 0, 1, 1], [], []>} : vector<64x4xbf16>, vector<4x128xbf16>, vector<64x128xf32> -> vector<64x128xf32>
    %108 = arith.addf %99, %107 : vector<64x128xf32>
    %c0_96 = arith.constant 0 : index
    %c0_97 = arith.constant 0 : index
    %c1_98 = arith.constant 1 : index
    %c1_99 = arith.constant 1 : index
    %c0_100 = arith.constant 0 : index
    %109 = vector.load %arg1[%c0_96, %c0_97, %c1_98, %c1_99, %c0_100] : memref<1x4x10x10x4xbf16, #tpu.memory_space<vmem>>, vector<1x1x8x8x4xbf16>
    %110 = vector.shape_cast %109 : vector<1x1x8x8x4xbf16> to vector<8x8x4xbf16>
    %111 = arith.extf %110 : vector<8x8x4xbf16> to vector<8x8x4xf32>
    %112 = vector.shape_cast %111 : vector<8x8x4xf32> to vector<64x4xf32>
    %113 = arith.truncf %112 : vector<64x4xf32> to vector<64x4xbf16>
    %c12 = arith.constant 12 : index
    %c0_101 = arith.constant 0 : index
    %c0_102 = arith.constant 0 : index
    %114 = vector.load %arg2[%c12, %c0_101, %c0_102] : memref<25x4x128xbf16, #tpu.memory_space<vmem>>, vector<1x4x128xbf16>
    %115 = vector.shape_cast %114 : vector<1x4x128xbf16> to vector<4x128xbf16>
    %cst_103 = arith.constant dense<0.000000e+00> : vector<64x128xf32>
    %116 = tpu.matmul %113, %115, %cst_103 {dimension_numbers = #tpu.dot_dimension_numbers<[1], [0], [0], [1], [0, 0, 1, 1], [], []>} : vector<64x4xbf16>, vector<4x128xbf16>, vector<64x128xf32> -> vector<64x128xf32>
    %117 = arith.addf %108, %116 : vector<64x128xf32>
    %c0_104 = arith.constant 0 : index
    %c1_105 = arith.constant 1 : index
    %c1_106 = arith.constant 1 : index
    %c1_107 = arith.constant 1 : index
    %c0_108 = arith.constant 0 : index
    %118 = vector.load %arg1[%c0_104, %c1_105, %c1_106, %c1_107, %c0_108] : memref<1x4x10x10x4xbf16, #tpu.memory_space<vmem>>, vector<1x1x8x8x4xbf16>
    %119 = vector.shape_cast %118 : vector<1x1x8x8x4xbf16> to vector<8x8x4xbf16>
    %120 = arith.extf %119 : vector<8x8x4xbf16> to vector<8x8x4xf32>
    %121 = vector.shape_cast %120 : vector<8x8x4xf32> to vector<64x4xf32>
    %122 = arith.truncf %121 : vector<64x4xf32> to vector<64x4xbf16>
    %c13 = arith.constant 13 : index
    %c0_109 = arith.constant 0 : index
    %c0_110 = arith.constant 0 : index
    %123 = vector.load %arg2[%c13, %c0_109, %c0_110] : memref<25x4x128xbf16, #tpu.memory_space<vmem>>, vector<1x4x128xbf16>
    %124 = vector.shape_cast %123 : vector<1x4x128xbf16> to vector<4x128xbf16>
    %cst_111 = arith.constant dense<0.000000e+00> : vector<64x128xf32>
    %125 = tpu.matmul %122, %124, %cst_111 {dimension_numbers = #tpu.dot_dimension_numbers<[1], [0], [0], [1], [0, 0, 1, 1], [], []>} : vector<64x4xbf16>, vector<4x128xbf16>, vector<64x128xf32> -> vector<64x128xf32>
    %126 = arith.addf %117, %125 : vector<64x128xf32>
    %c0_112 = arith.constant 0 : index
    %c0_113 = arith.constant 0 : index
    %c1_114 = arith.constant 1 : index
    %c2_115 = arith.constant 2 : index
    %c0_116 = arith.constant 0 : index
    %127 = vector.load %arg1[%c0_112, %c0_113, %c1_114, %c2_115, %c0_116] : memref<1x4x10x10x4xbf16, #tpu.memory_space<vmem>>, vector<1x1x8x8x4xbf16>
    %128 = vector.shape_cast %127 : vector<1x1x8x8x4xbf16> to vector<8x8x4xbf16>
    %129 = arith.extf %128 : vector<8x8x4xbf16> to vector<8x8x4xf32>
    %130 = vector.shape_cast %129 : vector<8x8x4xf32> to vector<64x4xf32>
    %131 = arith.truncf %130 : vector<64x4xf32> to vector<64x4xbf16>
    %c14 = arith.constant 14 : index
    %c0_117 = arith.constant 0 : index
    %c0_118 = arith.constant 0 : index
    %132 = vector.load %arg2[%c14, %c0_117, %c0_118] : memref<25x4x128xbf16, #tpu.memory_space<vmem>>, vector<1x4x128xbf16>
    %133 = vector.shape_cast %132 : vector<1x4x128xbf16> to vector<4x128xbf16>
    %cst_119 = arith.constant dense<0.000000e+00> : vector<64x128xf32>
    %134 = tpu.matmul %131, %133, %cst_119 {dimension_numbers = #tpu.dot_dimension_numbers<[1], [0], [0], [1], [0, 0, 1, 1], [], []>} : vector<64x4xbf16>, vector<4x128xbf16>, vector<64x128xf32> -> vector<64x128xf32>
    %135 = arith.addf %126, %134 : vector<64x128xf32>
    %c0_120 = arith.constant 0 : index
    %c2_121 = arith.constant 2 : index
    %c1_122 = arith.constant 1 : index
    %c0_123 = arith.constant 0 : index
    %c0_124 = arith.constant 0 : index
    %136 = vector.load %arg1[%c0_120, %c2_121, %c1_122, %c0_123, %c0_124] : memref<1x4x10x10x4xbf16, #tpu.memory_space<vmem>>, vector<1x1x8x8x4xbf16>
    %137 = vector.shape_cast %136 : vector<1x1x8x8x4xbf16> to vector<8x8x4xbf16>
    %138 = arith.extf %137 : vector<8x8x4xbf16> to vector<8x8x4xf32>
    %139 = vector.shape_cast %138 : vector<8x8x4xf32> to vector<64x4xf32>
    %140 = arith.truncf %139 : vector<64x4xf32> to vector<64x4xbf16>
    %c15 = arith.constant 15 : index
    %c0_125 = arith.constant 0 : index
    %c0_126 = arith.constant 0 : index
    %141 = vector.load %arg2[%c15, %c0_125, %c0_126] : memref<25x4x128xbf16, #tpu.memory_space<vmem>>, vector<1x4x128xbf16>
    %142 = vector.shape_cast %141 : vector<1x4x128xbf16> to vector<4x128xbf16>
    %cst_127 = arith.constant dense<0.000000e+00> : vector<64x128xf32>
    %143 = tpu.matmul %140, %142, %cst_127 {dimension_numbers = #tpu.dot_dimension_numbers<[1], [0], [0], [1], [0, 0, 1, 1], [], []>} : vector<64x4xbf16>, vector<4x128xbf16>, vector<64x128xf32> -> vector<64x128xf32>
    %144 = arith.addf %135, %143 : vector<64x128xf32>
    %c0_128 = arith.constant 0 : index
    %c3_129 = arith.constant 3 : index
    %c1_130 = arith.constant 1 : index
    %c0_131 = arith.constant 0 : index
    %c0_132 = arith.constant 0 : index
    %145 = vector.load %arg1[%c0_128, %c3_129, %c1_130, %c0_131, %c0_132] : memref<1x4x10x10x4xbf16, #tpu.memory_space<vmem>>, vector<1x1x8x8x4xbf16>
    %146 = vector.shape_cast %145 : vector<1x1x8x8x4xbf16> to vector<8x8x4xbf16>
    %147 = arith.extf %146 : vector<8x8x4xbf16> to vector<8x8x4xf32>
    %148 = vector.shape_cast %147 : vector<8x8x4xf32> to vector<64x4xf32>
    %149 = arith.truncf %148 : vector<64x4xf32> to vector<64x4xbf16>
    %c16 = arith.constant 16 : index
    %c0_133 = arith.constant 0 : index
    %c0_134 = arith.constant 0 : index
    %150 = vector.load %arg2[%c16, %c0_133, %c0_134] : memref<25x4x128xbf16, #tpu.memory_space<vmem>>, vector<1x4x128xbf16>
    %151 = vector.shape_cast %150 : vector<1x4x128xbf16> to vector<4x128xbf16>
    %cst_135 = arith.constant dense<0.000000e+00> : vector<64x128xf32>
    %152 = tpu.matmul %149, %151, %cst_135 {dimension_numbers = #tpu.dot_dimension_numbers<[1], [0], [0], [1], [0, 0, 1, 1], [], []>} : vector<64x4xbf16>, vector<4x128xbf16>, vector<64x128xf32> -> vector<64x128xf32>
    %153 = arith.addf %144, %152 : vector<64x128xf32>
    %c0_136 = arith.constant 0 : index
    %c2_137 = arith.constant 2 : index
    %c1_138 = arith.constant 1 : index
    %c1_139 = arith.constant 1 : index
    %c0_140 = arith.constant 0 : index
    %154 = vector.load %arg1[%c0_136, %c2_137, %c1_138, %c1_139, %c0_140] : memref<1x4x10x10x4xbf16, #tpu.memory_space<vmem>>, vector<1x1x8x8x4xbf16>
    %155 = vector.shape_cast %154 : vector<1x1x8x8x4xbf16> to vector<8x8x4xbf16>
    %156 = arith.extf %155 : vector<8x8x4xbf16> to vector<8x8x4xf32>
    %157 = vector.shape_cast %156 : vector<8x8x4xf32> to vector<64x4xf32>
    %158 = arith.truncf %157 : vector<64x4xf32> to vector<64x4xbf16>
    %c17 = arith.constant 17 : index
    %c0_141 = arith.constant 0 : index
    %c0_142 = arith.constant 0 : index
    %159 = vector.load %arg2[%c17, %c0_141, %c0_142] : memref<25x4x128xbf16, #tpu.memory_space<vmem>>, vector<1x4x128xbf16>
    %160 = vector.shape_cast %159 : vector<1x4x128xbf16> to vector<4x128xbf16>
    %cst_143 = arith.constant dense<0.000000e+00> : vector<64x128xf32>
    %161 = tpu.matmul %158, %160, %cst_143 {dimension_numbers = #tpu.dot_dimension_numbers<[1], [0], [0], [1], [0, 0, 1, 1], [], []>} : vector<64x4xbf16>, vector<4x128xbf16>, vector<64x128xf32> -> vector<64x128xf32>
    %162 = arith.addf %153, %161 : vector<64x128xf32>
    %c0_144 = arith.constant 0 : index
    %c3_145 = arith.constant 3 : index
    %c1_146 = arith.constant 1 : index
    %c1_147 = arith.constant 1 : index
    %c0_148 = arith.constant 0 : index
    %163 = vector.load %arg1[%c0_144, %c3_145, %c1_146, %c1_147, %c0_148] : memref<1x4x10x10x4xbf16, #tpu.memory_space<vmem>>, vector<1x1x8x8x4xbf16>
    %164 = vector.shape_cast %163 : vector<1x1x8x8x4xbf16> to vector<8x8x4xbf16>
    %165 = arith.extf %164 : vector<8x8x4xbf16> to vector<8x8x4xf32>
    %166 = vector.shape_cast %165 : vector<8x8x4xf32> to vector<64x4xf32>
    %167 = arith.truncf %166 : vector<64x4xf32> to vector<64x4xbf16>
    %c18 = arith.constant 18 : index
    %c0_149 = arith.constant 0 : index
    %c0_150 = arith.constant 0 : index
    %168 = vector.load %arg2[%c18, %c0_149, %c0_150] : memref<25x4x128xbf16, #tpu.memory_space<vmem>>, vector<1x4x128xbf16>
    %169 = vector.shape_cast %168 : vector<1x4x128xbf16> to vector<4x128xbf16>
    %cst_151 = arith.constant dense<0.000000e+00> : vector<64x128xf32>
    %170 = tpu.matmul %167, %169, %cst_151 {dimension_numbers = #tpu.dot_dimension_numbers<[1], [0], [0], [1], [0, 0, 1, 1], [], []>} : vector<64x4xbf16>, vector<4x128xbf16>, vector<64x128xf32> -> vector<64x128xf32>
    %171 = arith.addf %162, %170 : vector<64x128xf32>
    %c0_152 = arith.constant 0 : index
    %c2_153 = arith.constant 2 : index
    %c1_154 = arith.constant 1 : index
    %c2_155 = arith.constant 2 : index
    %c0_156 = arith.constant 0 : index
    %172 = vector.load %arg1[%c0_152, %c2_153, %c1_154, %c2_155, %c0_156] : memref<1x4x10x10x4xbf16, #tpu.memory_space<vmem>>, vector<1x1x8x8x4xbf16>
    %173 = vector.shape_cast %172 : vector<1x1x8x8x4xbf16> to vector<8x8x4xbf16>
    %174 = arith.extf %173 : vector<8x8x4xbf16> to vector<8x8x4xf32>
    %175 = vector.shape_cast %174 : vector<8x8x4xf32> to vector<64x4xf32>
    %176 = arith.truncf %175 : vector<64x4xf32> to vector<64x4xbf16>
    %c19 = arith.constant 19 : index
    %c0_157 = arith.constant 0 : index
    %c0_158 = arith.constant 0 : index
    %177 = vector.load %arg2[%c19, %c0_157, %c0_158] : memref<25x4x128xbf16, #tpu.memory_space<vmem>>, vector<1x4x128xbf16>
    %178 = vector.shape_cast %177 : vector<1x4x128xbf16> to vector<4x128xbf16>
    %cst_159 = arith.constant dense<0.000000e+00> : vector<64x128xf32>
    %179 = tpu.matmul %176, %178, %cst_159 {dimension_numbers = #tpu.dot_dimension_numbers<[1], [0], [0], [1], [0, 0, 1, 1], [], []>} : vector<64x4xbf16>, vector<4x128xbf16>, vector<64x128xf32> -> vector<64x128xf32>
    %180 = arith.addf %171, %179 : vector<64x128xf32>
    %c0_160 = arith.constant 0 : index
    %c0_161 = arith.constant 0 : index
    %c2_162 = arith.constant 2 : index
    %c0_163 = arith.constant 0 : index
    %c0_164 = arith.constant 0 : index
    %181 = vector.load %arg1[%c0_160, %c0_161, %c2_162, %c0_163, %c0_164] : memref<1x4x10x10x4xbf16, #tpu.memory_space<vmem>>, vector<1x1x8x8x4xbf16>
    %182 = vector.shape_cast %181 : vector<1x1x8x8x4xbf16> to vector<8x8x4xbf16>
    %183 = arith.extf %182 : vector<8x8x4xbf16> to vector<8x8x4xf32>
    %184 = vector.shape_cast %183 : vector<8x8x4xf32> to vector<64x4xf32>
    %185 = arith.truncf %184 : vector<64x4xf32> to vector<64x4xbf16>
    %c20 = arith.constant 20 : index
    %c0_165 = arith.constant 0 : index
    %c0_166 = arith.constant 0 : index
    %186 = vector.load %arg2[%c20, %c0_165, %c0_166] : memref<25x4x128xbf16, #tpu.memory_space<vmem>>, vector<1x4x128xbf16>
    %187 = vector.shape_cast %186 : vector<1x4x128xbf16> to vector<4x128xbf16>
    %cst_167 = arith.constant dense<0.000000e+00> : vector<64x128xf32>
    %188 = tpu.matmul %185, %187, %cst_167 {dimension_numbers = #tpu.dot_dimension_numbers<[1], [0], [0], [1], [0, 0, 1, 1], [], []>} : vector<64x4xbf16>, vector<4x128xbf16>, vector<64x128xf32> -> vector<64x128xf32>
    %189 = arith.addf %180, %188 : vector<64x128xf32>
    %c0_168 = arith.constant 0 : index
    %c1_169 = arith.constant 1 : index
    %c2_170 = arith.constant 2 : index
    %c0_171 = arith.constant 0 : index
    %c0_172 = arith.constant 0 : index
    %190 = vector.load %arg1[%c0_168, %c1_169, %c2_170, %c0_171, %c0_172] : memref<1x4x10x10x4xbf16, #tpu.memory_space<vmem>>, vector<1x1x8x8x4xbf16>
    %191 = vector.shape_cast %190 : vector<1x1x8x8x4xbf16> to vector<8x8x4xbf16>
    %192 = arith.extf %191 : vector<8x8x4xbf16> to vector<8x8x4xf32>
    %193 = vector.shape_cast %192 : vector<8x8x4xf32> to vector<64x4xf32>
    %194 = arith.truncf %193 : vector<64x4xf32> to vector<64x4xbf16>
    %c21 = arith.constant 21 : index
    %c0_173 = arith.constant 0 : index
    %c0_174 = arith.constant 0 : index
    %195 = vector.load %arg2[%c21, %c0_173, %c0_174] : memref<25x4x128xbf16, #tpu.memory_space<vmem>>, vector<1x4x128xbf16>
    %196 = vector.shape_cast %195 : vector<1x4x128xbf16> to vector<4x128xbf16>
    %cst_175 = arith.constant dense<0.000000e+00> : vector<64x128xf32>
    %197 = tpu.matmul %194, %196, %cst_175 {dimension_numbers = #tpu.dot_dimension_numbers<[1], [0], [0], [1], [0, 0, 1, 1], [], []>} : vector<64x4xbf16>, vector<4x128xbf16>, vector<64x128xf32> -> vector<64x128xf32>
    %198 = arith.addf %189, %197 : vector<64x128xf32>
    %c0_176 = arith.constant 0 : index
    %c0_177 = arith.constant 0 : index
    %c2_178 = arith.constant 2 : index
    %c1_179 = arith.constant 1 : index
    %c0_180 = arith.constant 0 : index
    %199 = vector.load %arg1[%c0_176, %c0_177, %c2_178, %c1_179, %c0_180] : memref<1x4x10x10x4xbf16, #tpu.memory_space<vmem>>, vector<1x1x8x8x4xbf16>
    %200 = vector.shape_cast %199 : vector<1x1x8x8x4xbf16> to vector<8x8x4xbf16>
    %201 = arith.extf %200 : vector<8x8x4xbf16> to vector<8x8x4xf32>
    %202 = vector.shape_cast %201 : vector<8x8x4xf32> to vector<64x4xf32>
    %203 = arith.truncf %202 : vector<64x4xf32> to vector<64x4xbf16>
    %c22 = arith.constant 22 : index
    %c0_181 = arith.constant 0 : index
    %c0_182 = arith.constant 0 : index
    %204 = vector.load %arg2[%c22, %c0_181, %c0_182] : memref<25x4x128xbf16, #tpu.memory_space<vmem>>, vector<1x4x128xbf16>
    %205 = vector.shape_cast %204 : vector<1x4x128xbf16> to vector<4x128xbf16>
    %cst_183 = arith.constant dense<0.000000e+00> : vector<64x128xf32>
    %206 = tpu.matmul %203, %205, %cst_183 {dimension_numbers = #tpu.dot_dimension_numbers<[1], [0], [0], [1], [0, 0, 1, 1], [], []>} : vector<64x4xbf16>, vector<4x128xbf16>, vector<64x128xf32> -> vector<64x128xf32>
    %207 = arith.addf %198, %206 : vector<64x128xf32>
    %c0_184 = arith.constant 0 : index
    %c1_185 = arith.constant 1 : index
    %c2_186 = arith.constant 2 : index
    %c1_187 = arith.constant 1 : index
    %c0_188 = arith.constant 0 : index
    %208 = vector.load %arg1[%c0_184, %c1_185, %c2_186, %c1_187, %c0_188] : memref<1x4x10x10x4xbf16, #tpu.memory_space<vmem>>, vector<1x1x8x8x4xbf16>
    %209 = vector.shape_cast %208 : vector<1x1x8x8x4xbf16> to vector<8x8x4xbf16>
    %210 = arith.extf %209 : vector<8x8x4xbf16> to vector<8x8x4xf32>
    %211 = vector.shape_cast %210 : vector<8x8x4xf32> to vector<64x4xf32>
    %212 = arith.truncf %211 : vector<64x4xf32> to vector<64x4xbf16>
    %c23 = arith.constant 23 : index
    %c0_189 = arith.constant 0 : index
    %c0_190 = arith.constant 0 : index
    %213 = vector.load %arg2[%c23, %c0_189, %c0_190] : memref<25x4x128xbf16, #tpu.memory_space<vmem>>, vector<1x4x128xbf16>
    %214 = vector.shape_cast %213 : vector<1x4x128xbf16> to vector<4x128xbf16>
    %cst_191 = arith.constant dense<0.000000e+00> : vector<64x128xf32>
    %215 = tpu.matmul %212, %214, %cst_191 {dimension_numbers = #tpu.dot_dimension_numbers<[1], [0], [0], [1], [0, 0, 1, 1], [], []>} : vector<64x4xbf16>, vector<4x128xbf16>, vector<64x128xf32> -> vector<64x128xf32>
    %216 = arith.addf %207, %215 : vector<64x128xf32>
    %c0_192 = arith.constant 0 : index
    %c0_193 = arith.constant 0 : index
    %c2_194 = arith.constant 2 : index
    %c2_195 = arith.constant 2 : index
    %c0_196 = arith.constant 0 : index
    %217 = vector.load %arg1[%c0_192, %c0_193, %c2_194, %c2_195, %c0_196] : memref<1x4x10x10x4xbf16, #tpu.memory_space<vmem>>, vector<1x1x8x8x4xbf16>
    %218 = vector.shape_cast %217 : vector<1x1x8x8x4xbf16> to vector<8x8x4xbf16>
    %219 = arith.extf %218 : vector<8x8x4xbf16> to vector<8x8x4xf32>
    %220 = vector.shape_cast %219 : vector<8x8x4xf32> to vector<64x4xf32>
    %221 = arith.truncf %220 : vector<64x4xf32> to vector<64x4xbf16>
    %c24 = arith.constant 24 : index
    %c0_197 = arith.constant 0 : index
    %c0_198 = arith.constant 0 : index
    %222 = vector.load %arg2[%c24, %c0_197, %c0_198] : memref<25x4x128xbf16, #tpu.memory_space<vmem>>, vector<1x4x128xbf16>
    %223 = vector.shape_cast %222 : vector<1x4x128xbf16> to vector<4x128xbf16>
    %cst_199 = arith.constant dense<0.000000e+00> : vector<64x128xf32>
    %224 = tpu.matmul %221, %223, %cst_199 {dimension_numbers = #tpu.dot_dimension_numbers<[1], [0], [0], [1], [0, 0, 1, 1], [], []>} : vector<64x4xbf16>, vector<4x128xbf16>, vector<64x128xf32> -> vector<64x128xf32>
    %225 = arith.addf %216, %224 : vector<64x128xf32>
    %c0_200 = arith.constant 0 : index
    %c0_201 = arith.constant 0 : index
    %226 = vector.load %arg3[%c0_200, %c0_201] : memref<1x128xf32, #tpu.memory_space<vmem>>, vector<1x128xf32>
    %227 = vector.broadcast %226 : vector<1x128xf32> to vector<64x128xf32>
    %228 = arith.addf %225, %227 : vector<64x128xf32>
    %cst_202 = arith.constant 0.000000e+00 : f32
    %229 = vector.broadcast %cst_202 : f32 to vector<64x128xf32>
    %230 = arith.maximumf %228, %229 : vector<64x128xf32>
    %cst_203 = arith.constant 0.000000e+00 : f32
    %231 = vector.broadcast %cst_203 : f32 to vector<10x10x128xf32>
    %c0_204 = arith.constant 0 : index
    %c0_205 = arith.constant 0 : index
    %c0_206 = arith.constant 0 : index
    %232 = vector.load %arg9[%c0_204, %c0_205, %c0_206] : memref<10x10x128xf32, #tpu.memory_space<vmem>>, vector<10x10x128xf32>
    tpu.vector_store %arg9[%c0_204, %c0_205, %c0_206], %231 {strides = array<i32>} : memref<10x10x128xf32, #tpu.memory_space<vmem>>, vector<10x10x128xf32>,
    %233 = vector.shape_cast %230 : vector<64x128xf32> to vector<8x8x128xf32>
    %c1_207 = arith.constant 1 : index
    %c1_208 = arith.constant 1 : index
    %c0_209 = arith.constant 0 : index
    %234 = vector.load %arg9[%c1_207, %c1_208, %c0_209] : memref<10x10x128xf32, #tpu.memory_space<vmem>>, vector<8x8x128xf32>
    tpu.vector_store %arg9[%c1_207, %c1_208, %c0_209], %233 {strides = array<i32>} : memref<10x10x128xf32, #tpu.memory_space<vmem>>, vector<8x8x128xf32>,
    %cst_210 = arith.constant 0.000000e+00 : f32
    %235 = vector.broadcast %cst_210 : f32 to vector<64x128xf32>
    %c0_211 = arith.constant 0 : index
    %c0_212 = arith.constant 0 : index
    %c0_213 = arith.constant 0 : index
    %236 = vector.load %arg9[%c0_211, %c0_212, %c0_213] : memref<10x10x128xf32, #tpu.memory_space<vmem>>, vector<8x8x128xf32>
    %237 = vector.shape_cast %236 : vector<8x8x128xf32> to vector<64x128xf32>
    %238 = arith.truncf %237 : vector<64x128xf32> to vector<64x128xbf16>
    %c0_214 = arith.constant 0 : index
    %c0_215 = arith.constant 0 : index
    %c0_216 = arith.constant 0 : index
    %239 = vector.load %arg4[%c0_214, %c0_215, %c0_216] : memref<9x128x128xbf16, #tpu.memory_space<vmem>>, vector<1x128x128xbf16>
    %240 = vector.shape_cast %239 : vector<1x128x128xbf16> to vector<128x128xbf16>
    %cst_217 = arith.constant dense<0.000000e+00> : vector<64x128xf32>
    %241 = tpu.matmul %238, %240, %cst_217 {dimension_numbers = #tpu.dot_dimension_numbers<[1], [0], [0], [1], [0, 0, 1, 1], [], []>} : vector<64x128xbf16>, vector<128x128xbf16>, vector<64x128xf32> -> vector<64x128xf32>
    %242 = arith.addf %235, %241 : vector<64x128xf32>
    %c0_218 = arith.constant 0 : index
    %c1_219 = arith.constant 1 : index
    %c0_220 = arith.constant 0 : index
    %243 = vector.load %arg9[%c0_218, %c1_219, %c0_220] : memref<10x10x128xf32, #tpu.memory_space<vmem>>, vector<8x8x128xf32>
    %244 = vector.shape_cast %243 : vector<8x8x128xf32> to vector<64x128xf32>
    %245 = arith.truncf %244 : vector<64x128xf32> to vector<64x128xbf16>
    %c1_221 = arith.constant 1 : index
    %c0_222 = arith.constant 0 : index
    %c0_223 = arith.constant 0 : index
    %246 = vector.load %arg4[%c1_221, %c0_222, %c0_223] : memref<9x128x128xbf16, #tpu.memory_space<vmem>>, vector<1x128x128xbf16>
    %247 = vector.shape_cast %246 : vector<1x128x128xbf16> to vector<128x128xbf16>
    %cst_224 = arith.constant dense<0.000000e+00> : vector<64x128xf32>
    %248 = tpu.matmul %245, %247, %cst_224 {dimension_numbers = #tpu.dot_dimension_numbers<[1], [0], [0], [1], [0, 0, 1, 1], [], []>} : vector<64x128xbf16>, vector<128x128xbf16>, vector<64x128xf32> -> vector<64x128xf32>
    %249 = arith.addf %242, %248 : vector<64x128xf32>
    %c0_225 = arith.constant 0 : index
    %c2_226 = arith.constant 2 : index
    %c0_227 = arith.constant 0 : index
    %250 = vector.load %arg9[%c0_225, %c2_226, %c0_227] : memref<10x10x128xf32, #tpu.memory_space<vmem>>, vector<8x8x128xf32>
    %251 = vector.shape_cast %250 : vector<8x8x128xf32> to vector<64x128xf32>
    %252 = arith.truncf %251 : vector<64x128xf32> to vector<64x128xbf16>
    %c2_228 = arith.constant 2 : index
    %c0_229 = arith.constant 0 : index
    %c0_230 = arith.constant 0 : index
    %253 = vector.load %arg4[%c2_228, %c0_229, %c0_230] : memref<9x128x128xbf16, #tpu.memory_space<vmem>>, vector<1x128x128xbf16>
    %254 = vector.shape_cast %253 : vector<1x128x128xbf16> to vector<128x128xbf16>
    %cst_231 = arith.constant dense<0.000000e+00> : vector<64x128xf32>
    %255 = tpu.matmul %252, %254, %cst_231 {dimension_numbers = #tpu.dot_dimension_numbers<[1], [0], [0], [1], [0, 0, 1, 1], [], []>} : vector<64x128xbf16>, vector<128x128xbf16>, vector<64x128xf32> -> vector<64x128xf32>
    %256 = arith.addf %249, %255 : vector<64x128xf32>
    %c1_232 = arith.constant 1 : index
    %c0_233 = arith.constant 0 : index
    %c0_234 = arith.constant 0 : index
    %257 = vector.load %arg9[%c1_232, %c0_233, %c0_234] : memref<10x10x128xf32, #tpu.memory_space<vmem>>, vector<8x8x128xf32>
    %258 = vector.shape_cast %257 : vector<8x8x128xf32> to vector<64x128xf32>
    %259 = arith.truncf %258 : vector<64x128xf32> to vector<64x128xbf16>
    %c3_235 = arith.constant 3 : index
    %c0_236 = arith.constant 0 : index
    %c0_237 = arith.constant 0 : index
    %260 = vector.load %arg4[%c3_235, %c0_236, %c0_237] : memref<9x128x128xbf16, #tpu.memory_space<vmem>>, vector<1x128x128xbf16>
    %261 = vector.shape_cast %260 : vector<1x128x128xbf16> to vector<128x128xbf16>
    %cst_238 = arith.constant dense<0.000000e+00> : vector<64x128xf32>
    %262 = tpu.matmul %259, %261, %cst_238 {dimension_numbers = #tpu.dot_dimension_numbers<[1], [0], [0], [1], [0, 0, 1, 1], [], []>} : vector<64x128xbf16>, vector<128x128xbf16>, vector<64x128xf32> -> vector<64x128xf32>
    %263 = arith.addf %256, %262 : vector<64x128xf32>
    %c1_239 = arith.constant 1 : index
    %c1_240 = arith.constant 1 : index
    %c0_241 = arith.constant 0 : index
    %264 = vector.load %arg9[%c1_239, %c1_240, %c0_241] : memref<10x10x128xf32, #tpu.memory_space<vmem>>, vector<8x8x128xf32>
    %265 = vector.shape_cast %264 : vector<8x8x128xf32> to vector<64x128xf32>
    %266 = arith.truncf %265 : vector<64x128xf32> to vector<64x128xbf16>
    %c4_242 = arith.constant 4 : index
    %c0_243 = arith.constant 0 : index
    %c0_244 = arith.constant 0 : index
    %267 = vector.load %arg4[%c4_242, %c0_243, %c0_244] : memref<9x128x128xbf16, #tpu.memory_space<vmem>>, vector<1x128x128xbf16>
    %268 = vector.shape_cast %267 : vector<1x128x128xbf16> to vector<128x128xbf16>
    %cst_245 = arith.constant dense<0.000000e+00> : vector<64x128xf32>
    %269 = tpu.matmul %266, %268, %cst_245 {dimension_numbers = #tpu.dot_dimension_numbers<[1], [0], [0], [1], [0, 0, 1, 1], [], []>} : vector<64x128xbf16>, vector<128x128xbf16>, vector<64x128xf32> -> vector<64x128xf32>
    %270 = arith.addf %263, %269 : vector<64x128xf32>
    %c1_246 = arith.constant 1 : index
    %c2_247 = arith.constant 2 : index
    %c0_248 = arith.constant 0 : index
    %271 = vector.load %arg9[%c1_246, %c2_247, %c0_248] : memref<10x10x128xf32, #tpu.memory_space<vmem>>, vector<8x8x128xf32>
    %272 = vector.shape_cast %271 : vector<8x8x128xf32> to vector<64x128xf32>
    %273 = arith.truncf %272 : vector<64x128xf32> to vector<64x128xbf16>
    %c5_249 = arith.constant 5 : index
    %c0_250 = arith.constant 0 : index
    %c0_251 = arith.constant 0 : index
    %274 = vector.load %arg4[%c5_249, %c0_250, %c0_251] : memref<9x128x128xbf16, #tpu.memory_space<vmem>>, vector<1x128x128xbf16>
    %275 = vector.shape_cast %274 : vector<1x128x128xbf16> to vector<128x128xbf16>
    %cst_252 = arith.constant dense<0.000000e+00> : vector<64x128xf32>
    %276 = tpu.matmul %273, %275, %cst_252 {dimension_numbers = #tpu.dot_dimension_numbers<[1], [0], [0], [1], [0, 0, 1, 1], [], []>} : vector<64x128xbf16>, vector<128x128xbf16>, vector<64x128xf32> -> vector<64x128xf32>
    %277 = arith.addf %270, %276 : vector<64x128xf32>
    %c2_253 = arith.constant 2 : index
    %c0_254 = arith.constant 0 : index
    %c0_255 = arith.constant 0 : index
    %278 = vector.load %arg9[%c2_253, %c0_254, %c0_255] : memref<10x10x128xf32, #tpu.memory_space<vmem>>, vector<8x8x128xf32>
    %279 = vector.shape_cast %278 : vector<8x8x128xf32> to vector<64x128xf32>
    %280 = arith.truncf %279 : vector<64x128xf32> to vector<64x128xbf16>
    %c6_256 = arith.constant 6 : index
    %c0_257 = arith.constant 0 : index
    %c0_258 = arith.constant 0 : index
    %281 = vector.load %arg4[%c6_256, %c0_257, %c0_258] : memref<9x128x128xbf16, #tpu.memory_space<vmem>>, vector<1x128x128xbf16>
    %282 = vector.shape_cast %281 : vector<1x128x128xbf16> to vector<128x128xbf16>
    %cst_259 = arith.constant dense<0.000000e+00> : vector<64x128xf32>
    %283 = tpu.matmul %280, %282, %cst_259 {dimension_numbers = #tpu.dot_dimension_numbers<[1], [0], [0], [1], [0, 0, 1, 1], [], []>} : vector<64x128xbf16>, vector<128x128xbf16>, vector<64x128xf32> -> vector<64x128xf32>
    %284 = arith.addf %277, %283 : vector<64x128xf32>
    %c2_260 = arith.constant 2 : index
    %c1_261 = arith.constant 1 : index
    %c0_262 = arith.constant 0 : index
    %285 = vector.load %arg9[%c2_260, %c1_261, %c0_262] : memref<10x10x128xf32, #tpu.memory_space<vmem>>, vector<8x8x128xf32>
    %286 = vector.shape_cast %285 : vector<8x8x128xf32> to vector<64x128xf32>
    %287 = arith.truncf %286 : vector<64x128xf32> to vector<64x128xbf16>
    %c7_263 = arith.constant 7 : index
    %c0_264 = arith.constant 0 : index
    %c0_265 = arith.constant 0 : index
    %288 = vector.load %arg4[%c7_263, %c0_264, %c0_265] : memref<9x128x128xbf16, #tpu.memory_space<vmem>>, vector<1x128x128xbf16>
    %289 = vector.shape_cast %288 : vector<1x128x128xbf16> to vector<128x128xbf16>
    %cst_266 = arith.constant dense<0.000000e+00> : vector<64x128xf32>
    %290 = tpu.matmul %287, %289, %cst_266 {dimension_numbers = #tpu.dot_dimension_numbers<[1], [0], [0], [1], [0, 0, 1, 1], [], []>} : vector<64x128xbf16>, vector<128x128xbf16>, vector<64x128xf32> -> vector<64x128xf32>
    %291 = arith.addf %284, %290 : vector<64x128xf32>
    %c2_267 = arith.constant 2 : index
    %c2_268 = arith.constant 2 : index
    %c0_269 = arith.constant 0 : index
    %292 = vector.load %arg9[%c2_267, %c2_268, %c0_269] : memref<10x10x128xf32, #tpu.memory_space<vmem>>, vector<8x8x128xf32>
    %293 = vector.shape_cast %292 : vector<8x8x128xf32> to vector<64x128xf32>
    %294 = arith.truncf %293 : vector<64x128xf32> to vector<64x128xbf16>
    %c8_270 = arith.constant 8 : index
    %c0_271 = arith.constant 0 : index
    %c0_272 = arith.constant 0 : index
    %295 = vector.load %arg4[%c8_270, %c0_271, %c0_272] : memref<9x128x128xbf16, #tpu.memory_space<vmem>>, vector<1x128x128xbf16>
    %296 = vector.shape_cast %295 : vector<1x128x128xbf16> to vector<128x128xbf16>
    %cst_273 = arith.constant dense<0.000000e+00> : vector<64x128xf32>
    %297 = tpu.matmul %294, %296, %cst_273 {dimension_numbers = #tpu.dot_dimension_numbers<[1], [0], [0], [1], [0, 0, 1, 1], [], []>} : vector<64x128xbf16>, vector<128x128xbf16>, vector<64x128xf32> -> vector<64x128xf32>
    %298 = arith.addf %291, %297 : vector<64x128xf32>
    %c0_274 = arith.constant 0 : index
    %c0_275 = arith.constant 0 : index
    %299 = vector.load %arg5[%c0_274, %c0_275] : memref<1x128xf32, #tpu.memory_space<vmem>>, vector<1x128xf32>
    %300 = vector.broadcast %299 : vector<1x128xf32> to vector<64x128xf32>
    %301 = arith.addf %298, %300 : vector<64x128xf32>
    %cst_276 = arith.constant 0.000000e+00 : f32
    %302 = vector.broadcast %cst_276 : f32 to vector<64x128xf32>
    %303 = arith.maximumf %301, %302 : vector<64x128xf32>
    %cst_277 = arith.constant 0.000000e+00 : f32
    %304 = vector.broadcast %cst_277 : f32 to vector<10x10x128xf32>
    %c0_278 = arith.constant 0 : index
    %c0_279 = arith.constant 0 : index
    %c0_280 = arith.constant 0 : index
    %305 = vector.load %arg10[%c0_278, %c0_279, %c0_280] : memref<10x10x128xf32, #tpu.memory_space<vmem>>, vector<10x10x128xf32>
    tpu.vector_store %arg10[%c0_278, %c0_279, %c0_280], %304 {strides = array<i32>} : memref<10x10x128xf32, #tpu.memory_space<vmem>>, vector<10x10x128xf32>,
    %306 = vector.shape_cast %303 : vector<64x128xf32> to vector<8x8x128xf32>
    %c1_281 = arith.constant 1 : index
    %c1_282 = arith.constant 1 : index
    %c0_283 = arith.constant 0 : index
    %307 = vector.load %arg10[%c1_281, %c1_282, %c0_283] : memref<10x10x128xf32, #tpu.memory_space<vmem>>, vector<8x8x128xf32>
    tpu.vector_store %arg10[%c1_281, %c1_282, %c0_283], %306 {strides = array<i32>} : memref<10x10x128xf32, #tpu.memory_space<vmem>>, vector<8x8x128xf32>,
    %cst_284 = arith.constant 0.000000e+00 : f32
    %308 = vector.broadcast %cst_284 : f32 to vector<64x128xf32>
    %c0_285 = arith.constant 0 : index
    %c0_286 = arith.constant 0 : index
    %c0_287 = arith.constant 0 : index
    %309 = vector.load %arg10[%c0_285, %c0_286, %c0_287] : memref<10x10x128xf32, #tpu.memory_space<vmem>>, vector<8x8x128xf32>
    %310 = vector.shape_cast %309 : vector<8x8x128xf32> to vector<64x128xf32>
    %311 = arith.truncf %310 : vector<64x128xf32> to vector<64x128xbf16>
    %c0_288 = arith.constant 0 : index
    %c0_289 = arith.constant 0 : index
    %c0_290 = arith.constant 0 : index
    %312 = vector.load %arg6[%c0_288, %c0_289, %c0_290] : memref<9x128x128xbf16, #tpu.memory_space<vmem>>, vector<1x128x128xbf16>
    %313 = vector.shape_cast %312 : vector<1x128x128xbf16> to vector<128x128xbf16>
    %cst_291 = arith.constant dense<0.000000e+00> : vector<64x128xf32>
    %314 = tpu.matmul %311, %313, %cst_291 {dimension_numbers = #tpu.dot_dimension_numbers<[1], [0], [0], [1], [0, 0, 1, 1], [], []>} : vector<64x128xbf16>, vector<128x128xbf16>, vector<64x128xf32> -> vector<64x128xf32>
    %315 = arith.addf %308, %314 : vector<64x128xf32>
    %c0_292 = arith.constant 0 : index
    %c1_293 = arith.constant 1 : index
    %c0_294 = arith.constant 0 : index
    %316 = vector.load %arg10[%c0_292, %c1_293, %c0_294] : memref<10x10x128xf32, #tpu.memory_space<vmem>>, vector<8x8x128xf32>
    %317 = vector.shape_cast %316 : vector<8x8x128xf32> to vector<64x128xf32>
    %318 = arith.truncf %317 : vector<64x128xf32> to vector<64x128xbf16>
    %c1_295 = arith.constant 1 : index
    %c0_296 = arith.constant 0 : index
    %c0_297 = arith.constant 0 : index
    %319 = vector.load %arg6[%c1_295, %c0_296, %c0_297] : memref<9x128x128xbf16, #tpu.memory_space<vmem>>, vector<1x128x128xbf16>
    %320 = vector.shape_cast %319 : vector<1x128x128xbf16> to vector<128x128xbf16>
    %cst_298 = arith.constant dense<0.000000e+00> : vector<64x128xf32>
    %321 = tpu.matmul %318, %320, %cst_298 {dimension_numbers = #tpu.dot_dimension_numbers<[1], [0], [0], [1], [0, 0, 1, 1], [], []>} : vector<64x128xbf16>, vector<128x128xbf16>, vector<64x128xf32> -> vector<64x128xf32>
    %322 = arith.addf %315, %321 : vector<64x128xf32>
    %c0_299 = arith.constant 0 : index
    %c2_300 = arith.constant 2 : index
    %c0_301 = arith.constant 0 : index
    %323 = vector.load %arg10[%c0_299, %c2_300, %c0_301] : memref<10x10x128xf32, #tpu.memory_space<vmem>>, vector<8x8x128xf32>
    %324 = vector.shape_cast %323 : vector<8x8x128xf32> to vector<64x128xf32>
    %325 = arith.truncf %324 : vector<64x128xf32> to vector<64x128xbf16>
    %c2_302 = arith.constant 2 : index
    %c0_303 = arith.constant 0 : index
    %c0_304 = arith.constant 0 : index
    %326 = vector.load %arg6[%c2_302, %c0_303, %c0_304] : memref<9x128x128xbf16, #tpu.memory_space<vmem>>, vector<1x128x128xbf16>
    %327 = vector.shape_cast %326 : vector<1x128x128xbf16> to vector<128x128xbf16>
    %cst_305 = arith.constant dense<0.000000e+00> : vector<64x128xf32>
    %328 = tpu.matmul %325, %327, %cst_305 {dimension_numbers = #tpu.dot_dimension_numbers<[1], [0], [0], [1], [0, 0, 1, 1], [], []>} : vector<64x128xbf16>, vector<128x128xbf16>, vector<64x128xf32> -> vector<64x128xf32>
    %329 = arith.addf %322, %328 : vector<64x128xf32>
    %c1_306 = arith.constant 1 : index
    %c0_307 = arith.constant 0 : index
    %c0_308 = arith.constant 0 : index
    %330 = vector.load %arg10[%c1_306, %c0_307, %c0_308] : memref<10x10x128xf32, #tpu.memory_space<vmem>>, vector<8x8x128xf32>
    %331 = vector.shape_cast %330 : vector<8x8x128xf32> to vector<64x128xf32>
    %332 = arith.truncf %331 : vector<64x128xf32> to vector<64x128xbf16>
    %c3_309 = arith.constant 3 : index
    %c0_310 = arith.constant 0 : index
    %c0_311 = arith.constant 0 : index
    %333 = vector.load %arg6[%c3_309, %c0_310, %c0_311] : memref<9x128x128xbf16, #tpu.memory_space<vmem>>, vector<1x128x128xbf16>
    %334 = vector.shape_cast %333 : vector<1x128x128xbf16> to vector<128x128xbf16>
    %cst_312 = arith.constant dense<0.000000e+00> : vector<64x128xf32>
    %335 = tpu.matmul %332, %334, %cst_312 {dimension_numbers = #tpu.dot_dimension_numbers<[1], [0], [0], [1], [0, 0, 1, 1], [], []>} : vector<64x128xbf16>, vector<128x128xbf16>, vector<64x128xf32> -> vector<64x128xf32>
    %336 = arith.addf %329, %335 : vector<64x128xf32>
    %c1_313 = arith.constant 1 : index
    %c1_314 = arith.constant 1 : index
    %c0_315 = arith.constant 0 : index
    %337 = vector.load %arg10[%c1_313, %c1_314, %c0_315] : memref<10x10x128xf32, #tpu.memory_space<vmem>>, vector<8x8x128xf32>
    %338 = vector.shape_cast %337 : vector<8x8x128xf32> to vector<64x128xf32>
    %339 = arith.truncf %338 : vector<64x128xf32> to vector<64x128xbf16>
    %c4_316 = arith.constant 4 : index
    %c0_317 = arith.constant 0 : index
    %c0_318 = arith.constant 0 : index
    %340 = vector.load %arg6[%c4_316, %c0_317, %c0_318] : memref<9x128x128xbf16, #tpu.memory_space<vmem>>, vector<1x128x128xbf16>
    %341 = vector.shape_cast %340 : vector<1x128x128xbf16> to vector<128x128xbf16>
    %cst_319 = arith.constant dense<0.000000e+00> : vector<64x128xf32>
    %342 = tpu.matmul %339, %341, %cst_319 {dimension_numbers = #tpu.dot_dimension_numbers<[1], [0], [0], [1], [0, 0, 1, 1], [], []>} : vector<64x128xbf16>, vector<128x128xbf16>, vector<64x128xf32> -> vector<64x128xf32>
    %343 = arith.addf %336, %342 : vector<64x128xf32>
    %c1_320 = arith.constant 1 : index
    %c2_321 = arith.constant 2 : index
    %c0_322 = arith.constant 0 : index
    %344 = vector.load %arg10[%c1_320, %c2_321, %c0_322] : memref<10x10x128xf32, #tpu.memory_space<vmem>>, vector<8x8x128xf32>
    %345 = vector.shape_cast %344 : vector<8x8x128xf32> to vector<64x128xf32>
    %346 = arith.truncf %345 : vector<64x128xf32> to vector<64x128xbf16>
    %c5_323 = arith.constant 5 : index
    %c0_324 = arith.constant 0 : index
    %c0_325 = arith.constant 0 : index
    %347 = vector.load %arg6[%c5_323, %c0_324, %c0_325] : memref<9x128x128xbf16, #tpu.memory_space<vmem>>, vector<1x128x128xbf16>
    %348 = vector.shape_cast %347 : vector<1x128x128xbf16> to vector<128x128xbf16>
    %cst_326 = arith.constant dense<0.000000e+00> : vector<64x128xf32>
    %349 = tpu.matmul %346, %348, %cst_326 {dimension_numbers = #tpu.dot_dimension_numbers<[1], [0], [0], [1], [0, 0, 1, 1], [], []>} : vector<64x128xbf16>, vector<128x128xbf16>, vector<64x128xf32> -> vector<64x128xf32>
    %350 = arith.addf %343, %349 : vector<64x128xf32>
    %c2_327 = arith.constant 2 : index
    %c0_328 = arith.constant 0 : index
    %c0_329 = arith.constant 0 : index
    %351 = vector.load %arg10[%c2_327, %c0_328, %c0_329] : memref<10x10x128xf32, #tpu.memory_space<vmem>>, vector<8x8x128xf32>
    %352 = vector.shape_cast %351 : vector<8x8x128xf32> to vector<64x128xf32>
    %353 = arith.truncf %352 : vector<64x128xf32> to vector<64x128xbf16>
    %c6_330 = arith.constant 6 : index
    %c0_331 = arith.constant 0 : index
    %c0_332 = arith.constant 0 : index
    %354 = vector.load %arg6[%c6_330, %c0_331, %c0_332] : memref<9x128x128xbf16, #tpu.memory_space<vmem>>, vector<1x128x128xbf16>
    %355 = vector.shape_cast %354 : vector<1x128x128xbf16> to vector<128x128xbf16>
    %cst_333 = arith.constant dense<0.000000e+00> : vector<64x128xf32>
    %356 = tpu.matmul %353, %355, %cst_333 {dimension_numbers = #tpu.dot_dimension_numbers<[1], [0], [0], [1], [0, 0, 1, 1], [], []>} : vector<64x128xbf16>, vector<128x128xbf16>, vector<64x128xf32> -> vector<64x128xf32>
    %357 = arith.addf %350, %356 : vector<64x128xf32>
    %c2_334 = arith.constant 2 : index
    %c1_335 = arith.constant 1 : index
    %c0_336 = arith.constant 0 : index
    %358 = vector.load %arg10[%c2_334, %c1_335, %c0_336] : memref<10x10x128xf32, #tpu.memory_space<vmem>>, vector<8x8x128xf32>
    %359 = vector.shape_cast %358 : vector<8x8x128xf32> to vector<64x128xf32>
    %360 = arith.truncf %359 : vector<64x128xf32> to vector<64x128xbf16>
    %c7_337 = arith.constant 7 : index
    %c0_338 = arith.constant 0 : index
    %c0_339 = arith.constant 0 : index
    %361 = vector.load %arg6[%c7_337, %c0_338, %c0_339] : memref<9x128x128xbf16, #tpu.memory_space<vmem>>, vector<1x128x128xbf16>
    %362 = vector.shape_cast %361 : vector<1x128x128xbf16> to vector<128x128xbf16>
    %cst_340 = arith.constant dense<0.000000e+00> : vector<64x128xf32>
    %363 = tpu.matmul %360, %362, %cst_340 {dimension_numbers = #tpu.dot_dimension_numbers<[1], [0], [0], [1], [0, 0, 1, 1], [], []>} : vector<64x128xbf16>, vector<128x128xbf16>, vector<64x128xf32> -> vector<64x128xf32>
    %364 = arith.addf %357, %363 : vector<64x128xf32>
    %c2_341 = arith.constant 2 : index
    %c2_342 = arith.constant 2 : index
    %c0_343 = arith.constant 0 : index
    %365 = vector.load %arg10[%c2_341, %c2_342, %c0_343] : memref<10x10x128xf32, #tpu.memory_space<vmem>>, vector<8x8x128xf32>
    %366 = vector.shape_cast %365 : vector<8x8x128xf32> to vector<64x128xf32>
    %367 = arith.truncf %366 : vector<64x128xf32> to vector<64x128xbf16>
    %c8_344 = arith.constant 8 : index
    %c0_345 = arith.constant 0 : index
    %c0_346 = arith.constant 0 : index
    %368 = vector.load %arg6[%c8_344, %c0_345, %c0_346] : memref<9x128x128xbf16, #tpu.memory_space<vmem>>, vector<1x128x128xbf16>
    %369 = vector.shape_cast %368 : vector<1x128x128xbf16> to vector<128x128xbf16>
    %cst_347 = arith.constant dense<0.000000e+00> : vector<64x128xf32>
    %370 = tpu.matmul %367, %369, %cst_347 {dimension_numbers = #tpu.dot_dimension_numbers<[1], [0], [0], [1], [0, 0, 1, 1], [], []>} : vector<64x128xbf16>, vector<128x128xbf16>, vector<64x128xf32> -> vector<64x128xf32>
    %371 = arith.addf %364, %370 : vector<64x128xf32>
    %c0_348 = arith.constant 0 : index
    %c0_349 = arith.constant 0 : index
    %372 = vector.load %arg7[%c0_348, %c0_349] : memref<1x128xf32, #tpu.memory_space<vmem>>, vector<1x128xf32>
    %373 = vector.broadcast %372 : vector<1x128xf32> to vector<64x128xf32>
    %374 = arith.addf %371, %373 : vector<64x128xf32>
    %c1_350 = arith.constant 1 : index
    %c1_351 = arith.constant 1 : index
    %c0_352 = arith.constant 0 : index
    %375 = vector.load %arg9[%c1_350, %c1_351, %c0_352] : memref<10x10x128xf32, #tpu.memory_space<vmem>>, vector<8x8x128xf32>
    %376 = vector.shape_cast %375 : vector<8x8x128xf32> to vector<64x128xf32>
    %377 = arith.addf %374, %376 : vector<64x128xf32>
    %cst_353 = arith.constant 0.000000e+00 : f32
    %378 = vector.broadcast %cst_353 : f32 to vector<64x128xf32>
    %379 = arith.maximumf %377, %378 : vector<64x128xf32>
    %380 = vector.extract_strided_slice %379 {offsets = [0, 0], sizes = [64, 8], strides = [1, 1]} : vector<64x128xf32> to vector<64x8xf32>
    %381 = vector.shape_cast %380 : vector<64x8xf32> to vector<8x8x8xf32>
    %c0_354 = arith.constant 0 : index
    %c0_355 = arith.constant 0 : index
    %c0_356 = arith.constant 0 : index
    %c0_357 = arith.constant 0 : index
    %382 = vector.load %arg8[%c0_354, %c0_355, %c0_356, %c0_357] : memref<1x8x8x8xf32, #tpu.memory_space<vmem>>, vector<1x8x8x8xf32>
    %383 = vector.shape_cast %382 : vector<1x8x8x8xf32> to vector<8x8x8xf32>
    %384 = vector.shape_cast %381 : vector<8x8x8xf32> to vector<1x8x8x8xf32>
    tpu.vector_store %arg8[%c0_354, %c0_355, %c0_356, %c0_357], %384 {strides = array<i32>} : memref<1x8x8x8xf32, #tpu.memory_space<vmem>>, vector<1x8x8x8xf32>,
    return
  }
  func.func @transform_0(%arg0: i32) -> (i32, i32, i32, i32, i32) {
    %c0_i32 = arith.constant 0 : i32
    %c0_i32_0 = arith.constant 0 : i32
    %c0_i32_1 = arith.constant 0 : i32
    %c0_i32_2 = arith.constant 0 : i32
    %c0_i32_3 = arith.constant 0 : i32
    return %arg0, %c0_i32, %c0_i32_0, %c0_i32_1, %c0_i32_2 : i32, i32, i32, i32, i32
  }
  func.func @transform_1(%arg0: i32) -> (i32, i32, i32) {
    %c0_i32 = arith.constant 0 : i32
    %c0_i32_0 = arith.constant 0 : i32
    %c0_i32_1 = arith.constant 0 : i32
    %c0_i32_2 = arith.constant 0 : i32
    return %c0_i32, %c0_i32_0, %c0_i32_1 : i32, i32, i32
  }
  func.func @transform_2(%arg0: i32) -> (i32, i32) {
    %c0_i32 = arith.constant 0 : i32
    %c0_i32_0 = arith.constant 0 : i32
    %c0_i32_1 = arith.constant 0 : i32
    return %c0_i32, %c0_i32_0 : i32, i32
  }
  func.func @transform_3(%arg0: i32) -> (i32, i32, i32) {
    %c0_i32 = arith.constant 0 : i32
    %c0_i32_0 = arith.constant 0 : i32
    %c0_i32_1 = arith.constant 0 : i32
    %c0_i32_2 = arith.constant 0 : i32
    return %c0_i32, %c0_i32_0, %c0_i32_1 : i32, i32, i32
  }
  func.func @transform_4(%arg0: i32) -> (i32, i32) {
    %c0_i32 = arith.constant 0 : i32
    %c0_i32_0 = arith.constant 0 : i32
    %c0_i32_1 = arith.constant 0 : i32
    return %c0_i32, %c0_i32_0 : i32, i32
  }
  func.func @transform_5(%arg0: i32) -> (i32, i32, i32) {
    %c0_i32 = arith.constant 0 : i32
    %c0_i32_0 = arith.constant 0 : i32
    %c0_i32_1 = arith.constant 0 : i32
    %c0_i32_2 = arith.constant 0 : i32
    return %c0_i32, %c0_i32_0, %c0_i32_1 : i32, i32, i32
  }
  func.func @transform_6(%arg0: i32) -> (i32, i32) {
    %c0_i32 = arith.constant 0 : i32
    %c0_i32_0 = arith.constant 0 : i32
    %c0_i32_1 = arith.constant 0 : i32
    return %c0_i32, %c0_i32_0 : i32, i32
  }
  func.func @transform_7(%arg0: i32) -> (i32, i32, i32, i32) {
    %c0_i32 = arith.constant 0 : i32
    %c0_i32_0 = arith.constant 0 : i32
    %c0_i32_1 = arith.constant 0 : i32
    %c0_i32_2 = arith.constant 0 : i32
    return %arg0, %c0_i32, %c0_i32_0, %c0_i32_1 : i32, i32, i32, i32
  }
}

</mosaic_0001>

<bundles_post_ra>
// kernel: _lambda_.1
= control target key start
LH: loop header
LB: loop body
LE: loop exit
PB: predicated region body
PF: predicated region fallthrough
CT: control target
= control target key end

     0   :  { %s9179_s24 = smov 0   ;;  %s10843_s0 = inlined_call_operand.vmem [shape: bf16[2,4,10,10,4], index: 0, kind: input, shape index: {}]   ;;  %s10844_s1 = inlined_call_operand.vmem [shape: bf16[25,4,128], index: 1, kind: input, shape index: {}]   ;;  %s10845_s2 = inlined_call_operand.vmem [shape: f32[1,128], index: 2, kind: input, shape index: {}]   ;;  %s10846_s3 = inlined_call_operand.vmem [shape: bf16[9,128,128], index: 3, kind: input, shape index: {}]   ;;  %s10847_s4 = inlined_call_operand.vmem [shape: f32[1,128], index: 4, kind: input, shape index: {}]   ;;  %s10848_s5 = inlined_call_operand.vmem [shape: bf16[9,128,128], index: 5, kind: input, shape index: {}]   ;;  %s10849_s6 = inlined_call_operand.vmem [shape: f32[1,128], index: 6, kind: input, shape index: {}]   ;;  %s10850_s7 = inlined_call_operand.vmem [shape: f32[2,8,8,8], index: 7, kind: output, shape index: {}]  }
   0x1 LB: > { %s6741_s25 = sadd.s32 4294967295, %s9136_s24   ;;  %p6745_p0 = scmp.ge.s32.totalorder %s9136_s24, 1  ;;  %s9136_s24 = sphi %s9179_s24, %s17_s24  }
   0x2   : > { %p237_p1 = scmp.lt.s32.totalorder %s9136_s24, 3 }
   0x4   : > { %p238_p2 = pnand %p6745_p0, %p237_p1 }
   0x5   : > { %v6765_v0 = vld [vmem:[%s10844_s1 + $0x2] sm:$0x3] (!%p238_p2)  ;;  %vm337_vm0 = vcmask (!%p238_p2), 1041408   ;;  %p269_p3 = scmp.lt.s32.totalorder (!%p238_p2), %s6741_s25, 1  ;;  %v300_v2 = vld [vmem:[%s10844_s1] sm:$0x3] (!%p238_p2) }
   0x6   : > { %241 = sbr.rel (%p238_p2) target bundleno = 1502 (0x5de), region = 48  ;;  %8910 = vmatprep.subr.msk.bf16.mxu0 (!%p238_p2), %vm337_vm0, %v6765_v0  ;;  %v339_v1 = vsel (!%p238_p2), %vm337_vm0, %v6765_v0, 0  ;;  %vm324_vm1 = vcmask (!%p238_p2), 31744   ;;  %v419_v3 = vsel (!%p238_p2), %vm337_vm0, %v300_v2, 0  ;;  %v6774_v5 = vld [vmem:[%s10844_s1 + $0x4] sm:$0x3] (!%p238_p2) }
   0x7   : > { %7909 = vmatpush3.bf16.msra.mxu0 (!%p238_p2), %v339_v1  ;;  %v586_v21 = vsel (!%p238_p2), %vm337_vm0, %v6774_v5, 0  ;;  %vm534_vm2 = vcmask (!%p238_p2), 1046528   ;;  %v6795_v34 = vld [vmem:[%s10844_s1 + $0x6] sm:$0x3] (!%p238_p2)  ;;  %vm859_vm3 = vcmask (!%p238_p2), 1045504   ;;  %vm6677_vm4 = vcmask (!%p238_p2), 64512  }
   0x8   : > { %8911 = vmatprep.subr.msk.bf16.mxu0 (!%p238_p2), %vm337_vm0, %v300_v2 }
   0xd   : > { %s10852_s25 = smov (!%p269_p3, %s6741_s25), 1 }
   0xe   : > { %s8935_s30 = smul.u32 320, %s10852_s25  ;;  %s7566_s17 = sshll.u32 %s10852_s25, 6 }
   0xf   : > { %s10822_s20 = scalar_lea.vmem %s10850_s7, %s7566_s17 }
  0x10   : > { %s9202_s10 = scalar_lea.vmem %s10843_s0, %s8935_s30 }
  0x11   : > { %v8945_v4 = vld [vmem:[%s9202_s10 + $0x50] ss:$8 sps:$4 sm:$0xff]   ;;  %v8946_v6 = vld [vmem:[%s9202_s10 + $0x60] ss:$8 sps:$4 sm:$0xff]   ;;  %v9219_v11 = vld [vmem:[%s9202_s10 + $0x4] sm:$0x1] }
  0x12   : > { %7910 = vmatprep.mubr.msk.bf16.mxu0 %vm324_vm1, %v8945_v4  ;;  %v8947_v7 = vld [vmem:[%s9202_s10 + $0x70] ss:$8 sps:$4 sm:$0xff]   ;;  %v8948_v8 = vld [vmem:[%s9202_s10 + $0x80] ss:$8 sps:$4 sm:$0xff]   ;;  %v9222_v12 = vld [vmem:[%s9202_s10 + $0xc] sm:$0x1]  ;;  %v503_v14 = vunpack.c.l.bf16 %v9219_v11 }
  0x13   : > { %7911 = vmatmul.mubr.msk.bf16.vlgmr.msra.gmra.mrb[0].mxu0 %vm324_vm1, %v8946_v6  ;;  %v8949_v9 = vld [vmem:[%s9202_s10] ss:$8 sps:$4 sm:$0xff]   ;;  %v505_v16 = vunpack.c.l.bf16 %v9222_v12  ;;  %v490_v17 = vld [vmem:[%s9202_s10 + $0x10] ss:$8 sps:$4 sm:$0xff]   ;;  %v9230_v18 = vld [vmem:[%s9202_s10 + $0x14] sm:$0x1] }
  0x14   : > { %7919 = vmatpush3.bf16.msra.mxu0 %v419_v3  ;;  %7914 = vmatprep.mubr.msk.bf16.mxu0 %vm324_vm1, %v8947_v7  ;;  %v486_v10 = vld [vmem:[%s9202_s10] ss:$8 sps:$4 sm:$0xff]   ;;  %v9233_v19 = vld [vmem:[%s9202_s10 + $0x1c] sm:$0x1]  ;;  %v8950_v20 = vld [vmem:[%s9202_s10 + $0x10] ss:$8 sps:$4 sm:$0xff]   ;;  %v506_v23 = vunpack.c.l.bf16 %v490_v17  ;;  %v507_v24 = vunpack.c.l.bf16 %v9230_v18  ;;  %v508_v25 = vunpack.c.h.bf16 %v490_v17 }
  0x15   : > { %8912 = vmatprep.subr.msk.bf16.mxu0 %vm337_vm0, %v6774_v5  ;;  %v502_v13 = vunpack.c.l.bf16 %v486_v10  ;;  %v504_v15 = vunpack.c.h.bf16 %v486_v10  ;;  %v8951_v22 = vld [vmem:[%s9202_s10 + $0x20] ss:$8 sps:$4 sm:$0xff]   ;;  %v509_v26 = vunpack.c.l.bf16 %v9233_v19  ;;  %v9242_v28 = vld [vmem:[%s9202_s10 + $0x24] sm:$0x1]  ;;  %v536_v30 = vrot.slane %v503_v14, 1 }
  0x16   : > { %v494_v27 = vld [vmem:[%s9202_s10 + $0x20] ss:$8 sps:$4 sm:$0xff]   ;;  %v539_v32 = vrot.slane %v505_v16, 1  ;;  %v9249_v33 = vld [vmem:[%s9202_s10 + $0x2c] sm:$0x1]  ;;  %v511_v36 = vunpack.c.l.bf16 %v9242_v28  ;;  %v541_v37 = vrot.slane %v506_v23, 1 }
  0x17   : > { %v535_v29 = vrot.slane %v502_v13, 1  ;;  %v538_v31 = vrot.slane %v504_v15, 1  ;;  %v510_v35 = vunpack.c.l.bf16 %v494_v27  ;;  %v542_v38 = vrot.slane %v507_v24, 1  ;;  %v8952_v41 = vld [vmem:[%s9202_s10 + $0x30] ss:$8 sps:$4 sm:$0xff]  }
  0x18   : > { %v512_v39 = vunpack.c.h.bf16 %v494_v27  ;;  %v513_v40 = vunpack.c.l.bf16 %v9249_v33  ;;  %v544_v44 = vrot.slane %v508_v25, 1  ;;  %v545_v45 = vrot.slane %v509_v26, 1  ;;  %v498_v46 = vld [vmem:[%s9202_s10 + $0x30] ss:$8 sps:$4 sm:$0xff]   ;;  %v9268_v47 = vld [vmem:[%s9202_s10 + $0x34] sm:$0x1] }
  0x19   : > { %v537_v42 = vsel %vm534_vm2, %v535_v29, %v536_v30  ;;  %v540_v43 = vsel %vm534_vm2, %v538_v31, %v539_v32  ;;  %v9271_v48 = vld [vmem:[%s9202_s10 + $0x3c] sm:$0x1]  ;;  %v547_v49 = vrot.slane %v510_v35, 1  ;;  %v548_v50 = vrot.slane %v511_v36, 1  ;;  %v6779_v51 = vld [vmem:[%s9202_s10 + $0x50] ss:$8 sps:$4 sm:$0xff]  }
  0x1a   : > { %v567_v52 = vpack.c.bf16 %v540_v43, %v537_v42  ;;  %v550_v53 = vrot.slane %v512_v39, 1  ;;  %v551_v54 = vrot.slane %v513_v40, 1  ;;  %v6780_v55 = vld [vmem:[%s9202_s10 + $0x54] sm:$0x1]  ;;  %v6782_v56 = vld [vmem:[%s9202_s10 + $0x5c] sm:$0x1]  ;;  %v543_v57 = vsel %vm534_vm2, %v541_v37, %v542_v38 }
  0x1b   : > { %7915 = vmatmul.mubr.msk.bf16.gmra.mrb[4].mxu0 %vm324_vm1, %v8948_v8  ;;  %v546_v58 = vsel %vm534_vm2, %v544_v44, %v545_v45  ;;  %v514_v59 = vunpack.c.l.bf16 %v498_v46  ;;  %v515_v60 = vunpack.c.l.bf16 %v9268_v47  ;;  %v549_v61 = vsel %vm534_vm2, %v547_v49, %v548_v50  ;;  %v6783_v8 = vld [vmem:[%s9202_s10 + $0x60] ss:$8 sps:$4 sm:$0xff]   ;;  %v6786_v27 = vld [vmem:[%s9202_s10 + $0x6c] sm:$0x1]  ;;  %v6787_v29 = vld [vmem:[%s9202_s10 + $0x70] ss:$8 sps:$4 sm:$0xff]  }
  0x1c   : > { %7920 = vmatprep.mubr.msk.bf16.mxu0 %vm324_vm1, %v8949_v9  ;;  %v516_v62 = vunpack.c.h.bf16 %v498_v46  ;;  %v517_v63 = vunpack.c.l.bf16 %v9271_v48  ;;  %v677_v0 = vunpack.c.l.bf16 %v6779_v51  ;;  %v552_v1 = vsel %vm534_vm2, %v550_v53, %v551_v54  ;;  %v6784_v9 = vld [vmem:[%s9202_s10 + $0x64] sm:$0x1]  ;;  %v6800_v25 = vld [vmem:[%s10844_s1 + $0x8] sm:$0x3]  ;;  %v6788_v30 = vld [vmem:[%s9202_s10 + $0x74] sm:$0x1] }
  0x1d   : > { %v678_v2 = vunpack.c.l.bf16 %v6780_v55  ;;  %v679_v3 = vunpack.c.h.bf16 %v6779_v51  ;;  %v680_v4 = vunpack.c.l.bf16 %v6782_v56  ;;  %v568_v5 = vpack.c.bf16 %v546_v58, %v543_v57  ;;  %v6790_v31 = vld [vmem:[%s9202_s10 + $0x7c] sm:$0x1]  ;;  %v6791_v55 = vld [vmem:[%s9202_s10 + $0x80] ss:$8 sps:$4 sm:$0xff]   ;;  %v6792_v56 = vld [vmem:[%s9202_s10 + $0x84] sm:$0x1] }
  0x1e   : > { %v760_v6 = vsel %vm337_vm0, %v6795_v34, 0  ;;  %v553_v7 = vrot.slane %v514_v59, 1  ;;  %v569_v10 = vpack.c.bf16 %v552_v1, %v549_v61  ;;  %v554_v13 = vrot.slane %v515_v60, 1  ;;  %v836_v1 = vld [vmem:[%s9202_s10 + $0x8] sm:$0xe] }
  0x1f   : > { %v556_v15 = vrot.slane %v516_v62, 1  ;;  %v557_v17 = vrot.slane %v517_v63, 1  ;;  %v713_v23 = vrot.slane %v680_v4, 1  ;;  %v681_v35 = vunpack.c.l.bf16 %v6783_v8  ;;  %v6794_v62 = vld [vmem:[%s9202_s10 + $0x8c] sm:$0x1] }
  0x20   : > { %v555_v32 = vsel %vm534_vm2, %v553_v7, %v554_v13  ;;  %v682_v37 = vunpack.c.l.bf16 %v6784_v9  ;;  %v684_v42 = vunpack.c.l.bf16 %v6786_v27  ;;  %v685_v43 = vunpack.c.l.bf16 %v6787_v29 }
  0x21   : > { %v686_v44 = vunpack.c.l.bf16 %v6788_v30  ;;  %v687_v45 = vunpack.c.h.bf16 %v6787_v29  ;;  %v688_v46 = vunpack.c.l.bf16 %v6790_v31  ;;  %v715_v50 = vrot.slane %v681_v35, 1  ;;  %v6817_v29 = vld [vmem:[%s10844_s1 + $0xa] sm:$0x3]  ;;  %v837_v30 = vld [vmem:[%s9202_s10 + $0x10] sm:$0xe] }
  0x22   : > { %v716_v51 = vrot.slane %v682_v37, 1  ;;  %v719_v54 = vrot.slane %v684_v42, 1  ;;  %v721_v57 = vrot.slane %v685_v43, 1  ;;  %v692_v7 = vunpack.c.l.bf16 %v6794_v62  ;;  %v839_v37 = vld [vmem:[%s9202_s10 + $0x20] sm:$0xe] }
  0x23   : > { %7921 = vmatmul.mubr.msk.bf16.vlgmr.msra.gmra.mrb[0].mxu0 %vm324_vm1, %v8950_v20  ;;  %v709_v20 = vrot.slane %v677_v0, 1  ;;  %v722_v58 = vrot.slane %v686_v44, 1  ;;  %v724_v59 = vrot.slane %v687_v45, 1  ;;  %v725_v61 = vrot.slane %v688_v46, 1  ;;  %v835_v0 = vld [vmem:[%s9202_s10] sm:$0xe] }
  0x24   : > { %7929 = vmatpush3.bf16.msra.mxu0 %v586_v21  ;;  %7924 = vmatprep.mubr.msk.bf16.mxu0 %vm324_vm1, %v8951_v22  ;;  %v710_v21 = vrot.slane %v678_v2, 1  ;;  %v712_v22 = vrot.slane %v679_v3, 1  ;;  %v717_v2 = vsel %vm534_vm2, %v715_v50, %v716_v51  ;;  %v689_v3 = vunpack.c.l.bf16 %v6791_v55  ;;  %v842_v50 = vld [vmem:[%s9202_s10 + $0x38] sm:$0xe] }
  0x25   : > { %8913 = vmatprep.subr.msk.bf16.mxu0 %vm337_vm0, %v6795_v34  ;;  %v558_v34 = vsel %vm534_vm2, %v556_v15, %v557_v17  ;;  %v726_v9 = vsel %vm534_vm2, %v724_v59, %v725_v61  ;;  %v844_v13 = vunpack.c.l.bf16 %v836_v1  ;;  %v911_v17 = vsel %vm337_vm0, %v6800_v25, 0  ;;  %v6834_v1 = vld [vmem:[%s10844_s1 + $0xc] sm:$0x3] }
  0x26   : > { %v711_v38 = vsel %vm534_vm2, %v709_v20, %v710_v21  ;;  %v714_v39 = vsel %vm534_vm2, %v712_v22, %v713_v23  ;;  %v570_v49 = vpack.c.bf16 %v558_v34, %v555_v32  ;;  %v727_v20 = vrot.slane %v689_v3, 1  ;;  %v8954_v3 = vld [vmem:[%s9202_s10 + $0xb0] ss:$8 sps:$4 sm:$0xff]  }
  0x27   : > { %v731_v27 = vrot.slane %v692_v7, 1  ;;  %v861_v32 = vrot.slane %v503_v14, 2  ;;  %v863_v34 = vrot.slane %v844_v13, 2  ;;  %v864_v35 = vrot.slane %v505_v16, 2  ;;  %v6839_v7 = vld [vmem:[%s9202_s10 + $0xa0] ss:$8 sps:$4 sm:$0xff]  }
  0x28   : > { %v847_v16 = vunpack.c.l.bf16 %v839_v37  ;;  %v867_v46 = vrot.slane %v507_v24, 2  ;;  %v850_v59 = vunpack.c.l.bf16 %v842_v50  ;;  %v879_v33 = vrot.slane %v515_v60, 2  ;;  %v9390_v13 = vld [vmem:[%s10844_s1 + $0x10] sm:$0x3]  ;;  %v6864_v50 = vld [vmem:[%s9202_s10 + $0x100] ss:$8 sps:$4 sm:$0xff]  }
  0x29   : > { %v865_v12 = vsel %vm859_vm3, %v863_v34, %v864_v35  ;;  %v882_v62 = vrot.slane %v517_v63, 2  ;;  %v8953_v63 = vld [vmem:[%s9202_s10 + $0xa0] ss:$8 sps:$4 sm:$0xff]   ;;  %v9411_v35 = vsel %vm337_vm0, %v9390_v13, 0  ;;  %v6851_v37 = vld [vmem:[%s9202_s10 + $0xd0] ss:$8 sps:$4 sm:$0xff]  }
  0x2a   : > { %v881_v61 = vrot.slane %v850_v59, 2 }
  0x2b   : > { %7925 = vmatmul.mubr.msk.bf16.gmra.mrb[4].mxu0 %vm324_vm1, %v8952_v41  ;;  %v683_v41 = vunpack.c.h.bf16 %v6783_v8  ;;  %v723_v8 = vsel %vm534_vm2, %v721_v57, %v722_v58  ;;  %v876_v57 = vrot.slane %v513_v40, 2 }
  0x2c   : > { %7930 = vmatprep.mubr.msk.bf16.mxu0 %vm324_vm1, %v567_v52  ;;  %v741_v52 = vpack.c.bf16 %v714_v39, %v711_v38  ;;  %v743_v21 = vpack.c.bf16 %v726_v9, %v723_v8  ;;  %v840_v38 = vld [vmem:[%s9202_s10 + $0x28] sm:$0xe]  ;;  %v845_v39 = vunpack.c.l.bf16 %v837_v30  ;;  %v883_v60 = vsel %vm859_vm3, %v881_v61, %v882_v62  ;;  %v8956_v8 = vld [vmem:[%s9202_s10 + $0xd0] ss:$8 sps:$4 sm:$0xff]   ;;  %v9384_v9 = vld [vmem:[%s9202_s10 + $0xa4] sm:$0x1] }
  0x2d   : > { %v718_v53 = vrot.slane %v683_v41, 1  ;;  %v848_v43 = vunpack.c.l.bf16 %v840_v38  ;;  %v9405_v30 = vld [vmem:[%s9202_s10 + $0xc4] sm:$0x1] }
  0x2e   : > { %v866_v45 = vrot.slane %v845_v39, 2 }
  0x2f   : > { %v720_v4 = vsel %vm534_vm2, %v718_v53, %v719_v54  ;;  %v870_v53 = vrot.slane %v509_v26, 2  ;;  %v872_v54 = vrot.slane %v847_v16, 2 }
  0x30   : > { %v742_v15 = vpack.c.bf16 %v720_v4, %v717_v2  ;;  %v868_v18 = vsel %vm859_vm3, %v866_v45, %v867_v46  ;;  %v1133_v2 = vsel %vm337_vm0, %v6834_v1, 0  ;;  %v8955_v4 = vld [vmem:[%s9202_s10 + $0xc0] ss:$8 sps:$4 sm:$0xff]   ;;  %v6861_v45 = vld [vmem:[%s9202_s10 + $0xf4] sm:$0x1] }
  0x31   : > { %v8959_v46 = vld [vmem:[%s9202_s10 + $0x110] ss:$8 sps:$4 sm:$0xff]  }
  0x33   : > { %7931 = vmatmul.mubr.msk.bf16.vlgmr.msra.gmra.mrb[0].mxu0 %vm324_vm1, %v568_v5  ;;  %v690_v5 = vunpack.c.l.bf16 %v6792_v56  ;;  %v875_v56 = vrot.slane %v848_v43, 2  ;;  %v9427_v43 = vld [vmem:[%s9202_s10 + $0xdc] sm:$0x1] }
  0x34   : > { %7939 = vmatpush3.bf16.msra.mxu0 %v760_v6  ;;  %7934 = vmatprep.mubr.msk.bf16.mxu0 %vm324_vm1, %v569_v10  ;;  %v691_v6 = vunpack.c.h.bf16 %v6791_v55  ;;  %v843_v10 = vunpack.c.l.bf16 %v835_v0  ;;  %v873_v55 = vrot.slane %v511_v36, 2  ;;  %v1022_v0 = vsel %vm337_vm0, %v6817_v29, 0 }
  0x35   : > { %8914 = vmatprep.subr.msk.bf16.mxu0 %vm337_vm0, %v6800_v25  ;;  %v728_v22 = vrot.slane %v690_v5, 1  ;;  %v838_v25 = vld [vmem:[%s9202_s10 + $0x18] sm:$0xe]  ;;  %v877_v26 = vsel %vm859_vm3, %v875_v56, %v876_v57  ;;  %v6855_v5 = vld [vmem:[%s10844_s1 + $0xe] sm:$0x3] }
  0x36   : > { %v730_v23 = vrot.slane %v691_v6, 1  ;;  %v860_v31 = vrot.slane %v843_v10, 2  ;;  %v846_v14 = vunpack.c.l.bf16 %v838_v25  ;;  %v874_v19 = vsel %vm859_vm3, %v872_v54, %v873_v55  ;;  %v8957_v10 = vld [vmem:[%s9202_s10 + $0xf0] ss:$8 sps:$4 sm:$0xff]   ;;  %v9414_v25 = vld [vmem:[%s9202_s10 + $0xcc] sm:$0x1] }
  0x37   : > { %v729_v41 = vsel %vm534_vm2, %v727_v20, %v728_v22  ;;  %v894_v36 = vpack.c.bf16 %v877_v26, %v874_v19  ;;  %v1307_v6 = vsel %vm337_vm0, %v6855_v5, 0  ;;  %v1225_v20 = vunpack.c.l.bf16 %v9384_v9  ;;  %v6843_v22 = vld [vmem:[%s9202_s10 + $0xb0] ss:$8 sps:$4 sm:$0xff]  }
  0x38   : > { %v732_v11 = vsel %vm534_vm2, %v730_v23, %v731_v27  ;;  %v862_v42 = vsel %vm859_vm3, %v860_v31, %v861_v32  ;;  %v9398_v23 = vld [vmem:[%s9202_s10 + $0xb4] sm:$0x1]  ;;  %v9401_v27 = vld [vmem:[%s9202_s10 + $0xbc] sm:$0x1]  ;;  %v1228_v34 = vunpack.c.l.bf16 %v6843_v22  ;;  %v1235_v57 = vunpack.c.l.bf16 %v9414_v25 }
  0x39   : > { %v744_v44 = vpack.c.bf16 %v732_v11, %v729_v41  ;;  %v892_v51 = vpack.c.bf16 %v865_v12, %v862_v42  ;;  %v1257_v38 = vrot.slane %v1225_v20, 1  ;;  %v1229_v41 = vunpack.c.l.bf16 %v9398_v23  ;;  %v8958_v42 = vld [vmem:[%s9202_s10 + $0x100] ss:$8 sps:$4 sm:$0xff]  }
  0x3a   : > { %v1230_v11 = vunpack.c.h.bf16 %v6843_v22  ;;  %v1231_v12 = vunpack.c.l.bf16 %v9401_v27  ;;  %v1238_v19 = vunpack.c.h.bf16 %v6851_v37  ;;  %v1239_v26 = vunpack.c.l.bf16 %v9427_v43  ;;  %v6889_v22 = vld [vmem:[%s10844_s1 + $0x12] sm:$0x3] }
  0x3b   : > { %7935 = vmatmul.mubr.msk.bf16.gmra.mrb[4].mxu0 %vm324_vm1, %v570_v49  ;;  %v841_v49 = vld [vmem:[%s9202_s10 + $0x30] sm:$0xe]  ;;  %v1263_v55 = vrot.slane %v1229_v41, 1 }
  0x3c   : > { %7940 = vmatprep.mubr.msk.bf16.mxu0 %vm324_vm1, %v741_v52  ;;  %v869_v52 = vrot.slane %v846_v14, 2  ;;  %v849_v58 = vunpack.c.l.bf16 %v841_v49  ;;  %v9422_v14 = vld [vmem:[%s9202_s10 + $0xd4] sm:$0x1]  ;;  %v6863_v49 = vld [vmem:[%s9202_s10 + $0xfc] sm:$0x1]  ;;  %v1265_v56 = vrot.slane %v1230_v11, 1 }
  0x3d   : > { %v1237_v59 = vunpack.c.l.bf16 %v9422_v14 }
  0x3e   : > { %v871_v24 = vsel %vm859_vm3, %v869_v52, %v870_v53  ;;  %v878_v40 = vrot.slane %v849_v58, 2  ;;  %v1262_v52 = vrot.slane %v1228_v34, 1  ;;  %v1233_v53 = vunpack.c.l.bf16 %v9405_v30 }
  0x3f   : > { %v893_v28 = vpack.c.bf16 %v871_v24, %v868_v18  ;;  %v1236_v18 = vunpack.c.l.bf16 %v6851_v37  ;;  %v1266_v24 = vrot.slane %v1231_v12, 1  ;;  %v1404_v37 = vunpack.c.h.bf16 %v6864_v50 }
  0x40   : > { %v880_v47 = vsel %vm859_vm3, %v878_v40, %v879_v33  ;;  %v1399_v33 = vunpack.c.l.bf16 %v6861_v45  ;;  %v6865_v40 = vld [vmem:[%s9202_s10 + $0x104] sm:$0x1]  ;;  %v1269_v61 = vrot.slane %v1233_v53, 1 }
  0x41   : > { %v895_v48 = vpack.c.bf16 %v883_v60, %v880_v47  ;;  %v1402_v47 = vunpack.c.l.bf16 %v6864_v50  ;;  %v6868_v60 = vld [vmem:[%s9202_s10 + $0x110] ss:$8 sps:$4 sm:$0xff]   ;;  %v6873_v50 = vld [vmem:[%s9202_s10 + $0x124] sm:$0x1] }
  0x43   : > { %7941 = vmatmul.mubr.msk.bf16.vlgmr.msra.gmra.mrb[0].mxu0 %vm324_vm1, %v742_v15  ;;  %v9393_v15 = vld [vmem:[%s9202_s10 + $0xac] sm:$0x1]  ;;  %v1436_v34 = vrot.slane %v1402_v47, 1 }
  0x44   : > { %7949 = vmatpush3.bf16.msra.mxu0 %v911_v17  ;;  %7944 = vmatprep.mubr.msk.bf16.mxu0 %vm324_vm1, %v743_v21  ;;  %v1224_v17 = vunpack.c.l.bf16 %v6839_v7  ;;  %v1226_v21 = vunpack.c.h.bf16 %v6839_v7  ;;  %v1227_v31 = vunpack.c.l.bf16 %v9393_v15  ;;  %v1275_v7 = vrot.slane %v1237_v59, 1 }
  0x45   : > { %8915 = vmatprep.subr.msk.bf16.mxu0 %vm337_vm0, %v6817_v29  ;;  %v6847_v29 = vld [vmem:[%s9202_s10 + $0xc0] ss:$8 sps:$4 sm:$0xff]  }
  0x46   : > { %v1256_v32 = vrot.slane %v1224_v17, 1  ;;  %v1259_v39 = vrot.slane %v1226_v21, 1  ;;  %v1232_v16 = vunpack.c.l.bf16 %v6847_v29  ;;  %v1234_v54 = vunpack.c.h.bf16 %v6847_v29 }
  0x47   : > { %v1431_v17 = vrot.slane %v1399_v33, 1 }
  0x48   : > { %v1268_v58 = vrot.slane %v1232_v16, 1  ;;  %v1271_v62 = vrot.slane %v1234_v54, 1  ;;  %v1267_v16 = vsel %vm534_vm2, %v1265_v56, %v1266_v24  ;;  %v6872_v54 = vld [vmem:[%s9202_s10 + $0x120] ss:$8 sps:$4 sm:$0xff]  }
  0x4a   : > { %v1270_v45 = vsel %vm534_vm2, %v1268_v58, %v1269_v61  ;;  %v1408_v58 = vunpack.c.h.bf16 %v6868_v60  ;;  %v1412_v61 = vunpack.c.h.bf16 %v6872_v54 }
  0x4b   : > { %7945 = vmatmul.mubr.msk.bf16.gmra.mrb[4].mxu0 %vm324_vm1, %v744_v44  ;;  %v6860_v44 = vld [vmem:[%s9202_s10 + $0xf0] ss:$8 sps:$4 sm:$0xff]  }
  0x4c   : > { %7950 = vmatprep.mubr.msk.bf16.mxu0 %vm324_vm1, %v892_v51  ;;  %v1260_v51 = vrot.slane %v1227_v31, 1 }
  0x53   : > { %7951 = vmatmul.mubr.msk.bf16.vlgmr.msra.gmra.mrb[0].mxu0 %vm324_vm1, %v893_v28  ;;  %v1398_v28 = vunpack.c.l.bf16 %v6860_v44 }
  0x54   : > { %7959 = vmatpush3.bf16.msra.mxu0 %v1022_v0  ;;  %7954 = vmatprep.mubr.msk.bf16.mxu0 %vm324_vm1, %v894_v36  ;;  %v1400_v36 = vunpack.c.h.bf16 %v6860_v44  ;;  %v1401_v0 = vunpack.c.l.bf16 %v6863_v49  ;;  %v6871_v44 = vld [vmem:[%s9202_s10 + $0x11c] sm:$0x1] }
  0x55   : > { %8916 = vmatprep.subr.msk.bf16.mxu0 %vm337_vm0, %v6834_v1  ;;  %v6867_v1 = vld [vmem:[%s9202_s10 + $0x10c] sm:$0x1]  ;;  %v1409_v33 = vunpack.c.l.bf16 %v6871_v44 }
  0x56   : > { %v1433_v21 = vrot.slane %v1400_v36, 1  ;;  %v1410_v36 = vunpack.c.l.bf16 %v6872_v54  ;;  %v6906_v54 = vld [vmem:[%s10844_s1 + $0x14] sm:$0x3] }
  0x5b   : > { %7955 = vmatmul.mubr.msk.bf16.gmra.mrb[4].mxu0 %vm324_vm1, %v895_v48  ;;  %v6869_v48 = vld [vmem:[%s9202_s10 + $0x114] sm:$0x1] }
  0x5c   : > { %7960 = vmatprep.mubr.msk.bf16.mxu0 %vm324_vm1, %v8953_v63  ;;  %v1258_v63 = vsel %vm534_vm2, %v1256_v32, %v1257_v38  ;;  %v1434_v32 = vrot.slane %v1401_v0, 1  ;;  %v1405_v38 = vunpack.c.l.bf16 %v6867_v1  ;;  %v1407_v11 = vunpack.c.l.bf16 %v6869_v48  ;;  %v6881_v0 = vld [vmem:[%s9202_s10 + $0xa0] sm:$0xe] }
  0x5d   : > { %v1445_v48 = vrot.slane %v1408_v58, 1 }
  0x5e   : > { %v1443_v24 = vrot.slane %v1407_v11, 1 }
  0x63   : > { %7961 = vmatmul.mubr.msk.bf16.vlgmr.msra.gmra.mrb[0].mxu0 %vm324_vm1, %v8954_v3  ;;  %v1272_v3 = vrot.slane %v1235_v57, 1 }
  0x64   : > { %7969 = vmatpush3.bf16.msra.mxu0 %v1133_v2  ;;  %7964 = vmatprep.mubr.msk.bf16.mxu0 %vm324_vm1, %v8955_v4  ;;  %v1261_v2 = vsel %vm534_vm2, %v1259_v39, %v1260_v51  ;;  %v1274_v4 = vrot.slane %v1236_v18, 1  ;;  %v1406_v39 = vunpack.c.l.bf16 %v6868_v60  ;;  %v9473_v51 = vsel %vm337_vm0, %v6889_v22, 0  ;;  %v6875_v18 = vld [vmem:[%s9202_s10 + $0x12c] sm:$0x1] }
  0x65   : > { %8917 = vmatprep.subr.msk.bf16.mxu0 %vm337_vm0, %v6855_v5  ;;  %v8960_v5 = vld [vmem:[%s9202_s10 + $0x120] ss:$8 sps:$4 sm:$0xff]   ;;  %v1288_v29 = vpack.c.bf16 %v1261_v2, %v1258_v63  ;;  %v1446_v63 = vrot.slane %v1409_v33, 1  ;;  %v1448_v60 = vrot.slane %v1410_v36, 1 }
  0x66   : > { %v1442_v56 = vrot.slane %v1406_v39, 1  ;;  %v1276_v1 = vsel %vm534_vm2, %v1274_v4, %v1275_v7  ;;  %v6882_v2 = vld [vmem:[%s9202_s10 + $0xa8] sm:$0xe]  ;;  %v1435_v4 = vsel %vm534_vm2, %v1433_v21, %v1434_v32  ;;  %v1584_v32 = vrot.slane %v1227_v31, 2 }
  0x67   : > { %v6886_v21 = vld [vmem:[%s9202_s10 + $0xc8] sm:$0xe] }
  0x68   : > { %v1444_v44 = vsel %vm534_vm2, %v1442_v56, %v1443_v24  ;;  %v1569_v31 = vunpack.c.l.bf16 %v6886_v21  ;;  %v6940_v21 = vld [vmem:[%s9202_s10 + $0x38] ss:$8 sps:$4 sm:$0xff]  }
  0x6b   : > { %7965 = vmatmul.mubr.msk.bf16.gmra.mrb[4].mxu0 %vm324_vm1, %v8956_v8  ;;  %v1277_v8 = vrot.slane %v1238_v19, 1 }
  0x6c   : > { %7970 = vmatprep.mubr.msk.bf16.mxu0 %vm324_vm1, %v8957_v10  ;;  %v1430_v10 = vrot.slane %v1398_v28, 1 }
  0x73   : > { %7971 = vmatmul.mubr.msk.bf16.vlgmr.msra.gmra.mrb[0].mxu0 %vm324_vm1, %v8958_v42  ;;  %v1264_v42 = vsel %vm534_vm2, %v1262_v52, %v1263_v55  ;;  %v1439_v52 = vrot.slane %v1404_v37, 1  ;;  %v1440_v55 = vrot.slane %v1405_v38, 1  ;;  %v1565_v37 = vunpack.c.l.bf16 %v6882_v2  ;;  %v6883_v38 = vld [vmem:[%s9202_s10 + $0xb0] sm:$0xe]  ;;  %v8962_v2 = vld [vmem:[%s9202_s10 + $0x18] ss:$8 sps:$4 sm:$0xff]  }
  0x74   : > { %7979 = vmatpush3.bf16.msra.mxu0 %v1307_v6  ;;  %7974 = vmatprep.mubr.msk.bf16.mxu0 %vm324_vm1, %v8959_v46  ;;  %v1278_v6 = vrot.slane %v1239_v26, 1  ;;  %v1273_v46 = vsel %vm534_vm2, %v1271_v62, %v1272_v3  ;;  %v1289_v19 = vpack.c.bf16 %v1267_v16, %v1264_v42  ;;  %v1413_v62 = vunpack.c.l.bf16 %v6875_v18 }
  0x75   : > { %8918 = vmatprep.subr.msk.bf16.mxu0 %vm337_vm0, %v9390_v13  ;;  %v1403_v13 = vunpack.c.l.bf16 %v6865_v40  ;;  %v1290_v28 = vpack.c.bf16 %v1273_v46, %v1270_v45  ;;  %v1411_v40 = vunpack.c.l.bf16 %v6873_v50  ;;  %v1441_v11 = vsel %vm534_vm2, %v1439_v52, %v1440_v55 }
  0x76   : > { %v1279_v47 = vsel %vm534_vm2, %v1277_v8, %v1278_v6  ;;  %v1564_v8 = vunpack.c.l.bf16 %v6881_v0  ;;  %v1587_v16 = vrot.slane %v1229_v41, 2  ;;  %v1447_v45 = vsel %vm534_vm2, %v1445_v48, %v1446_v63  ;;  %v6923_v63 = vld [vmem:[%s10844_s1 + $0x16] sm:$0x3] }
  0x77   : > { %v1437_v49 = vrot.slane %v1403_v13, 1  ;;  %v1449_v3 = vrot.slane %v1411_v40, 1  ;;  %v1432_v13 = vsel %vm534_vm2, %v1430_v10, %v1431_v17  ;;  %v1291_v7 = vpack.c.bf16 %v1279_v47, %v1276_v1  ;;  %v6885_v17 = vld [vmem:[%s9202_s10 + $0xc0] sm:$0xe] }
  0x78   : > { %v1462_v6 = vpack.c.bf16 %v1435_v4, %v1432_v13  ;;  %v1580_v42 = vrot.slane %v1564_v8, 2  ;;  %v1581_v10 = vrot.slane %v1225_v20, 2  ;;  %v1566_v20 = vunpack.c.l.bf16 %v6883_v38  ;;  %v6944_v13 = vld [vmem:[%s10844_s1 + $0x18] sm:$0x3]  ;;  %v9557_v4 = vld [vmem:[%s9202_s10 + $0x14] sm:$0x1] }
  0x79   : > { %v1438_v39 = vsel %vm534_vm2, %v1436_v34, %v1437_v49  ;;  %v1590_v34 = vrot.slane %v1231_v12, 2  ;;  %v1464_v49 = vpack.c.bf16 %v1447_v45, %v1444_v44  ;;  %v1568_v15 = vunpack.c.l.bf16 %v6885_v17  ;;  %v9577_v17 = vld [vmem:[%s9202_s10 + $0x34] sm:$0x1]  ;;  %v9590_v44 = vld [vmem:[%s9202_s10 + $0x3c] sm:$0x1] }
  0x7a   : > { %v1463_v9 = vpack.c.bf16 %v1441_v11, %v1438_v39  ;;  %v1450_v23 = vsel %vm534_vm2, %v1448_v60, %v1449_v3  ;;  %v1586_v41 = vrot.slane %v1566_v20, 2  ;;  %v1593_v18 = vrot.slane %v1233_v53, 2  ;;  %v6928_v60 = vld [vmem:[%s9202_s10 + $0x8] ss:$8 sps:$4 sm:$0xff]   ;;  %v9549_v3 = vld [vmem:[%s9202_s10 + $0xc] sm:$0x1] }
  0x7b   : > { %7975 = vmatmul.mubr.msk.bf16.gmra.mrb[4].mxu0 %vm324_vm1, %v8960_v5  ;;  %v1451_v5 = vrot.slane %v1412_v61, 1  ;;  %v1592_v50 = vrot.slane %v1568_v15, 2  ;;  %v1595_v52 = vrot.slane %v1569_v31, 2  ;;  %v1596_v55 = vrot.slane %v1235_v57, 2  ;;  %v9566_v39 = vld [vmem:[%s9202_s10 + $0x24] sm:$0x1] }
  0x7c   : > { %7980 = vmatprep.mubr.msk.bf16.mxu0 %vm324_vm1, %v1288_v29  ;;  %v1452_v29 = vrot.slane %v1413_v62, 1  ;;  %v1582_v56 = vsel %vm859_vm3, %v1580_v42, %v1581_v10  ;;  %v1588_v30 = vsel %vm859_vm3, %v1586_v41, %v1587_v16  ;;  %v1742_v53 = vsel %vm337_vm0, %v6906_v54, 0  ;;  %v6936_v11 = vld [vmem:[%s9202_s10 + $0x28] ss:$8 sps:$4 sm:$0xff]   ;;  %v9574_v10 = vld [vmem:[%s9202_s10 + $0x2c] sm:$0x1] }
  0x7d   : > { %v1594_v57 = vsel %vm859_vm3, %v1592_v50, %v1593_v18  ;;  %v1597_v40 = vsel %vm859_vm3, %v1595_v52, %v1596_v55  ;;  %v1599_v62 = vrot.slane %v1237_v59, 2  ;;  %v1602_v1 = vrot.slane %v1239_v26, 2  ;;  %v8961_v26 = vld [vmem:[%s9202_s10 + $0x8] ss:$8 sps:$4 sm:$0xff]   ;;  %v8965_v45 = vld [vmem:[%s9202_s10 + $0x58] ss:$8 sps:$4 sm:$0xff]  }
  0x7e   : > { %v1453_v27 = vsel %vm534_vm2, %v1451_v5, %v1452_v29  ;;  %v1614_v48 = vpack.c.bf16 %v1597_v40, %v1594_v57  ;;  %v1853_v5 = vsel %vm337_vm0, %v6923_v63, 0  ;;  %v8963_v29 = vld [vmem:[%s9202_s10 + $0x28] ss:$8 sps:$4 sm:$0xff]   ;;  %v1944_v8 = vunpack.c.l.bf16 %v6928_v60  ;;  %v9604_v52 = vld [vmem:[%s9202_s10 + $0x44] sm:$0x1] }
  0x7f   : > { %v1465_v58 = vpack.c.bf16 %v1453_v27, %v1450_v23  ;;  %v1947_v38 = vunpack.c.l.bf16 %v9557_v4  ;;  %v9571_v42 = vsel %vm337_vm0, %v6944_v13, 0  ;;  %v1951_v15 = vunpack.c.l.bf16 %v9566_v39  ;;  %v6949_v55 = vld [vmem:[%s9202_s10 + $0x58] ss:$8 sps:$4 sm:$0xff]  }
  0x80   : > { %v1952_v31 = vunpack.c.l.bf16 %v6936_v11  ;;  %v1953_v23 = vunpack.c.l.bf16 %v9574_v10  ;;  %v1954_v27 = vunpack.c.h.bf16 %v6936_v11  ;;  %v1955_v41 = vunpack.c.l.bf16 %v9577_v17  ;;  %v6978_v11 = vld [vmem:[%s10844_s1 + $0x1c] sm:$0x3]  ;;  %v6976_v39 = vld [vmem:[%s9202_s10 + $0x38] sm:$0xe] }
  0x81   : > { %v1980_v20 = vrot.slane %v1947_v38, 1  ;;  %v1957_v50 = vunpack.c.l.bf16 %v9590_v44  ;;  %v1958_v18 = vunpack.c.h.bf16 %v6940_v21 }
  0x82   : > { %v1992_v57 = vrot.slane %v1955_v41, 1 }
  0x83   : > { %7981 = vmatmul.mubr.msk.bf16.vlgmr.msra.gmra.mrb[0].mxu0 %vm324_vm1, %v1289_v19  ;;  %v6887_v19 = vld [vmem:[%s9202_s10 + $0xd0] sm:$0xe] }
  0x84   : > { %7989 = vmatpush3.bf16.msra.mxu0 %v9411_v35  ;;  %7984 = vmatprep.mubr.msk.bf16.mxu0 %vm324_vm1, %v1290_v28  ;;  %v6884_v35 = vld [vmem:[%s9202_s10 + $0xb8] sm:$0xe]  ;;  %v1570_v33 = vunpack.c.l.bf16 %v6887_v19 }
  0x85   : > { %8919 = vmatprep.subr.msk.bf16.mxu0 %vm337_vm0, %v6889_v22  ;;  %v1583_v22 = vrot.slane %v1565_v37, 2  ;;  %v1567_v46 = vunpack.c.l.bf16 %v6884_v35  ;;  %v6888_v28 = vld [vmem:[%s9202_s10 + $0xd8] sm:$0xe]  ;;  %v1946_v37 = vunpack.c.h.bf16 %v6928_v60  ;;  %v9563_v35 = vld [vmem:[%s9202_s10 + $0x1c] sm:$0x1] }
  0x86   : > { %v1571_v36 = vunpack.c.l.bf16 %v6888_v28  ;;  %v1598_v61 = vrot.slane %v1570_v33, 2  ;;  %v9622_v33 = vrot.slane %v1952_v31, 1  ;;  %v6961_v31 = vld [vmem:[%s9202_s10 + $0x88] ss:$8 sps:$4 sm:$0xff]  }
  0x87   : > { %v1589_v12 = vrot.slane %v1567_v46, 2  ;;  %v1585_v24 = vsel %vm859_vm3, %v1583_v22, %v1584_v32  ;;  %v8964_v22 = vld [vmem:[%s9202_s10 + $0x38] ss:$8 sps:$4 sm:$0xff]   ;;  %v9583_v32 = vrot.slane %v1944_v8, 1  ;;  %v1949_v46 = vunpack.c.l.bf16 %v9563_v35  ;;  %v6995_v35 = vld [vmem:[%s10844_s1 + $0x1e] sm:$0x3] }
  0x88   : > { %v1601_v0 = vrot.slane %v1571_v36, 2  ;;  %v1600_v14 = vsel %vm859_vm3, %v1598_v61, %v1599_v62  ;;  %v9626_v36 = vrot.slane %v1953_v23, 1  ;;  %v9639_v61 = vrot.slane %v1957_v50, 1 }
  0x89   : > { %v1591_v25 = vsel %vm859_vm3, %v1589_v12, %v1590_v34  ;;  %v1956_v12 = vunpack.c.l.bf16 %v6940_v21  ;;  %v9641_v62 = vrot.slane %v1958_v18, 1 }
  0x8a   : > { %v1613_v47 = vpack.c.bf16 %v1591_v25, %v1588_v30  ;;  %v1603_v43 = vsel %vm859_vm3, %v1601_v0, %v1602_v1  ;;  %v9628_v30 = vrot.slane %v1954_v27, 1  ;;  %v6952_v25 = vld [vmem:[%s9202_s10 + $0x64] sm:$0x1]  ;;  %v6954_v0 = vld [vmem:[%s9202_s10 + $0x6c] sm:$0x1] }
  0x8b   : > { %7985 = vmatmul.mubr.msk.bf16.gmra.mrb[4].mxu0 %vm324_vm1, %v1291_v7  ;;  %v1615_v59 = vpack.c.bf16 %v1603_v43, %v1600_v14  ;;  %v6932_v7 = vld [vmem:[%s9202_s10 + $0x18] ss:$8 sps:$4 sm:$0xff]   ;;  %v9635_v40 = vrot.slane %v1956_v12, 1  ;;  %v6956_v1 = vld [vmem:[%s9202_s10 + $0x74] sm:$0x1]  ;;  %v1959_v14 = vunpack.c.l.bf16 %v9604_v52  ;;  %v2118_v43 = vunpack.c.l.bf16 %v6949_v55 }
  0x8c   : > { %7990 = vmatprep.mubr.msk.bf16.mxu0 %vm324_vm1, %v1462_v6  ;;  %v1945_v6 = vunpack.c.l.bf16 %v9549_v3  ;;  %v1948_v34 = vunpack.c.l.bf16 %v6932_v7  ;;  %v2121_v60 = vunpack.c.l.bf16 %v6952_v25  ;;  %v6962_v27 = vld [vmem:[%s9202_s10 + $0x8c] sm:$0x1]  ;;  %v8968_v25 = vld [vmem:[%s9202_s10 + $0x88] ss:$8 sps:$4 sm:$0xff]  }
  0x8d   : > { %v1998_v8 = vrot.slane %v1959_v14, 1 }
  0x8e   : > { %v9587_v16 = vrot.slane %v1945_v6, 1 }
  0x90   : > { %v1978_v12 = vsel %vm534_vm2, %v9583_v32, %v9587_v16 }
  0x93   : > { %7991 = vmatmul.mubr.msk.bf16.vlgmr.msra.gmra.mrb[0].mxu0 %vm324_vm1, %v1463_v9  ;;  %v1979_v9 = vrot.slane %v1946_v37, 1  ;;  %v2150_v37 = vrot.slane %v2118_v43, 1 }
  0x94   : > { %7999 = vmatpush3.bf16.msra.mxu0 %v9473_v51  ;;  %7994 = vmatprep.mubr.msk.bf16.mxu0 %vm324_vm1, %v1464_v49  ;;  %v1612_v51 = vpack.c.bf16 %v1585_v24, %v1582_v56  ;;  %v1950_v49 = vunpack.c.h.bf16 %v6932_v7  ;;  %v9607_v56 = vrot.slane %v1948_v34, 1  ;;  %v9611_v24 = vrot.slane %v1949_v46, 1 }
  0x95   : > { %8920 = vmatprep.subr.msk.bf16.mxu0 %vm337_vm0, %v6906_v54  ;;  %v6965_v54 = vld [vmem:[%s10844_s1 + $0x1a] sm:$0x3]  ;;  %v2125_v7 = vunpack.c.l.bf16 %v6956_v1  ;;  %v1981_v18 = vsel %vm534_vm2, %v1979_v9, %v1980_v20  ;;  %v2130_v9 = vunpack.c.l.bf16 %v6961_v31  ;;  %v2131_v20 = vunpack.c.l.bf16 %v6962_v27 }
  0x96   : > { %v9613_v19 = vrot.slane %v1950_v49, 1  ;;  %v9616_v28 = vsel %vm337_vm0, %v6965_v54, 0  ;;  %v6960_v49 = vld [vmem:[%s9202_s10 + $0x84] sm:$0x1]  ;;  %v2008_v43 = vpack.c.bf16 %v1981_v18, %v1978_v12  ;;  %v6972_v27 = vld [vmem:[%s9202_s10 + $0x18] sm:$0xe]  ;;  %v1996_v12 = vsel %vm534_vm2, %v9635_v40, %v9639_v61 }
  0x97   : > { %v2160_v1 = vrot.slane %v2125_v7, 1  ;;  %v2129_v16 = vunpack.c.l.bf16 %v6960_v49  ;;  %v1990_v7 = vsel %vm534_vm2, %v9622_v33, %v9626_v36  ;;  %v1999_v33 = vsel %vm534_vm2, %v9641_v62, %v1998_v8 }
  0x98   : > { %v2304_v40 = vrot.slane %v1947_v38, 2  ;;  %v2011_v8 = vpack.c.bf16 %v1999_v33, %v1996_v12  ;;  %v8972_v12 = vld [vmem:[%s9202_s10 + $0xd8] ss:$8 sps:$4 sm:$0xff]  }
  0x99   : > { %v8973_v33 = vld [vmem:[%s9202_s10 + $0xf8] ss:$8 sps:$4 sm:$0xff]  }
  0x9b   : > { %7995 = vmatmul.mubr.msk.bf16.gmra.mrb[4].mxu0 %vm324_vm1, %v1465_v58  ;;  %v6950_v58 = vld [vmem:[%s9202_s10 + $0x5c] sm:$0x1] }
  0x9c   : > { %8000 = vmatprep.mubr.msk.bf16.mxu0 %vm324_vm1, %v1612_v51  ;;  %v1986_v51 = vrot.slane %v1951_v15, 1 }
  0xa3   : > { %8001 = vmatmul.mubr.msk.bf16.vlgmr.msra.gmra.mrb[0].mxu0 %vm324_vm1, %v1613_v47  ;;  %v8966_v47 = vld [vmem:[%s9202_s10 + $0x68] ss:$8 sps:$4 sm:$0xff]  }
  0xa4   : > { %8009 = vmatpush3.bf16.msra.mxu0 %v1742_v53  ;;  %8004 = vmatprep.mubr.msk.bf16.mxu0 %vm324_vm1, %v1614_v48  ;;  %v6953_v53 = vld [vmem:[%s9202_s10 + $0x68] ss:$8 sps:$4 sm:$0xff]   ;;  %v6957_v48 = vld [vmem:[%s9202_s10 + $0x78] ss:$8 sps:$4 sm:$0xff]  }
  0xa5   : > { %8921 = vmatprep.subr.msk.bf16.mxu0 %vm337_vm0, %v6923_v63  ;;  %v8967_v63 = vld [vmem:[%s9202_s10 + $0x78] ss:$8 sps:$4 sm:$0xff]   ;;  %v2126_v21 = vunpack.c.l.bf16 %v6957_v48  ;;  %v2128_v32 = vunpack.c.h.bf16 %v6957_v48  ;;  %v2166_v48 = vrot.slane %v2129_v16, 1 }
  0xab   : > { %8005 = vmatmul.mubr.msk.bf16.gmra.mrb[4].mxu0 %vm324_vm1, %v1615_v59  ;;  %v6958_v59 = vld [vmem:[%s9202_s10 + $0x7c] sm:$0x1] }
  0xac   : > { %8010 = vmatprep.mubr.msk.bf16.mxu0 %vm324_vm1, %v8961_v26  ;;  %v2119_v26 = vunpack.c.l.bf16 %v6950_v58 }
  0xae   : > { %v2151_v34 = vrot.slane %v2119_v26, 1  ;;  %v1987_v26 = vsel %vm534_vm2, %v9613_v19, %v1986_v51 }
  0xb0   : > { %v2152_v61 = vsel %vm534_vm2, %v2150_v37, %v2151_v34  ;;  %v6974_v37 = vld [vmem:[%s9202_s10 + $0x28] sm:$0xe]  ;;  %v6975_v34 = vld [vmem:[%s9202_s10 + $0x30] sm:$0xe] }
  0xb3   : > { %8011 = vmatmul.mubr.msk.bf16.vlgmr.msra.gmra.mrb[0].mxu0 %vm324_vm1, %v8962_v2  ;;  %v2120_v2 = vunpack.c.h.bf16 %v6949_v55  ;;  %v2154_v55 = vrot.slane %v2121_v60, 1  ;;  %v6971_v60 = vld [vmem:[%s9202_s10 + $0x10] sm:$0xe] }
  0xb4   : > { %8019 = vmatpush3.bf16.msra.mxu0 %v1853_v5  ;;  %8014 = vmatprep.mubr.msk.bf16.mxu0 %vm324_vm1, %v8963_v29  ;;  %v2122_v5 = vunpack.c.l.bf16 %v6953_v53  ;;  %v2123_v29 = vunpack.c.l.bf16 %v6954_v0  ;;  %v2285_v49 = vunpack.c.l.bf16 %v6971_v60  ;;  %v2290_v60 = vunpack.c.l.bf16 %v6976_v39  ;;  %v7029_v39 = vld [vmem:[%s9202_s10 + $0xd8] ss:$8 sps:$4 sm:$0xff]  }
  0xb5   : > { %8922 = vmatprep.subr.msk.bf16.mxu0 %vm337_vm0, %v6944_v13  ;;  %v2124_v13 = vunpack.c.h.bf16 %v6953_v53 }
  0xb6   : > { %v2156_v58 = vrot.slane %v2122_v5, 1  ;;  %v2157_v53 = vrot.slane %v2123_v29, 1  ;;  %v2165_v5 = vrot.slane %v2128_v32, 1  ;;  %v2168_v29 = vrot.slane %v2130_v9, 1 }
  0xb7   : > { %v2159_v0 = vrot.slane %v2124_v13, 1  ;;  %v2169_v13 = vrot.slane %v2131_v20, 1  ;;  %v2289_v9 = vunpack.c.l.bf16 %v6975_v34 }
  0xb8   : > { %v2158_v4 = vsel %vm534_vm2, %v2156_v58, %v2157_v53 }
  0xb9   : > { %v2161_v38 = vsel %vm534_vm2, %v2159_v0, %v2160_v1  ;;  %v2170_v58 = vsel %vm534_vm2, %v2168_v29, %v2169_v13  ;;  %v2310_v1 = vrot.slane %v1951_v15, 2  ;;  %v2315_v20 = vrot.slane %v2289_v9, 2  ;;  %v6977_v15 = vld [vmem:[%s9202_s10 + $0x40] sm:$0xe] }
  0xba   : > { %v2318_v29 = vrot.slane %v2290_v60, 2  ;;  %v2319_v13 = vrot.slane %v1957_v50, 2 }
  0xbb   : > { %8015 = vmatmul.mubr.msk.bf16.gmra.mrb[4].mxu0 %vm324_vm1, %v8964_v22  ;;  %v2127_v22 = vunpack.c.l.bf16 %v6958_v59  ;;  %v6964_v59 = vld [vmem:[%s9202_s10 + $0x94] sm:$0x1] }
  0xbc   : > { %8020 = vmatprep.mubr.msk.bf16.mxu0 %vm324_vm1, %v8965_v45  ;;  %v2153_v45 = vrot.slane %v2120_v2, 1  ;;  %v6970_v2 = vld [vmem:[%s9202_s10 + $0x8] sm:$0xe]  ;;  %v2320_v44 = vsel %vm859_vm3, %v2318_v29, %v2319_v13  ;;  %v2676_v13 = vunpack.c.l.bf16 %v7029_v39 }
  0xbd   : > { %v2284_v51 = vunpack.c.l.bf16 %v6970_v2 }
  0xbe   : > { %v2155_v62 = vsel %vm534_vm2, %v2153_v45, %v2154_v55  ;;  %v2167_v45 = vsel %vm534_vm2, %v2165_v5, %v2166_v48  ;;  %v2183_v55 = vpack.c.bf16 %v2161_v38, %v2158_v4  ;;  %v2291_v5 = vunpack.c.l.bf16 %v6977_v15  ;;  %v9787_v4 = vld [vmem:[%s9202_s10 + $0xcc] sm:$0x1]  ;;  %v9790_v38 = vld [vmem:[%s9202_s10 + $0xd4] sm:$0x1] }
  0xc3   : > { %8021 = vmatmul.mubr.msk.bf16.vlgmr.msra.gmra.mrb[0].mxu0 %vm324_vm1, %v8966_v47  ;;  %v2162_v47 = vrot.slane %v2126_v21, 1  ;;  %v1993_v21 = vsel %vm534_vm2, %v9628_v30, %v1992_v57  ;;  %v2300_v30 = vrot.slane %v2284_v51, 2  ;;  %v2301_v57 = vrot.slane %v1945_v6, 2  ;;  %v8971_v51 = vld [vmem:[%s9202_s10 + $0xc8] ss:$8 sps:$4 sm:$0xff]  }
  0xc4   : > { %8029 = vmatpush3.bf16.msra.mxu0 %v9571_v42  ;;  %8024 = vmatprep.mubr.msk.bf16.mxu0 %vm324_vm1, %v8967_v63  ;;  %v9668_v42 = vsel %vm337_vm0, %v6978_v11, 0  ;;  %v2163_v63 = vrot.slane %v2127_v22, 1  ;;  %v2133_v22 = vunpack.c.l.bf16 %v6964_v59  ;;  %v2010_v19 = vpack.c.bf16 %v1993_v21, %v1990_v7 }
  0xc5   : > { %8923 = vmatprep.subr.msk.bf16.mxu0 %vm337_vm0, %v6965_v54  ;;  %v1984_v54 = vsel %vm534_vm2, %v9607_v56, %v9611_v24  ;;  %v2132_v24 = vunpack.c.h.bf16 %v6961_v31  ;;  %v2303_v31 = vrot.slane %v2285_v49, 2  ;;  %v2307_v6 = vrot.slane %v1949_v46, 2 }
  0xc6   : > { %v2009_v56 = vpack.c.bf16 %v1987_v26, %v1984_v54  ;;  %v2172_v18 = vrot.slane %v2133_v22, 1  ;;  %v2288_v46 = vunpack.c.l.bf16 %v6974_v37  ;;  %v2316_v59 = vrot.slane %v1955_v41, 2  ;;  %v7012_v22 = vld [vmem:[%s10844_s1 + $0x20] sm:$0x3] }
  0xc7   : > { %v2171_v36 = vrot.slane %v2132_v24, 1  ;;  %v2302_v54 = vsel %vm859_vm3, %v2300_v30, %v2301_v57  ;;  %v2305_v26 = vsel %vm859_vm3, %v2303_v31, %v2304_v40  ;;  %v2321_v7 = vrot.slane %v2291_v5, 2  ;;  %v9769_v30 = vld [vmem:[%s9202_s10 + $0xb4] sm:$0x1]  ;;  %v9822_v5 = vld [vmem:[%s9202_s10 + $0xdc] sm:$0x1] }
  0xc8   : > { %v2317_v48 = vsel %vm859_vm3, %v2315_v20, %v2316_v59  ;;  %v2322_v21 = vrot.slane %v1959_v14, 2  ;;  %v8969_v14 = vld [vmem:[%s9202_s10 + $0xa8] ss:$8 sps:$4 sm:$0xff]   ;;  %v2573_v49 = vsel %vm337_vm0, %v7012_v22, 0 }
  0xc9   : > { %v2173_v53 = vsel %vm534_vm2, %v2171_v36, %v2172_v18  ;;  %v7017_v36 = vld [vmem:[%s9202_s10 + $0xa8] ss:$8 sps:$4 sm:$0xff]   ;;  %v9766_v18 = vld [vmem:[%s9202_s10 + $0xac] sm:$0x1] }
  0xca   : > { %v2185_v2 = vpack.c.bf16 %v2173_v53, %v2170_v58  ;;  %v2323_v50 = vsel %vm859_vm3, %v2321_v7, %v2322_v21  ;;  %v2664_v57 = vunpack.c.l.bf16 %v7017_v36  ;;  %v2665_v31 = vunpack.c.l.bf16 %v9766_v18 }
  0xcb   : > { %8025 = vmatmul.mubr.msk.bf16.gmra.mrb[4].mxu0 %vm324_vm1, %v8968_v25  ;;  %v2182_v25 = vpack.c.bf16 %v2155_v62, %v2152_v61  ;;  %v2335_v52 = vpack.c.bf16 %v2323_v50, %v2320_v44  ;;  %v2666_v40 = vunpack.c.h.bf16 %v7017_v36  ;;  %v2667_v61 = vunpack.c.l.bf16 %v9769_v30  ;;  %v8974_v62 = vld [vmem:[%s9202_s10 + $0x108] ss:$8 sps:$4 sm:$0xff]   ;;  %v8986_v50 = vld [vmem:[%s10846_s3 + $0xc0] sm:$0xff]  }
  0xcc   : > { %8030 = vmatprep.mubr.msk.bf16.mxu0 %vm324_vm1, %v2008_v43  ;;  %v6973_v43 = vld [vmem:[%s9202_s10 + $0x20] sm:$0xe]  ;;  %v2696_v37 = vrot.slane %v2664_v57, 1  ;;  %v2697_v34 = vrot.slane %v2665_v31, 1  ;;  %v2673_v58 = vunpack.c.l.bf16 %v9787_v4  ;;  %v2677_v7 = vunpack.c.l.bf16 %v9822_v5  ;;  %8230 = vmatprep.subr.bf16.mxu1 %v8986_v50 }
  0xcd   : > { %v2287_v32 = vunpack.c.l.bf16 %v6973_v43  ;;  %v9780_v43 = vld [vmem:[%s9202_s10 + $0xbc] sm:$0x1]  ;;  %v2678_v21 = vunpack.c.h.bf16 %v7029_v39  ;;  %8231 = vmatpush3.bf16.msra.mxu1 %v8986_v50 }
  0xcf   : > { %v2309_v0 = vrot.slane %v2287_v32, 2 }
  0xd1   : > { %v2311_v17 = vsel %vm859_vm3, %v2309_v0, %v2310_v1  ;;  %v2675_v0 = vunpack.c.l.bf16 %v9790_v38  ;;  %v8976_v1 = vld [vmem:[%s9202_s10 + $0x128] ss:$8 sps:$4 sm:$0xff]   ;;  %v3039_v38 = vrot.slane %v2677_v7, 2 }
  0xd3   : > { %8031 = vmatmul.mubr.msk.bf16.vlgmr.msra.gmra.mrb[0].mxu0 %vm324_vm1, %v2009_v56  ;;  %v2712_v60 = vrot.slane %v2675_v0, 1 }
  0xd4   : > { %8039 = vmatpush3.bf16.msra.mxu0 %v9616_v28  ;;  %8034 = vmatprep.mubr.msk.bf16.mxu0 %vm324_vm1, %v2010_v19  ;;  %v2286_v28 = vunpack.c.l.bf16 %v6972_v27  ;;  %v8970_v19 = vld [vmem:[%s9202_s10 + $0xb8] ss:$8 sps:$4 sm:$0xff]  }
  0xd5   : > { %8924 = vmatprep.subr.msk.bf16.mxu0 %vm337_vm0, %v6978_v11  ;;  %v2164_v11 = vsel %vm534_vm2, %v2162_v47, %v2163_v63  ;;  %v2312_v47 = vrot.slane %v2288_v46, 2  ;;  %v2313_v63 = vrot.slane %v1953_v23, 2  ;;  %v2462_v23 = vsel %vm337_vm0, %v6995_v35, 0  ;;  %v7033_v27 = vld [vmem:[%s10844_s1 + $0x22] sm:$0x3] }
  0xd6   : > { %v2306_v3 = vrot.slane %v2286_v28, 2  ;;  %v2184_v16 = vpack.c.bf16 %v2167_v45, %v2164_v11  ;;  %v8975_v28 = vld [vmem:[%s9202_s10 + $0x118] ss:$8 sps:$4 sm:$0xff]   ;;  %v2699_v11 = vrot.slane %v2666_v40, 1  ;;  %v2700_v45 = vrot.slane %v2667_v61, 1 }
  0xd7   : > { %v2314_v41 = vsel %vm859_vm3, %v2312_v47, %v2313_v63  ;;  %v2698_v47 = vsel %vm534_vm2, %v2696_v37, %v2697_v34 }
  0xd8   : > { %v2308_v10 = vsel %vm859_vm3, %v2306_v3, %v2307_v6  ;;  %v2334_v24 = vpack.c.bf16 %v2317_v48, %v2314_v41  ;;  %v9783_v3 = vld [vmem:[%s9202_s10 + $0xc4] sm:$0x1]  ;;  %v7025_v6 = vld [vmem:[%s9202_s10 + $0xc8] ss:$8 sps:$4 sm:$0xff]   ;;  %v2701_v63 = vsel %vm534_vm2, %v2699_v11, %v2700_v45  ;;  %v7039_v41 = vld [vmem:[%s9202_s10 + $0xfc] sm:$0x1] }
  0xd9   : > { %v2333_v56 = vpack.c.bf16 %v2311_v17, %v2308_v10  ;;  %v2671_v46 = vunpack.c.l.bf16 %v9783_v3  ;;  %v2672_v9 = vunpack.c.l.bf16 %v7025_v6  ;;  %v2674_v53 = vunpack.c.h.bf16 %v7025_v6  ;;  %v9825_v17 = vld [vmem:[%s9202_s10 + $0xe4] sm:$0x1]  ;;  %v7045_v11 = vld [vmem:[%s9202_s10 + $0x114] sm:$0x1] }
  0xda   : > { %v2728_v10 = vpack.c.bf16 %v2701_v63, %v2698_v47  ;;  %v7041_v48 = vld [vmem:[%s9202_s10 + $0x104] sm:$0x1]  ;;  %v2679_v44 = vunpack.c.l.bf16 %v9825_v17 }
  0xdb   : > { %8035 = vmatmul.mubr.msk.bf16.gmra.mrb[4].mxu0 %vm324_vm1, %v2011_v8  ;;  %v2747_v8 = vsel %vm337_vm0, %v7033_v27, 0  ;;  %v2708_v15 = vrot.slane %v2672_v9, 1  ;;  %v7049_v47 = vld [vmem:[%s9202_s10 + $0x124] sm:$0x1] }
  0xdc   : > { %8040 = vmatprep.mubr.msk.bf16.mxu0 %vm324_vm1, %v2182_v25  ;;  %v7021_v25 = vld [vmem:[%s9202_s10 + $0xb8] ss:$8 sps:$4 sm:$0xff]   ;;  %v2718_v40 = vrot.slane %v2679_v44, 1 }
  0xdd   : > { %v2668_v32 = vunpack.c.l.bf16 %v7021_v25 }
  0xdf   : > { %v2702_v20 = vrot.slane %v2668_v32, 1  ;;  %v7067_v32 = vld [vmem:[%s10844_s1 + $0x26] sm:$0x3] }
  0xe3   : > { %8041 = vmatmul.mubr.msk.bf16.vlgmr.msra.gmra.mrb[0].mxu0 %vm324_vm1, %v2183_v55  ;;  %v9799_v55 = vld [vmem:[%s10844_s1 + $0x24] sm:$0x3] }
  0xe4   : > { %8049 = vmatpush3.bf16.msra.mxu0 %v9668_v42  ;;  %8044 = vmatprep.mubr.msk.bf16.mxu0 %vm324_vm1, %v2184_v16  ;;  %v2332_v42 = vpack.c.bf16 %v2305_v26, %v2302_v54  ;;  %v2669_v16 = vunpack.c.l.bf16 %v9780_v43  ;;  %v2706_v26 = vrot.slane %v2671_v46, 1  ;;  %v2921_v45 = vsel %vm337_vm0, %v9799_v55, 0 }
  0xe5   : > { %8925 = vmatprep.subr.msk.bf16.mxu0 %vm337_vm0, %v6995_v35  ;;  %v2670_v35 = vunpack.c.h.bf16 %v7021_v25 }
  0xe6   : > { %v2703_v59 = vrot.slane %v2669_v16, 1 }
  0xe7   : > { %v2705_v54 = vrot.slane %v2670_v35, 1 }
  0xe8   : > { %v2704_v29 = vsel %vm534_vm2, %v2702_v20, %v2703_v59  ;;  %v2845_v59 = vunpack.c.l.bf16 %v7045_v11 }
  0xeb   : > { %8045 = vmatmul.mubr.msk.bf16.gmra.mrb[4].mxu0 %vm324_vm1, %v2185_v2  ;;  %v2709_v2 = vrot.slane %v2673_v58, 1 }
  0xec   : > { %8050 = vmatprep.mubr.msk.bf16.mxu0 %vm324_vm1, %v2332_v42  ;;  %v2711_v42 = vrot.slane %v2674_v53, 1  ;;  %v7046_v53 = vld [vmem:[%s9202_s10 + $0x118] ss:$8 sps:$4 sm:$0xff]  }
  0xf3   : > { %8051 = vmatmul.mubr.msk.bf16.vlgmr.msra.gmra.mrb[0].mxu0 %vm324_vm1, %v2333_v56  ;;  %v2707_v56 = vsel %vm534_vm2, %v2705_v54, %v2706_v26 }
  0xf4   : > { %8059 = vmatpush3.bf16.msra.mxu0 %v2462_v23  ;;  %8054 = vmatprep.mubr.msk.bf16.mxu0 %vm324_vm1, %v2334_v24  ;;  %v7038_v23 = vld [vmem:[%s9202_s10 + $0xf8] ss:$8 sps:$4 sm:$0xff]   ;;  %v2710_v24 = vsel %vm534_vm2, %v2708_v15, %v2709_v2  ;;  %v2729_v36 = vpack.c.bf16 %v2707_v56, %v2704_v29  ;;  %v2846_v15 = vunpack.c.l.bf16 %v7046_v53  ;;  %v2880_v29 = vrot.slane %v2845_v59, 1  ;;  %v7051_v56 = vld [vmem:[%s9202_s10 + $0x12c] sm:$0x1] }
  0xf5   : > { %8926 = vmatprep.subr.msk.bf16.mxu0 %vm337_vm0, %v7012_v22  ;;  %v2713_v22 = vsel %vm534_vm2, %v2711_v42, %v2712_v60  ;;  %v2848_v42 = vunpack.c.h.bf16 %v7046_v53  ;;  %v2849_v60 = vunpack.c.l.bf16 %v7049_v47  ;;  %v3024_v53 = vrot.slane %v2667_v61, 2  ;;  %v7084_v59 = vld [vmem:[%s10844_s1 + $0x28] sm:$0x3] }
  0xf6   : > { %v2730_v57 = vpack.c.bf16 %v2713_v22, %v2710_v24  ;;  %v2882_v24 = vrot.slane %v2846_v15, 1 }
  0xf7   : > { %v2885_v50 = vrot.slane %v2848_v42, 1  ;;  %v3027_v42 = vrot.slane %v2669_v16, 2 }
  0xfb   : > { %8055 = vmatmul.mubr.msk.bf16.gmra.mrb[4].mxu0 %vm324_vm1, %v2335_v52  ;;  %v2838_v52 = vunpack.c.l.bf16 %v7038_v23 }
  0xfc   : > { %8060 = vmatprep.mubr.msk.bf16.mxu0 %vm324_vm1, %v8969_v14  ;;  %v2839_v14 = vunpack.c.l.bf16 %v7039_v41 }
  0xfd   : > { %v2870_v25 = vrot.slane %v2838_v52, 1  ;;  %v2886_v52 = vrot.slane %v2849_v60, 1 }
  0xfe   : > { %v2871_v6 = vrot.slane %v2839_v14, 1  ;;  %v7053_v14 = vld [vmem:[%s9202_s10 + $0x134] sm:$0x1] }
 0x100   : > { %v2872_v26 = vsel %vm534_vm2, %v2870_v25, %v2871_v6  ;;  %v3071_v6 = vsel %vm337_vm0, %v7067_v32, 0 }
 0x103   : > { %8061 = vmatmul.mubr.msk.bf16.vlgmr.msra.gmra.mrb[0].mxu0 %vm324_vm1, %v8970_v19  ;;  %v2840_v19 = vunpack.c.h.bf16 %v7038_v23 }
 0x104   : > { %8069 = vmatpush3.bf16.msra.mxu0 %v2573_v49  ;;  %8064 = vmatprep.mubr.msk.bf16.mxu0 %vm324_vm1, %v8971_v51  ;;  %v2841_v51 = vunpack.c.l.bf16 %v7041_v48  ;;  %v8988_v49 = vld [vmem:[%s10846_s3 + $0xc8] sm:$0xff]  }
 0x105   : > { %8927 = vmatprep.subr.msk.bf16.mxu0 %vm337_vm0, %v7033_v27  ;;  %v2714_v27 = vrot.slane %v2676_v13, 1  ;;  %8232 = vmatprep.subr.bf16.mxu1 %v8988_v49  ;;  %v2873_v37 = vrot.slane %v2840_v19, 1 }
 0x106   : > { %v2874_v34 = vrot.slane %v2841_v51, 1  ;;  %8233 = vmatpush3.bf16.msra.mxu1 %v8988_v49  ;;  %v7059_v51 = vld [vmem:[%s9202_s10 + $0xa8] sm:$0xe]  ;;  %v7060_v49 = vld [vmem:[%s9202_s10 + $0xb0] sm:$0xe] }
 0x108   : > { %v2875_v39 = vsel %vm534_vm2, %v2873_v37, %v2874_v34 }
 0x109   : > { %v2902_v13 = vpack.c.bf16 %v2875_v39, %v2872_v26 }
 0x10b   : > { %8065 = vmatmul.mubr.msk.bf16.gmra.mrb[4].mxu0 %vm324_vm1, %v8972_v12  ;;  %v2715_v12 = vrot.slane %v2677_v7, 1 }
 0x10c   : > { %8070 = vmatprep.mubr.msk.bf16.mxu0 %vm324_vm1, %v8973_v33  ;;  %v2717_v33 = vrot.slane %v2678_v21, 1  ;;  %v7050_v21 = vld [vmem:[%s9202_s10 + $0x128] ss:$8 sps:$4 sm:$0xff]  }
 0x10d   : > { %v2716_v63 = vsel %vm534_vm2, %v2714_v27, %v2715_v12  ;;  %v2850_v12 = vunpack.c.l.bf16 %v7050_v21 }
 0x10e   : > { %v2719_v54 = vsel %vm534_vm2, %v2717_v33, %v2718_v40  ;;  %v2851_v33 = vunpack.c.l.bf16 %v7051_v56  ;;  %v3036_v56 = vrot.slane %v2675_v0, 2 }
 0x10f   : > { %v2731_v41 = vpack.c.bf16 %v2719_v54, %v2716_v63  ;;  %v2888_v37 = vrot.slane %v2850_v12, 1  ;;  %v7061_v63 = vld [vmem:[%s9202_s10 + $0xb8] sm:$0xe] }
 0x110   : > { %v2889_v34 = vrot.slane %v2851_v33, 1  ;;  %v7122_v33 = vld [vmem:[%s10844_s1 + $0x2c] sm:$0x3] }
 0x112   : > { %v2890_v18 = vsel %vm534_vm2, %v2888_v37, %v2889_v34  ;;  %v8982_v34 = vld [vmem:[%s9202_s10 + $0x70] ss:$8 sps:$4 sm:$0xff]  }
 0x113   : > { %8071 = vmatmul.mubr.msk.bf16.vlgmr.msra.gmra.mrb[0].mxu0 %vm324_vm1, %v8974_v62  ;;  %v7042_v62 = vld [vmem:[%s9202_s10 + $0x108] ss:$8 sps:$4 sm:$0xff]  }
 0x114   : > { %8079 = vmatpush3.bf16.msra.mxu0 %v2747_v8  ;;  %8074 = vmatprep.mubr.msk.bf16.mxu0 %vm324_vm1, %v8975_v28  ;;  %v7043_v8 = vld [vmem:[%s9202_s10 + $0x10c] sm:$0x1]  ;;  %v8990_v28 = vld [vmem:[%s10846_s3 + $0xd0] sm:$0xff]   ;;  %v2842_v35 = vunpack.c.l.bf16 %v7042_v62  ;;  %v2844_v20 = vunpack.c.h.bf16 %v7042_v62  ;;  %v2887_v62 = vsel %vm534_vm2, %v2885_v50, %v2886_v52 }
 0x115   : > { %8928 = vmatprep.subr.msk.bf16.mxu0 %vm337_vm0, %v9799_v55  ;;  %v2843_v9 = vunpack.c.l.bf16 %v7043_v8  ;;  %8234 = vmatprep.subr.bf16.mxu1 %v8990_v28  ;;  %v8992_v55 = vld [vmem:[%s10846_s3 + $0xd8] sm:$0xff]   ;;  %v3004_v8 = vunpack.c.l.bf16 %v7059_v51  ;;  %v7101_v51 = vld [vmem:[%s10844_s1 + $0x2a] sm:$0x3] }
 0x116   : > { %8235 = vmatpush3.bf16.msra.mxu1 %v8990_v28  ;;  %v2879_v48 = vrot.slane %v2844_v20, 1  ;;  %v3005_v28 = vunpack.c.l.bf16 %v7060_v49  ;;  %v7062_v20 = vld [vmem:[%s9202_s10 + $0xc0] sm:$0xe]  ;;  %v3293_v12 = vsel %vm337_vm0, %v7101_v51, 0 }
 0x117   : > { %v2877_v23 = vrot.slane %v2843_v9, 1  ;;  %8236 = vmatprep.subr.bf16.mxu1 %v8992_v55  ;;  %v3021_v9 = vrot.slane %v2665_v31, 2  ;;  %v3006_v31 = vunpack.c.l.bf16 %v7061_v63  ;;  %v3007_v61 = vunpack.c.l.bf16 %v7062_v20  ;;  %v8978_v49 = vld [vmem:[%s9202_s10 + $0x20] ss:$8 sps:$4 sm:$0xff]   ;;  %v9971_v63 = vld [vmem:[%s9202_s10 + $0x3c] sm:$0x1] }
 0x118   : > { %v2881_v27 = vsel %vm534_vm2, %v2879_v48, %v2880_v29  ;;  %v3023_v47 = vrot.slane %v3005_v28, 2  ;;  %v7065_v48 = vld [vmem:[%s9202_s10 + $0xd8] sm:$0xe] }
 0x119   : > { %v3010_v3 = vunpack.c.l.bf16 %v7065_v48 }
 0x11a   : > { %8237 = vmatpush3.bf16.msra.mxu1 %v8992_v55  ;;  %v7064_v55 = vld [vmem:[%s9202_s10 + $0xd0] sm:$0xe]  ;;  %v3025_v26 = vsel %vm859_vm3, %v3023_v47, %v3024_v53  ;;  %v9964_v53 = vld [vmem:[%s9202_s10 + $0x2c] sm:$0x1]  ;;  %v9968_v47 = vld [vmem:[%s9202_s10 + $0x34] sm:$0x1] }
 0x11b   : > { %8075 = vmatmul.mubr.msk.bf16.gmra.mrb[4].mxu0 %vm324_vm1, %v8976_v1  ;;  %v7047_v1 = vld [vmem:[%s9202_s10 + $0x11c] sm:$0x1]  ;;  %v3009_v15 = vunpack.c.l.bf16 %v7064_v55  ;;  %v3038_v50 = vrot.slane %v3010_v3, 2 }
 0x11c   : > { %8080 = vmatprep.mubr.msk.bf16.mxu0 %vm324_vm1, %v2728_v10  ;;  %v2847_v2 = vunpack.c.l.bf16 %v7047_v1  ;;  %v2876_v10 = vrot.slane %v2842_v35, 1  ;;  %v3020_v1 = vrot.slane %v3004_v8, 2  ;;  %v9950_v8 = vld [vmem:[%s9202_s10 + $0x1c] sm:$0x1] }
 0x11d   : > { %v3040_v5 = vsel %vm859_vm3, %v3038_v50, %v3039_v38  ;;  %v3387_v37 = vunpack.c.l.bf16 %v9950_v8 }
 0x11e   : > { %v2883_v22 = vrot.slane %v2847_v2, 1  ;;  %v2878_v19 = vsel %vm534_vm2, %v2876_v10, %v2877_v23  ;;  %v3022_v54 = vsel %vm859_vm3, %v3020_v1, %v3021_v9  ;;  %v3026_v10 = vrot.slane %v3006_v31, 2  ;;  %v9961_v9 = vld [vmem:[%s9202_s10 + $0x24] sm:$0x1]  ;;  %v7114_v1 = vld [vmem:[%s9202_s10 + $0x30] ss:$8 sps:$4 sm:$0xff]  }
 0x11f   : > { %v2903_v25 = vpack.c.bf16 %v2881_v27, %v2878_v19  ;;  %v3052_v60 = vpack.c.bf16 %v3025_v26, %v3022_v54  ;;  %v3029_v23 = vrot.slane %v3007_v61, 2  ;;  %v3182_v19 = vsel %vm337_vm0, %v7084_v59, 0  ;;  %v8979_v27 = vld [vmem:[%s9202_s10 + $0x30] ss:$8 sps:$4 sm:$0xff]  }
 0x120   : > { %v2884_v40 = vsel %vm534_vm2, %v2882_v24, %v2883_v22  ;;  %v7066_v24 = vld [vmem:[%s9202_s10 + $0xe0] sm:$0xe]  ;;  %v3028_v43 = vsel %vm859_vm3, %v3026_v10, %v3027_v42  ;;  %v3420_v55 = vrot.slane %v3387_v37, 1  ;;  %v3389_v31 = vunpack.c.l.bf16 %v9961_v9  ;;  %v8984_v42 = vld [vmem:[%s9202_s10 + $0x90] ss:$8 sps:$4 sm:$0xff]  }
 0x121   : > { %v3391_v54 = vunpack.c.l.bf16 %v9964_v53  ;;  %v3392_v26 = vunpack.c.l.bf16 %v7114_v1 }
 0x123   : > { %8081 = vmatmul.mubr.msk.bf16.vlgmr.msra.gmra.mrb[0].mxu0 %vm324_vm1, %v2729_v36  ;;  %v2852_v36 = vunpack.c.h.bf16 %v7050_v21  ;;  %v3035_v21 = vrot.slane %v3009_v15, 2  ;;  %v3394_v15 = vunpack.c.h.bf16 %v7114_v1 }
 0x124   : > { %8089 = vmatpush3.bf16.msra.mxu0 %v2921_v45  ;;  %8084 = vmatprep.mubr.msk.bf16.mxu0 %vm324_vm1, %v2730_v57  ;;  %v2853_v57 = vunpack.c.l.bf16 %v7053_v14  ;;  %v2904_v45 = vpack.c.bf16 %v2887_v62, %v2884_v40  ;;  %v3042_v14 = vrot.slane %v2679_v44, 2  ;;  %v8977_v44 = vld [vmem:[%s9202_s10 + $0x10] ss:$8 sps:$4 sm:$0xff]   ;;  %v9947_v62 = vld [vmem:[%s9202_s10 + $0x14] sm:$0x1] }
 0x125   : > { %8929 = vmatprep.subr.msk.bf16.mxu0 %vm337_vm0, %v7067_v32  ;;  %v2891_v11 = vrot.slane %v2852_v36, 1  ;;  %v7063_v32 = vld [vmem:[%s9202_s10 + $0xc8] sm:$0xe]  ;;  %v3037_v4 = vsel %vm859_vm3, %v3035_v21, %v3036_v56  ;;  %v7106_v40 = vld [vmem:[%s9202_s10 + $0x10] ss:$8 sps:$4 sm:$0xff]   ;;  %v3428_v21 = vrot.slane %v3392_v26, 1 }
 0x126   : > { %v2892_v35 = vrot.slane %v2853_v57, 1  ;;  %v3008_v39 = vunpack.c.l.bf16 %v7063_v32  ;;  %v8980_v36 = vld [vmem:[%s9202_s10 + $0x40] ss:$8 sps:$4 sm:$0xff]   ;;  %v3384_v28 = vunpack.c.l.bf16 %v7106_v40 }
 0x127   : > { %v8981_v57 = vld [vmem:[%s9202_s10 + $0x60] ss:$8 sps:$4 sm:$0xff]  }
 0x128   : > { %v2893_v30 = vsel %vm534_vm2, %v2891_v11, %v2892_v35  ;;  %v3032_v29 = vrot.slane %v3008_v39, 2  ;;  %v3467_v11 = vsel %vm337_vm0, %v7122_v33, 0  ;;  %v7110_v35 = vld [vmem:[%s9202_s10 + $0x20] ss:$8 sps:$4 sm:$0xff]   ;;  %v3416_v20 = vrot.slane %v3384_v28, 1 }
 0x129   : > { %v2905_v2 = vpack.c.bf16 %v2893_v30, %v2890_v18  ;;  %v7143_v18 = vld [vmem:[%s10844_s1 + $0x2e] sm:$0x3]  ;;  %v3388_v30 = vunpack.c.l.bf16 %v7110_v35  ;;  %v3390_v61 = vunpack.c.h.bf16 %v7110_v35  ;;  %v3393_v39 = vunpack.c.l.bf16 %v9968_v47  ;;  %v7131_v28 = vld [vmem:[%s9202_s10 + $0x70] ss:$8 sps:$4 sm:$0xff]   ;;  %v7132_v35 = vld [vmem:[%s9202_s10 + $0x74] sm:$0x1] }
 0x12a   : > { %v3641_v1 = vsel %vm337_vm0, %v7143_v18, 0 }
 0x12b   : > { %8085 = vmatmul.mubr.msk.bf16.gmra.mrb[4].mxu0 %vm324_vm1, %v2731_v41  ;;  %v3030_v41 = vrot.slane %v2671_v46, 2  ;;  %v3011_v46 = vunpack.c.l.bf16 %v7066_v24  ;;  %v3425_v48 = vrot.slane %v3390_v61, 1  ;;  %v3429_v56 = vrot.slane %v3393_v39, 1 }
 0x12c   : > { %8090 = vmatprep.mubr.msk.bf16.mxu0 %vm324_vm1, %v2902_v13  ;;  %v3033_v13 = vrot.slane %v2673_v58, 2  ;;  %v3431_v24 = vrot.slane %v3394_v15, 1  ;;  %v3562_v15 = vunpack.c.l.bf16 %v7131_v28 }
 0x12d   : > { %v3031_v16 = vsel %vm859_vm3, %v3029_v23, %v3030_v41  ;;  %v3041_v52 = vrot.slane %v3011_v46, 2  ;;  %v3422_v23 = vrot.slane %v3388_v30, 1  ;;  %v3423_v41 = vrot.slane %v3389_v31, 1  ;;  %v10003_v46 = vld [vmem:[%s9202_s10 + $0x4c] sm:$0x1] }
 0x12e   : > { %v3034_v22 = vsel %vm859_vm3, %v3032_v29, %v3033_v13  ;;  %v3053_v58 = vpack.c.bf16 %v3031_v16, %v3028_v43  ;;  %v3426_v29 = vrot.slane %v3391_v54, 1  ;;  %v7118_v13 = vld [vmem:[%s9202_s10 + $0x40] ss:$8 sps:$4 sm:$0xff]   ;;  %v10000_v16 = vld [vmem:[%s9202_s10 + $0x44] sm:$0x1] }
 0x12f   : > { %v3054_v0 = vpack.c.bf16 %v3037_v4, %v3034_v22  ;;  %v3043_v7 = vsel %vm859_vm3, %v3041_v52, %v3042_v14  ;;  %v7127_v22 = vld [vmem:[%s9202_s10 + $0x60] ss:$8 sps:$4 sm:$0xff]   ;;  %v7128_v4 = vld [vmem:[%s9202_s10 + $0x64] sm:$0x1]  ;;  %v3424_v38 = vsel %vm534_vm2, %v3422_v23, %v3423_v41  ;;  %v3396_v50 = vunpack.c.l.bf16 %v7118_v13  ;;  %v7138_v30 = vld [vmem:[%s9202_s10 + $0x8c] sm:$0x1] }
 0x130   : > { %v3055_v17 = vpack.c.bf16 %v3043_v7, %v3040_v5  ;;  %v3397_v52 = vunpack.c.l.bf16 %v10000_v16  ;;  %v3430_v14 = vsel %vm534_vm2, %v3428_v21, %v3429_v56  ;;  %v3399_v5 = vunpack.c.l.bf16 %v10003_v46  ;;  %v8989_v16 = vld [vmem:[%s10846_s3 + $0x50] sm:$0xff]  }
 0x131   : > { %v3558_v7 = vunpack.c.l.bf16 %v7127_v22  ;;  %v3596_v56 = vrot.slane %v3562_v15, 1  ;;  %v7151_v15 = vld [vmem:[%s9202_s10 + $0x28] sm:$0xe] }
 0x133   : > { %8091 = vmatmul.mubr.msk.bf16.vlgmr.msra.gmra.mrb[0].mxu0 %vm324_vm1, %v2903_v25  ;;  %v3385_v25 = vunpack.c.l.bf16 %v9947_v62 }
 0x134   : > { %8099 = vmatpush3.bf16.msra.mxu0 %v3071_v6  ;;  %8094 = vmatprep.mubr.msk.bf16.mxu0 %vm324_vm1, %v2904_v45  ;;  %v3386_v6 = vunpack.c.h.bf16 %v7106_v40  ;;  %v8983_v45 = vld [vmem:[%s9202_s10 + $0x80] ss:$8 sps:$4 sm:$0xff]   ;;  %v3438_v40 = vrot.slane %v3399_v5, 1 }
 0x135   : > { %8930 = vmatprep.subr.msk.bf16.mxu0 %vm337_vm0, %v7084_v59  ;;  %v3417_v59 = vrot.slane %v3385_v25, 1 }
 0x136   : > { %v3419_v32 = vrot.slane %v3386_v6, 1  ;;  %v3590_v6 = vrot.slane %v3558_v7, 1  ;;  %v7149_v7 = vld [vmem:[%s9202_s10 + $0x18] sm:$0xe] }
 0x138   : > { %v3421_v10 = vsel %vm534_vm2, %v3419_v32, %v3420_v55  ;;  %v7135_v32 = vld [vmem:[%s9202_s10 + $0x80] ss:$8 sps:$4 sm:$0xff]   ;;  %v7136_v55 = vld [vmem:[%s9202_s10 + $0x84] sm:$0x1] }
 0x139   : > { %v3566_v41 = vunpack.c.l.bf16 %v7135_v32 }
 0x13b   : > { %8095 = vmatmul.mubr.msk.bf16.gmra.mrb[4].mxu0 %vm324_vm1, %v2905_v2  ;;  %v3395_v2 = vunpack.c.l.bf16 %v9971_v63 }
 0x13c   : > { %8100 = vmatprep.mubr.msk.bf16.mxu0 %vm324_vm1, %v3052_v60  ;;  %v3418_v60 = vsel %vm534_vm2, %v3416_v20, %v3417_v59  ;;  %v7156_v20 = vld [vmem:[%s10844_s1 + $0x30] sm:$0x3]  ;;  %v7134_v59 = vld [vmem:[%s9202_s10 + $0x7c] sm:$0x1] }
 0x13d   : > { %v3432_v43 = vrot.slane %v3395_v2, 1  ;;  %v3448_v3 = vpack.c.bf16 %v3421_v10, %v3418_v60  ;;  %v3564_v10 = vunpack.c.h.bf16 %v7131_v28  ;;  %v3565_v23 = vunpack.c.l.bf16 %v7134_v59 }
 0x13e   : > { %v3725_v28 = vunpack.c.l.bf16 %v7149_v7 }
 0x143   : > { %8101 = vmatmul.mubr.msk.bf16.vlgmr.msra.gmra.mrb[0].mxu0 %vm324_vm1, %v3053_v58  ;;  %v7130_v58 = vld [vmem:[%s9202_s10 + $0x6c] sm:$0x1] }
 0x144   : > { %8109 = vmatpush3.bf16.msra.mxu0 %v3182_v19  ;;  %8104 = vmatprep.mubr.msk.bf16.mxu0 %vm324_vm1, %v3054_v0  ;;  %v3427_v0 = vsel %vm534_vm2, %v3425_v48, %v3426_v29  ;;  %v3433_v19 = vsel %vm534_vm2, %v3431_v24, %v3432_v43  ;;  %v3567_v48 = vunpack.c.l.bf16 %v7136_v55  ;;  %v3568_v29 = vunpack.c.h.bf16 %v7135_v32  ;;  %v7150_v55 = vld [vmem:[%s9202_s10 + $0x20] sm:$0xe] }
 0x145   : > { %8931 = vmatprep.subr.msk.bf16.mxu0 %vm337_vm0, %v7101_v51  ;;  %v3398_v51 = vunpack.c.h.bf16 %v7118_v13  ;;  %v3569_v13 = vunpack.c.l.bf16 %v7138_v30  ;;  %v3741_v32 = vrot.slane %v3385_v25, 2 }
 0x14b   : > { %8105 = vmatmul.mubr.msk.bf16.gmra.mrb[4].mxu0 %vm324_vm1, %v3055_v17  ;;  %v3559_v17 = vunpack.c.l.bf16 %v7128_v4  ;;  %v7139_v4 = vld [vmem:[%s9202_s10 + $0x90] ss:$8 sps:$4 sm:$0xff]  }
 0x14c   : > { %8110 = vmatprep.mubr.msk.bf16.mxu0 %vm324_vm1, %v8977_v44  ;;  %v3560_v44 = vunpack.c.h.bf16 %v7127_v22  ;;  %v3600_v22 = vrot.slane %v3565_v23, 1 }
 0x153   : > { %8111 = vmatmul.mubr.msk.bf16.vlgmr.msra.gmra.mrb[0].mxu0 %vm324_vm1, %v8978_v49  ;;  %v3561_v49 = vunpack.c.l.bf16 %v7130_v58  ;;  %v7140_v58 = vld [vmem:[%s9202_s10 + $0x94] sm:$0x1] }
 0x154   : > { %8119 = vmatpush3.bf16.msra.mxu0 %v3293_v12  ;;  %8114 = vmatprep.mubr.msk.bf16.mxu0 %vm324_vm1, %v8979_v27  ;;  %v3449_v27 = vpack.c.bf16 %v3427_v0, %v3424_v38  ;;  %v3434_v12 = vrot.slane %v3396_v50, 1  ;;  %v3602_v38 = vrot.slane %v3566_v41, 1  ;;  %v3603_v0 = vrot.slane %v3567_v48, 1 }
 0x155   : > { %8932 = vmatprep.subr.msk.bf16.mxu0 %vm337_vm0, %v7122_v33  ;;  %v3450_v33 = vpack.c.bf16 %v3433_v19, %v3430_v14  ;;  %v3605_v50 = vrot.slane %v3568_v29, 1  ;;  %v3606_v14 = vrot.slane %v3569_v13, 1  ;;  %v7142_v19 = vld [vmem:[%s9202_s10 + $0x9c] sm:$0x1]  ;;  %v3747_v13 = vrot.slane %v3389_v31, 2 }
 0x15b   : > { %8115 = vmatmul.mubr.msk.bf16.gmra.mrb[4].mxu0 %vm324_vm1, %v8980_v36  ;;  %v3435_v36 = vrot.slane %v3397_v52, 1 }
 0x15c   : > { %8120 = vmatprep.mubr.msk.bf16.mxu0 %vm324_vm1, %v8981_v57  ;;  %v3437_v57 = vrot.slane %v3398_v51, 1  ;;  %v7148_v51 = vld [vmem:[%s9202_s10 + $0x10] sm:$0xe] }
 0x15d   : > { %v3436_v61 = vsel %vm534_vm2, %v3434_v12, %v3435_v36  ;;  %v3572_v12 = vunpack.c.h.bf16 %v7139_v4  ;;  %v3604_v36 = vsel %vm534_vm2, %v3602_v38, %v3603_v0  ;;  %v7155_v38 = vld [vmem:[%s9202_s10 + $0x48] sm:$0xe] }
 0x15e   : > { %v3439_v26 = vsel %vm534_vm2, %v3437_v57, %v3438_v40  ;;  %v3607_v57 = vsel %vm534_vm2, %v3605_v50, %v3606_v14  ;;  %v3724_v40 = vunpack.c.l.bf16 %v7148_v51  ;;  %v8987_v51 = vld [vmem:[%s10846_s3 + $0x48] sm:$0xff]  }
 0x15f   : > { %v3451_v21 = vpack.c.bf16 %v3439_v26, %v3436_v61  ;;  %v3743_v61 = vrot.slane %v3725_v28, 2  ;;  %v3744_v26 = vrot.slane %v3387_v37, 2  ;;  %v9000_v28 = vld [vmem:[%s10846_s3 + $0xf8] sm:$0xff]  }
 0x160   : > { %v3740_v30 = vrot.slane %v3724_v40, 2  ;;  %v8998_v40 = vld [vmem:[%s10846_s3 + $0xf0] sm:$0xff]  }
 0x161   : > { %v3745_v37 = vsel %vm859_vm3, %v3743_v61, %v3744_v26 }
 0x162   : > { %v3742_v8 = vsel %vm859_vm3, %v3740_v30, %v3741_v32 }
 0x163   : > { %8121 = vmatmul.mubr.msk.bf16.vlgmr.msra.gmra.mrb[0].mxu0 %vm324_vm1, %v8982_v34  ;;  %v3591_v34 = vrot.slane %v3559_v17, 1  ;;  %v3570_v17 = vunpack.c.l.bf16 %v7139_v4 }
 0x164   : > { %8129 = vmatpush3.bf16.msra.mxu0 %v3467_v11  ;;  %8124 = vmatprep.mubr.msk.bf16.mxu0 %vm324_vm1, %v8983_v45  ;;  %v3593_v11 = vrot.slane %v3560_v44, 1  ;;  %v3594_v45 = vrot.slane %v3561_v49, 1  ;;  %v3571_v44 = vunpack.c.l.bf16 %v7140_v58  ;;  %v7154_v58 = vld [vmem:[%s9202_s10 + $0x40] sm:$0xe] }
 0x165   : > { %8933 = vmatprep.subr.msk.bf16.mxu0 %vm337_vm0, %v7143_v18  ;;  %v3592_v18 = vsel %vm534_vm2, %v3590_v6, %v3591_v34  ;;  %v3791_v34 = vsel %vm337_vm0, %v7156_v20, 0  ;;  %v3730_v31 = vunpack.c.l.bf16 %v7154_v58 }
 0x166   : > { %v3595_v60 = vsel %vm534_vm2, %v3593_v11, %v3594_v45  ;;  %v3608_v11 = vrot.slane %v3570_v17, 1  ;;  %v3609_v45 = vrot.slane %v3571_v44, 1  ;;  %v8995_v44 = vld [vmem:[%s10846_s3 + $0x68] sm:$0xff]  }
 0x167   : > { %v3622_v43 = vpack.c.bf16 %v3595_v60, %v3592_v18  ;;  %v7153_v18 = vld [vmem:[%s9202_s10 + $0x38] sm:$0xe]  ;;  %v3726_v60 = vunpack.c.l.bf16 %v7150_v55  ;;  %v3758_v50 = vrot.slane %v3730_v31, 2 }
 0x168   : > { %v3610_v62 = vsel %vm534_vm2, %v3608_v11, %v3609_v45  ;;  %v3729_v41 = vunpack.c.l.bf16 %v7153_v18 }
 0x169   : > { %v3746_v29 = vrot.slane %v3726_v60, 2 }
 0x16a   : > { %v3755_v4 = vrot.slane %v3729_v41, 2 }
 0x16b   : > { %8125 = vmatmul.mubr.msk.bf16.gmra.mrb[4].mxu0 %vm324_vm1, %v8984_v42  ;;  %v3563_v42 = vunpack.c.l.bf16 %v7132_v35  ;;  %v3624_v35 = vpack.c.bf16 %v3607_v57, %v3604_v36  ;;  %v3748_v9 = vsel %vm859_vm3, %v3746_v29, %v3747_v13  ;;  %v8996_v36 = vld [vmem:[%s10846_s3 + $0xe8] sm:$0xff]   ;;  %v9001_v57 = vld [vmem:[%s10846_s3] sm:$0xff]  }
 0x16c   : > { %8130 = vmatprep.mubr.msk.bf16.mxu0 %vm324_vm1, %v3448_v3  ;;  %v3599_v3 = vrot.slane %v3564_v10, 1  ;;  %v3727_v10 = vunpack.c.l.bf16 %v7151_v15 }
 0x16d   : > { %v3597_v24 = vrot.slane %v3563_v42, 1  ;;  %v8985_v42 = vld [vmem:[%s10846_s3 + $0x40] sm:$0xff]  }
 0x16f   : > { %v3598_v49 = vsel %vm534_vm2, %v3596_v56, %v3597_v24  ;;  %v3772_v56 = vpack.c.bf16 %v3745_v37, %v3742_v8  ;;  %v3749_v24 = vrot.slane %v3727_v10, 2  ;;  %v9003_v10 = vld [vmem:[%s10846_s3 + $0x8] sm:$0xff]  }
 0x173   : > { %8131 = vmatmul.mubr.msk.bf16.vlgmr.msra.gmra.mrb[0].mxu0 %vm324_vm1, %v3449_v27  ;;  %v3601_v27 = vsel %vm534_vm2, %v3599_v3, %v3600_v22  ;;  %v3756_v3 = vrot.slane %v3395_v2, 2  ;;  %v3759_v2 = vrot.slane %v3397_v52, 2  ;;  %v8991_v52 = vld [vmem:[%s10846_s3 + $0x58] sm:$0xff]  }
 0x174   : > { %8139 = vmatpush3.bf16.msra.mxu0 %v3641_v1  ;;  %8134 = vmatprep.mubr.msk.bf16.mxu0 %vm324_vm1, %v3450_v33  ;;  %v3573_v33 = vunpack.c.l.bf16 %v7142_v19  ;;  %v3623_v6 = vpack.c.bf16 %v3601_v27, %v3598_v49  ;;  %v3611_v1 = vrot.slane %v3572_v12, 1  ;;  %v3762_v19 = vrot.slane %v3399_v5, 2  ;;  %v8993_v5 = vld [vmem:[%s10846_s3 + $0x60] sm:$0xff]   ;;  %v8997_v27 = vld [vmem:[%s10846_s3 + $0x70] sm:$0xff]  }
 0x175   : > { %8934 = vmatprep.subr.msk.bf16.mxu0 %vm337_vm0, %v7156_v20  ;;  %v7152_v20 = vld [vmem:[%s9202_s10 + $0x30] sm:$0xe]  ;;  %v3760_v7 = vsel %vm859_vm3, %v3758_v50, %v3759_v2  ;;  %v9138_v49 = vmov 0.0   ;;  %v8994_v12 = vld [vmem:[%s10846_s3 + $0xe0] sm:$0xff]   ;;  %v9007_v2 = vld [vmem:[%s10846_s3 + $0x18] sm:$0xff]  }
 0x176   : > { %v3612_v59 = vrot.slane %v3573_v33, 1  ;;  %v3728_v23 = vunpack.c.l.bf16 %v7152_v20  ;;  %3895 = vst [vmem:[#allocation2 + $0x30] sm:$0xff] %v9138_v49  ;;  %3896 = vst [vmem:[#allocation2 + $0x38] sm:$0x3] %v9138_v49  ;;  %8238 = vmatprep.subr.bf16.mxu1 %v8994_v12  ;;  %v8999_v33 = vld [vmem:[%s10846_s3 + $0x78] sm:$0xff]  }
 0x177   : > { %3889 = vst [vmem:[#allocation2] sm:$0xff] %v9138_v49  ;;  %3890 = vst [vmem:[#allocation2 + $0x8] sm:$0x3] %v9138_v49  ;;  %8239 = vmatpush3.bf16.msra.mxu1 %v8994_v12  ;;  %v9010_v12 = vld [vmem:[%s10846_s3 + $0x120] sm:$0xff]  }
 0x178   : > { %v3613_v25 = vsel %vm534_vm2, %v3611_v1, %v3612_v59  ;;  %v3752_v22 = vrot.slane %v3728_v23, 2  ;;  %3891 = vst [vmem:[#allocation2 + $0x10] sm:$0xff] %v9138_v49  ;;  %3892 = vst [vmem:[#allocation2 + $0x18] sm:$0x3] %v9138_v49  ;;  %8240 = vmatprep.subr.bf16.mxu1 %v8996_v36 }
 0x179   : > { %v3625_v48 = vpack.c.bf16 %v3613_v25, %v3610_v62  ;;  %3893 = vst [vmem:[#allocation2 + $0x20] sm:$0xff] %v9138_v49  ;;  %3894 = vst [vmem:[#allocation2 + $0x28] sm:$0x3] %v9138_v49 }
 0x17a   : > { %3897 = vst [vmem:[#allocation2 + $0x40] sm:$0xff] %v9138_v49  ;;  %3898 = vst [vmem:[#allocation2 + $0x48] sm:$0x3] %v9138_v49 }
 0x17b   : > { %8135 = vmatmul.mubr.msk.bf16.gmra.mrb[4].mxu0 %vm324_vm1, %v3451_v21  ;;  %v3750_v21 = vrot.slane %v3391_v54, 2  ;;  %v3731_v54 = vunpack.c.l.bf16 %v7155_v38  ;;  %3899 = vst [vmem:[#allocation2 + $0x50] sm:$0xff] %v9138_v49  ;;  %3900 = vst [vmem:[#allocation2 + $0x58] sm:$0x3] %v9138_v49  ;;  %8241 = vmatpush3.bf16.msra.mxu1 %v8996_v36  ;;  %v9012_v36 = vld [vmem:[%s10846_s3 + $0x128] sm:$0xff]  }
 0x17c   : > { %8140 = vmatprep.mubr.msk.bf16.mxu0 %vm324_vm1, %v3622_v43  ;;  %v3753_v43 = vrot.slane %v3393_v39, 2  ;;  %v3757_v39 = vsel %vm859_vm3, %v3755_v4, %v3756_v3  ;;  %3901 = vst [vmem:[#allocation2 + $0x60] sm:$0xff] %v9138_v49  ;;  %3902 = vst [vmem:[#allocation2 + $0x68] sm:$0x3] %v9138_v49  ;;  %8242 = vmatprep.subr.bf16.mxu1 %v8998_v40 }
 0x17d   : > { %v3751_v53 = vsel %vm859_vm3, %v3749_v24, %v3750_v21  ;;  %v3761_v14 = vrot.slane %v3731_v54, 2  ;;  %3903 = vst [vmem:[#allocation2 + $0x70] sm:$0xff] %v9138_v49  ;;  %3904 = vst [vmem:[#allocation2 + $0x78] sm:$0x3] %v9138_v49 }
 0x17e   : > { %v3754_v47 = vsel %vm859_vm3, %v3752_v22, %v3753_v43  ;;  %v3773_v63 = vpack.c.bf16 %v3751_v53, %v3748_v9  ;;  %3905 = vst [vmem:[#allocation2 + $0x80] sm:$0xff] %v9138_v49  ;;  %3906 = vst [vmem:[#allocation2 + $0x88] sm:$0x3] %v9138_v49  ;;  %v3946_v61 = vld [vmem:[#allocation2 + $0x1] sm:$0xff]  ;;  %v9005_v43 = vld [vmem:[%s10846_s3 + $0x10] sm:$0xff]  }
 0x17f   : > { %v3774_v0 = vpack.c.bf16 %v3757_v39, %v3754_v47  ;;  %v3763_v17 = vsel %vm859_vm3, %v3761_v14, %v3762_v19  ;;  %3907 = vst [vmem:[#allocation2 + $0x90] sm:$0xff] %v9138_v49  ;;  %3908 = vst [vmem:[#allocation2 + $0x98] sm:$0x3] %v9138_v49  ;;  %8243 = vmatpush3.bf16.msra.mxu1 %v8998_v40  ;;  %v9009_v14 = vld [vmem:[%s10846_s3 + $0x20] sm:$0xff]   ;;  %v9006_v19 = vld [vmem:[%s10846_s3 + $0x110] sm:$0xff]  }
 0x180   : > { %v3775_v46 = vpack.c.bf16 %v3763_v17, %v3760_v7  ;;  %5275 = vst [vmem:[#allocation3] sm:$0xff] %v9138_v49  ;;  %5276 = vst [vmem:[#allocation3 + $0x8] sm:$0x3] %v9138_v49  ;;  %8244 = vmatprep.subr.bf16.mxu1 %v9000_v28  ;;  %v9014_v40 = vld [vmem:[%s10846_s3 + $0x130] sm:$0xff]  }
 0x181   : > { %5277 = vst [vmem:[#allocation3 + $0x10] sm:$0xff] %v9138_v49  ;;  %5278 = vst [vmem:[#allocation3 + $0x18] sm:$0x3] %v9138_v49 }
 0x182   : > { %5279 = vst [vmem:[#allocation3 + $0x20] sm:$0xff] %v9138_v49  ;;  %5280 = vst [vmem:[#allocation3 + $0x28] sm:$0x3] %v9138_v49 }
 0x183   : > { %8141 = vmatmul.mubr.msk.bf16.vlgmr.msra.gmra.mrb[0].mxu0 %vm324_vm1, %v3623_v6  ;;  %5281 = vst [vmem:[#allocation3 + $0x30] sm:$0xff] %v9138_v49  ;;  %5282 = vst [vmem:[#allocation3 + $0x38] sm:$0x3] %v9138_v49  ;;  %8245 = vmatpush3.bf16.msra.mxu1 %v9000_v28  ;;  %v10170_v6 = vld [vmem:[%s10846_s3 + $0x100] sm:$0xff]  }
 0x184   : > { %8149 = vmatpush3.bf16.msra.mxu0 %v3791_v34  ;;  %8144 = vmatprep.mubr.msk.bf16.mxu0 %vm324_vm1, %v3624_v35  ;;  %5283 = vst [vmem:[#allocation3 + $0x40] sm:$0xff] %v9138_v49  ;;  %5284 = vst [vmem:[#allocation3 + $0x48] sm:$0x3] %v9138_v49  ;;  %v7161_v34 = vld [vmem:[%s10845_s2] ss:$0 sm:$0xff] }
 0x185   : > { %8158 = vmatprep.subr.bf16.mxu0 %v8985_v42  ;;  %5285 = vst [vmem:[#allocation3 + $0x50] sm:$0xff] %v9138_v49  ;;  %5286 = vst [vmem:[#allocation3 + $0x58] sm:$0x3] %v9138_v49  ;;  %8254 = vmatprep.subr.bf16.mxu1 %v10170_v6 }
 0x186   : > { %5287 = vst [vmem:[#allocation3 + $0x60] sm:$0xff] %v9138_v49  ;;  %5288 = vst [vmem:[#allocation3 + $0x68] sm:$0x3] %v9138_v49 }
 0x187   : > { %5289 = vst [vmem:[#allocation3 + $0x70] sm:$0xff] %v9138_v49  ;;  %5290 = vst [vmem:[#allocation3 + $0x78] sm:$0x3] %v9138_v49 }
 0x188   : > { %5291 = vst [vmem:[#allocation3 + $0x80] sm:$0xff] %v9138_v49  ;;  %5292 = vst [vmem:[#allocation3 + $0x88] sm:$0x3] %v9138_v49 }
 0x189   : > { %5293 = vst [vmem:[#allocation3 + $0x90] sm:$0xff] %v9138_v49  ;;  %5294 = vst [vmem:[#allocation3 + $0x98] sm:$0x3] %v9138_v49 }
 0x18b   : > { %8145 = vmatmul.mubr.msk.bf16.gmra.mrb[4].mxu0 %vm324_vm1, %v3625_v48 }
 0x18c   : > { %8150 = vmatprep.mubr.msk.bf16.mxu0 %vm324_vm1, %v3772_v56 }
 0x193   : > { %8151 = vmatmul.mubr.msk.bf16.vlgmr.msra.gmra.mrb[0].mxu0 %vm324_vm1, %v3773_v63  ;;  %v9004_v63 = vld [vmem:[%s10846_s3 + $0x108] sm:$0xff]  }
 0x194   : > { %8154 = vmatprep.mubr.msk.bf16.mxu0 %vm324_vm1, %v3774_v0  ;;  %8159 = vmatpush3.bf16.msra.mxu0 %v8985_v42 }
 0x195   : > { %8160 = vmatprep.subr.bf16.mxu0 %v8987_v51 }
 0x198   : > { %8161 = vmatpush3.bf16.msra.mxu0 %v8987_v51 }
 0x199   : > { %8162 = vmatprep.subr.bf16.mxu0 %v8989_v16 }
 0x19b   : > { %8155 = vmatmul.mubr.msk.bf16.gmra.mrb[4].mxu0 %vm324_vm1, %v3775_v46 }
 0x19c   : > { %8163 = vmatpush3.bf16.msra.mxu0 %v8989_v16 }
 0x19d   : > { %8164 = vmatprep.subr.bf16.mxu0 %v8991_v52 }
 0x1a0   : > { %8165 = vmatpush3.bf16.msra.mxu0 %v8991_v52 }
 0x1a1   : > { %8166 = vmatprep.subr.bf16.mxu0 %v8993_v5 }
 0x1a4   : > { %8167 = vmatpush3.bf16.msra.mxu0 %v8993_v5  ;;  %v9008_v5 = vld [vmem:[%s10846_s3 + $0x118] sm:$0xff]  }
 0x1a5   : > { %8168 = vmatprep.subr.bf16.mxu0 %v8995_v44 }
 0x1a8   : > { %8169 = vmatpush3.bf16.msra.mxu0 %v8995_v44  ;;  %v9011_v44 = vld [vmem:[%s10846_s3 + $0x28] sm:$0xff]  }
 0x1a9   : > { %8170 = vmatprep.subr.bf16.mxu0 %v8997_v27 }
 0x1ac   : > { %8171 = vmatpush3.bf16.msra.mxu0 %v8997_v27  ;;  %v9013_v27 = vld [vmem:[%s10846_s3 + $0x30] sm:$0xff]  }
 0x1ad   : > { %8172 = vmatprep.subr.bf16.mxu0 %v8999_v33 }
 0x1b0   : > { %8173 = vmatpush3.bf16.msra.mxu0 %v8999_v33  ;;  %v9015_v33 = vld [vmem:[%s10846_s3 + $0x38] sm:$0xff]  }
 0x1b1   : > { %8182 = vmatprep.subr.bf16.mxu0 %v9001_v57 }
 0x266   : > { %v8152_v11 = vpop.f32.mrb[0].mxu0 }
 0x267   : > { %v3875_v45 = vadd.f32 %v8152_v11, %v7161_v34  ;;  %v3827_v35 = vpop.f32.mrb[1].mxu0 }
 0x268   : > { %v3873_v1 = vadd.f32 %v7161_v34, %v3827_v35  ;;  %v8153_v59 = vpop.f32.mrb[2].mxu0  ;;  %v9018_v35 = vld [vmem:[%s10846_s3 + $0x140] sm:$0xff]  }
 0x269   : > { %v10176_v32 = vmax.f32 %v3875_v45, 0.0  ;;  %v3876_v55 = vadd.f32 %v8153_v59, %v7161_v34  ;;  %v3830_v30 = vpop.f32.mrb[3].mxu0  ;;  %v9021_v45 = vld [vmem:[%s10846_s3 + $0x90] sm:$0xff]   ;;  %v4201_v59 = vld [vmem:[#allocation2 + $0x2] sm:$0xff] }
 0x26a   : > { %v10178_v26 = vmax.f32 %v3873_v1, 0.0  ;;  %v3874_v15 = vadd.f32 %v7161_v34, %v3830_v30  ;;  %v9020_v30 = vld [vmem:[%s10846_s3 + $0x148] sm:$0xff]  }
 0x26b   : > { %3912 = vst [vmem:[#allocation2 + $0x31] sm:$0xff] %v10176_v32  ;;  %v10181_v42 = vmax.f32 %v3876_v55, 0.0 }
 0x26c   : > { %3910 = vst [vmem:[#allocation2 + $0x11] sm:$0xff] %v10178_v26  ;;  %v10184_v20 = vmax.f32 %v3874_v15, 0.0  ;;  %v3954_v18 = vpack.c.bf16 %v10178_v26, %v3946_v61  ;;  %v9023_v61 = vld [vmem:[%s10846_s3 + $0x98] sm:$0xff]   ;;  %v9025_v15 = vld [vmem:[%s10846_s3 + $0xa0] sm:$0xff]  }
 0x26d   : > { %3913 = vst [vmem:[#allocation2 + $0x41] sm:$0xff] %v10181_v42  ;;  %v4510_v60 = vpack.c.bf16 %v10181_v42, %v10176_v32 }
 0x26e   : > { %3911 = vst [vmem:[#allocation2 + $0x21] sm:$0xff] %v10184_v20  ;;  %v8156_v62 = vpop.f32.mrb[4].mxu0  ;;  %8174 = vmatprep.mubr.bf16.mxu0 %v3954_v18  ;;  %v10193_v25 = vpack.c.bf16 %v10176_v32, %v10184_v20  ;;  %v4509_v8 = vpack.c.bf16 %v10184_v20, %v10178_v26  ;;  %v9022_v20 = vld [vmem:[%s10846_s3 + $0x150] sm:$0xff]   ;;  %v9027_v18 = vld [vmem:[%s10846_s3 + $0xa8] sm:$0xff]  }
 0x26f   : > { %v3879_v37 = vadd.f32 %v8156_v62, %v7161_v34  ;;  %v3843_v23 = vpop.f32.mrb[5].mxu0  ;;  %v9029_v62 = vld [vmem:[%s10846_s3 + $0xb0] sm:$0xff]  }
 0x270   : > { %v3877_v41 = vadd.f32 %v7161_v34, %v3843_v23  ;;  %v8157_v48 = vpop.f32.mrb[6].mxu0  ;;  %8175 = vmatmul.mubr.bf16.vlgmr.msra.gmra.mrb[8].mxu0 %v10193_v25  ;;  %v9030_v23 = vld [vmem:[%s10846_s3 + $0x170] sm:$0xff]  }
 0x271   : > { %v10201_v29 = vmax.f32 %v3879_v37, 0.0  ;;  %v3880_v13 = vadd.f32 %v8157_v48, %v7161_v34  ;;  %v3846_v21 = vpop.f32.mrb[7].mxu0  ;;  %8183 = vmatpush3.bf16.msra.mxu0 %v9001_v57  ;;  %v9017_v57 = vld [vmem:[%s10846_s3 + $0x80] sm:$0xff]   ;;  %v9028_v37 = vld [vmem:[%s10846_s3 + $0x168] sm:$0xff]  }
 0x272   : > { %v10203_v56 = vmax.f32 %v3877_v41, 0.0  ;;  %v3878_v24 = vadd.f32 %v7161_v34, %v3846_v21  ;;  %8184 = vmatprep.subr.bf16.mxu0 %v9003_v10  ;;  %v4353_v54 = vld [vmem:[#allocation2 + $0x30] sm:$0xff]  ;;  %v9016_v34 = vld [vmem:[%s10846_s3 + $0x138] sm:$0xff]  }
 0x273   : > { %3916 = vst [vmem:[#allocation2 + $0x71] sm:$0xff] %v10201_v29  ;;  %v10209_v3 = vmax.f32 %v3880_v13, 0.0  ;;  %v4351_v38 = vld [vmem:[#allocation2 + $0x10] sm:$0xff]  ;;  %v9032_v21 = vld [vmem:[%s10846_s3 + $0x178] sm:$0xff]  }
 0x274   : > { %3914 = vst [vmem:[#allocation2 + $0x51] sm:$0xff] %v10203_v56  ;;  %v10212_v22 = vmax.f32 %v3878_v24, 0.0  ;;  %v10214_v4 = vld [vmem:[#allocation2 + $0x40] sm:$0xff]  ;;  %v10218_v58 = vpack.c.bf16 %v10203_v56, %v10181_v42  ;;  %v3926_v50 = vpack.c.bf16 %v4351_v38, %v9138_v49  ;;  %v4202_v55 = vld [vmem:[#allocation2 + $0x12] sm:$0xff] }
 0x275   : > { %3917 = vst [vmem:[#allocation2 + $0x81] sm:$0xff] %v10209_v3  ;;  %v4352_v9 = vld [vmem:[#allocation2 + $0x20] sm:$0xff]  ;;  %8185 = vmatpush3.bf16.msra.mxu0 %v9003_v10  ;;  %v4512_v53 = vpack.c.bf16 %v10209_v3, %v10201_v29  ;;  %v4360_v39 = vpack.c.bf16 %v10214_v4, %v4353_v54  ;;  %v4209_v26 = vpack.c.bf16 %v4202_v55, %v4201_v59  ;;  %v9024_v42 = vld [vmem:[%s10846_s3 + $0x158] sm:$0xff]   ;;  %v9062_v59 = vld [vmem:[%s10848_s5 + $0x68] sm:$0xff]  }
 0x276   : > { %3915 = vst [vmem:[#allocation2 + $0x61] sm:$0xff] %v10212_v22  ;;  %v4359_v31 = vpack.c.bf16 %v4352_v9, %v4351_v38  ;;  %8178 = vmatprep.mubr.bf16.mxu0 %v10218_v58  ;;  %8186 = vmatprep.subr.bf16.mxu0 %v9005_v43  ;;  %v10227_v47 = vpack.c.bf16 %v10201_v29, %v10212_v22  ;;  %v4652_v32 = vld [vmem:[#allocation2 + $0x22] sm:$0xff]  ;;  %v4204_v48 = vld [vmem:[#allocation2 + $0x32] sm:$0xff] }
 0x277   : > { %v4511_v0 = vpack.c.bf16 %v10212_v22, %v10203_v56  ;;  %v10274_v28 = vpack.c.bf16 %v4353_v54, %v4352_v9  ;;  %v9026_v10 = vld [vmem:[%s10846_s3 + $0x160] sm:$0xff]   ;;  %v10338_v29 = vpack.c.bf16 %v4204_v48, %v4652_v32  ;;  %v9034_v9 = vld [vmem:[%s10846_s3 + $0x188] sm:$0xff]  }
 0x278   : > { %8246 = vmatprep.mubr.bf16.mxu1 %v4359_v31  ;;  %8179 = vmatmul.mubr.bf16.gmra.mrb[12].mxu0 %v10227_v47  ;;  %v4205_v13 = vld [vmem:[#allocation2 + $0x42] sm:$0xff]  ;;  %v9035_v31 = vld [vmem:[%s10846_s3 + $0x190] sm:$0xff]  }
 0x279   : > { %8247 = vmatmul.mubr.bf16.vlgmr.msra.gmra.mrb[0].mxu1 %v4360_v39  ;;  %8187 = vmatpush3.bf16.msra.mxu0 %v9005_v43  ;;  %v9033_v24 = vld [vmem:[%s10846_s3 + $0x180] sm:$0xff]   ;;  %v4660_v38 = vpack.c.bf16 %v4205_v13, %v4204_v48 }
 0x27a   : > { %8255 = vmatpush3.bf16.msra.mxu1 %v10170_v6  ;;  %8198 = vmatprep.mubr.bf16.mxu0 %v3926_v50  ;;  %v4357_v46 = vld [vmem:[#allocation2 + $0x70] sm:$0xff]  ;;  %v9019_v6 = vld [vmem:[%s10846_s3 + $0x88] sm:$0xff]  }
 0x27b   : > { %8256 = vmatprep.subr.bf16.mxu1 %v9004_v63  ;;  %8188 = vmatprep.subr.bf16.mxu0 %v9007_v2  ;;  %v4355_v7 = vld [vmem:[#allocation2 + $0x50] sm:$0xff] }
 0x27c   : > { %v10247_v51 = vld [vmem:[#allocation2 + $0x80] sm:$0xff]  ;;  %v10283_v11 = vpack.c.bf16 %v4355_v7, %v10214_v4  ;;  %v4206_v41 = vld [vmem:[#allocation2 + $0x52] sm:$0xff] }
 0x27d   : > { %v4356_v17 = vld [vmem:[#allocation2 + $0x60] sm:$0xff]  ;;  %8189 = vmatpush3.bf16.msra.mxu0 %v9007_v2  ;;  %v4362_v52 = vpack.c.bf16 %v10247_v51, %v4357_v46  ;;  %v10343_v56 = vpack.c.bf16 %v4206_v41, %v4205_v13  ;;  %v4208_v22 = vld [vmem:[#allocation2 + $0x72] sm:$0xff] }
 0x27e   : > { %8257 = vmatpush3.bf16.msra.mxu1 %v9004_v63  ;;  %v4361_v16 = vpack.c.bf16 %v4356_v17, %v4355_v7  ;;  %8190 = vmatprep.subr.bf16.mxu0 %v9009_v14  ;;  %v10293_v1 = vpack.c.bf16 %v4357_v46, %v4356_v17  ;;  %v4656_v43 = vld [vmem:[#allocation2 + $0x62] sm:$0xff]  ;;  %v9036_v63 = vld [vmem:[%s10846_s3 + $0x198] sm:$0xff]   ;;  %v9039_v50 = vld [vmem:[%s10846_s3 + $0x1b0] sm:$0xff]  }
 0x27f   : > { %8258 = vmatprep.subr.bf16.mxu1 %v9006_v19  ;;  %v10350_v4 = vpack.c.bf16 %v4208_v22, %v4656_v43  ;;  %v10359_v54 = vld [vmem:[#allocation2 + $0x82] sm:$0xff]  ;;  %v9043_v17 = vld [vmem:[%s10846_s3 + $0x1d0] sm:$0xff]   ;;  %v9044_v46 = vld [vmem:[%s10846_s3 + $0x1d8] sm:$0xff]  }
 0x280   : > { %8250 = vmatprep.mubr.bf16.mxu1 %v4361_v16  ;;  %v4662_v39 = vpack.c.bf16 %v10359_v54, %v4208_v22  ;;  %v9037_v2 = vld [vmem:[%s10846_s3 + $0x1a0] sm:$0xff]   ;;  %v9042_v7 = vld [vmem:[%s10846_s3 + $0x1c8] sm:$0xff]   ;;  %v4813_v16 = vpack.c.bf16 %v9138_v49, %v10247_v51 }
 0x281   : > { %8251 = vmatmul.mubr.bf16.gmra.mrb[4].mxu1 %v4362_v52  ;;  %8191 = vmatpush3.bf16.msra.mxu0 %v9009_v14  ;;  %v9040_v14 = vld [vmem:[%s10846_s3 + $0x1b8] sm:$0xff]   ;;  %v9045_v52 = vld [vmem:[%s10846_s3 + $0x1e0] sm:$0xff]   ;;  %v9046_v51 = vld [vmem:[%s10846_s3 + $0x1e8] sm:$0xff]  }
 0x282   : > { %8259 = vmatpush3.bf16.msra.mxu1 %v9006_v19  ;;  %8270 = vmatprep.mubr.bf16.mxu1 %v4509_v8  ;;  %v9031_v8 = vld [vmem:[%s10846_s3 + $0xb8] sm:$0xff]   ;;  %v9041_v19 = vld [vmem:[%s10846_s3 + $0x1c0] sm:$0xff]  }
 0x283   : > { %8260 = vmatprep.subr.bf16.mxu1 %v9008_v5  ;;  %8192 = vmatprep.subr.bf16.mxu0 %v9011_v44 }
 0x285   : > { %8193 = vmatpush3.bf16.msra.mxu0 %v9011_v44  ;;  %v9049_v44 = vld [vmem:[%s10846_s3 + $0x200] sm:$0xff]  }
 0x286   : > { %8261 = vmatpush3.bf16.msra.mxu1 %v9008_v5  ;;  %8194 = vmatprep.subr.bf16.mxu0 %v9013_v27  ;;  %v9047_v5 = vld [vmem:[%s10846_s3 + $0x1f0] sm:$0xff]  }
 0x287   : > { %8262 = vmatprep.subr.bf16.mxu1 %v9010_v12 }
 0x289   : > { %8195 = vmatpush3.bf16.msra.mxu0 %v9013_v27  ;;  %v9050_v27 = vld [vmem:[%s10846_s3 + $0x208] sm:$0xff]  }
 0x28a   : > { %8263 = vmatpush3.bf16.msra.mxu1 %v9010_v12  ;;  %8196 = vmatprep.subr.bf16.mxu0 %v9015_v33  ;;  %v9051_v12 = vld [vmem:[%s10846_s3 + $0x210] sm:$0xff]  }
 0x28b   : > { %8264 = vmatprep.subr.bf16.mxu1 %v9012_v36 }
 0x28d   : > { %8197 = vmatpush3.bf16.msra.mxu0 %v9015_v33  ;;  %v4959_v33 = vld [vmem:[#allocation2 + $0x91] sm:$0xff] }
 0x28e   : > { %8265 = vmatpush3.bf16.msra.mxu1 %v9012_v36  ;;  %8206 = vmatprep.subr.bf16.mxu0 %v9017_v57  ;;  %v4963_v36 = vpack.c.bf16 %v4959_v33, %v10209_v3  ;;  %v9054_v3 = vld [vmem:[%s10846_s3 + $0x228] sm:$0xff]   ;;  %v9067_v33 = vld [vmem:[%s10848_s5 + $0x10] sm:$0xff]  }
 0x28f   : > { %8266 = vmatprep.subr.bf16.mxu1 %v9014_v40 }
 0x290   : > { %8199 = vmatmul.mubr.bf16.vlgmr.msra.gmra.mrb[8].mxu0 %v10274_v28 }
 0x291   : > { %8202 = vmatprep.mubr.bf16.mxu0 %v10283_v11  ;;  %8207 = vmatpush3.bf16.msra.mxu0 %v9017_v57  ;;  %v9052_v57 = vld [vmem:[%s10846_s3 + $0x218] sm:$0xff]  }
 0x292   : > { %8267 = vmatpush3.bf16.msra.mxu1 %v9014_v40  ;;  %8208 = vmatprep.subr.bf16.mxu0 %v9019_v6  ;;  %v9056_v40 = vld [vmem:[%s10846_s3 + $0x238] sm:$0xff]  }
 0x293   : > { %8268 = vmatprep.subr.bf16.mxu1 %v9016_v34 }
 0x295   : > { %8209 = vmatpush3.bf16.msra.mxu0 %v9019_v6  ;;  %v9058_v6 = vld [vmem:[%s10848_s5 + $0x48] sm:$0xff]  }
 0x296   : > { %8269 = vmatpush3.bf16.msra.mxu1 %v9016_v34  ;;  %8210 = vmatprep.subr.bf16.mxu0 %v9021_v45  ;;  %v9059_v34 = vld [vmem:[%s10848_s5 + $0x50] sm:$0xff]  }
 0x297   : > { %8278 = vmatprep.subr.bf16.mxu1 %v9018_v35 }
 0x298   : > { %8203 = vmatmul.mubr.bf16.gmra.mrb[12].mxu0 %v10293_v1 }
 0x299   : > { %8271 = vmatmul.mubr.bf16.vlgmr.msra.gmra.mrb[0].mxu1 %v4510_v60  ;;  %8211 = vmatpush3.bf16.msra.mxu0 %v9021_v45  ;;  %v4659_v60 = vpack.c.bf16 %v4652_v32, %v4202_v55  ;;  %v9063_v55 = vld [vmem:[%s10848_s5 + $0x70] sm:$0xff]  }
 0x29a   : > { %8274 = vmatprep.mubr.bf16.mxu1 %v4511_v0  ;;  %8279 = vmatpush3.bf16.msra.mxu1 %v9018_v35  ;;  %v9038_v0 = vld [vmem:[%s10846_s3 + $0x1a8] sm:$0xff]   ;;  %v9060_v35 = vld [vmem:[%s10848_s5 + $0x58] sm:$0xff]  }
 0x29b   : > { %8280 = vmatprep.subr.bf16.mxu1 %v9020_v30  ;;  %8222 = vmatprep.mubr.bf16.mxu0 %v4209_v26 }
 0x29c   : > { %8212 = vmatprep.subr.bf16.mxu0 %v9023_v61 }
 0x29d   : > { %8213 = vmatpush3.bf16.msra.mxu0 %v9023_v61  ;;  %v9065_v61 = vld [vmem:[%s10848_s5] sm:$0xff]  }
 0x29e   : > { %8281 = vmatpush3.bf16.msra.mxu1 %v9020_v30  ;;  %8214 = vmatprep.subr.bf16.mxu0 %v9025_v15  ;;  %v9064_v30 = vld [vmem:[%s10848_s5 + $0x78] sm:$0xff]  }
 0x29f   : > { %8282 = vmatprep.subr.bf16.mxu1 %v9022_v20 }
 0x2a1   : > { %8275 = vmatmul.mubr.bf16.gmra.mrb[4].mxu1 %v4512_v53  ;;  %8215 = vmatpush3.bf16.msra.mxu0 %v9025_v15  ;;  %v4661_v53 = vpack.c.bf16 %v4656_v43, %v4206_v41 }
 0x2a2   : > { %8283 = vmatpush3.bf16.msra.mxu1 %v9022_v20  ;;  %8294 = vmatprep.mubr.bf16.mxu1 %v4659_v60 }
 0x2a3   : > { %8284 = vmatprep.subr.bf16.mxu1 %v9024_v42  ;;  %8216 = vmatprep.subr.bf16.mxu0 %v9027_v18 }
 0x2a5   : > { %8217 = vmatpush3.bf16.msra.mxu0 %v9027_v18 }
 0x2a6   : > { %8285 = vmatpush3.bf16.msra.mxu1 %v9024_v42  ;;  %8218 = vmatprep.subr.bf16.mxu0 %v9029_v62 }
 0x2a7   : > { %8286 = vmatprep.subr.bf16.mxu1 %v9026_v10 }
 0x2a9   : > { %8219 = vmatpush3.bf16.msra.mxu0 %v9029_v62 }
 0x2aa   : > { %8287 = vmatpush3.bf16.msra.mxu1 %v9026_v10  ;;  %8220 = vmatprep.subr.bf16.mxu0 %v9031_v8 }
 0x2ab   : > { %8288 = vmatprep.subr.bf16.mxu1 %v9028_v37 }
 0x2ad   : > { %8221 = vmatpush3.bf16.msra.mxu0 %v9031_v8  ;;  %v7362_v8 = vld [vmem:[%s10847_s4] ss:$0 sm:$0xff] }
 0x2ae   : > { %8289 = vmatpush3.bf16.msra.mxu1 %v9028_v37 }
 0x2af   : > { %8290 = vmatprep.subr.bf16.mxu1 %v9030_v23 }
 0x2b0   : > { %8223 = vmatmul.mubr.bf16.vlgmr.msra.gmra.mrb[8].mxu0 %v10338_v29 }
 0x2b1   : > { %8226 = vmatprep.mubr.bf16.mxu0 %v10343_v56 }
 0x2b2   : > { %8291 = vmatpush3.bf16.msra.mxu1 %v9030_v23 }
 0x2b3   : > { %8292 = vmatprep.subr.bf16.mxu1 %v9032_v21 }
 0x2b6   : > { %8293 = vmatpush3.bf16.msra.mxu1 %v9032_v21 }
 0x2b7   : > { %8302 = vmatprep.subr.bf16.mxu1 %v9033_v24 }
 0x2b8   : > { %8227 = vmatmul.mubr.bf16.gmra.mrb[12].mxu0 %v10350_v4 }
 0x2b9   : > { %8295 = vmatmul.mubr.bf16.vlgmr.msra.gmra.mrb[0].mxu1 %v4660_v38 }
 0x2ba   : > { %8298 = vmatprep.mubr.bf16.mxu1 %v4661_v53  ;;  %8303 = vmatpush3.bf16.msra.mxu1 %v9033_v24 }
 0x2bb   : > { %8304 = vmatprep.subr.bf16.mxu1 %v9034_v9 }
 0x2be   : > { %8305 = vmatpush3.bf16.msra.mxu1 %v9034_v9 }
 0x2bf   : > { %8306 = vmatprep.subr.bf16.mxu1 %v9035_v31 }
 0x2c1   : > { %8299 = vmatmul.mubr.bf16.gmra.mrb[4].mxu1 %v4662_v39 }
 0x2c2   : > { %8307 = vmatpush3.bf16.msra.mxu1 %v9035_v31  ;;  %8318 = vmatprep.mubr.bf16.mxu1 %v10274_v28  ;;  %v9057_v28 = vld [vmem:[%s10848_s5 + $0x40] sm:$0xff]  }
 0x2c3   : > { %8308 = vmatprep.subr.bf16.mxu1 %v9036_v63 }
 0x2c6   : > { %8309 = vmatpush3.bf16.msra.mxu1 %v9036_v63 }
 0x2c7   : > { %8310 = vmatprep.subr.bf16.mxu1 %v9037_v2 }
 0x2ca   : > { %8311 = vmatpush3.bf16.msra.mxu1 %v9037_v2 }
 0x2cb   : > { %8312 = vmatprep.subr.bf16.mxu1 %v9038_v0 }
 0x2ce   : > { %8313 = vmatpush3.bf16.msra.mxu1 %v9038_v0 }
 0x2cf   : > { %8314 = vmatprep.subr.bf16.mxu1 %v9039_v50 }
 0x2d2   : > { %8315 = vmatpush3.bf16.msra.mxu1 %v9039_v50 }
 0x2d3   : > { %8316 = vmatprep.subr.bf16.mxu1 %v9040_v14 }
 0x2d6   : > { %8317 = vmatpush3.bf16.msra.mxu1 %v9040_v14 }
 0x2d7   : > { %8326 = vmatprep.subr.bf16.mxu1 %v9041_v19 }
 0x2d9   : > { %8319 = vmatmul.mubr.bf16.vlgmr.msra.gmra.mrb[0].mxu1 %v10283_v11  ;;  %v5109_v11 = vld [vmem:[#allocation2 + $0x92] sm:$0xff] }
 0x2da   : > { %8322 = vmatprep.mubr.bf16.mxu1 %v10293_v1  ;;  %8327 = vmatpush3.bf16.msra.mxu1 %v9041_v19  ;;  %v5113_v45 = vpack.c.bf16 %v5109_v11, %v10359_v54  ;;  %v9061_v1 = vld [vmem:[%s10848_s5 + $0x60] sm:$0xff]  }
 0x2db   : > { %8328 = vmatprep.subr.bf16.mxu1 %v9042_v7 }
 0x2de   : > { %8329 = vmatpush3.bf16.msra.mxu1 %v9042_v7  ;;  %v9066_v7 = vld [vmem:[%s10848_s5 + $0x8] sm:$0xff]  }
 0x2df   : > { %8330 = vmatprep.subr.bf16.mxu1 %v9043_v17 }
 0x2e1   : > { %8323 = vmatmul.mubr.bf16.gmra.mrb[4].mxu1 %v4813_v16 }
 0x2e2   : > { %8331 = vmatpush3.bf16.msra.mxu1 %v9043_v17  ;;  %8342 = vmatprep.mubr.bf16.mxu1 %v10193_v25  ;;  %v9048_v25 = vld [vmem:[%s10846_s3 + $0x1f8] sm:$0xff]  }
 0x2e3   : > { %8332 = vmatprep.subr.bf16.mxu1 %v9044_v46 }
 0x2e6   : > { %8333 = vmatpush3.bf16.msra.mxu1 %v9044_v46 }
 0x2e7   : > { %8334 = vmatprep.subr.bf16.mxu1 %v9045_v52 }
 0x2ea   : > { %8335 = vmatpush3.bf16.msra.mxu1 %v9045_v52 }
 0x2eb   : > { %8336 = vmatprep.subr.bf16.mxu1 %v9046_v51 }
 0x2ee   : > { %8337 = vmatpush3.bf16.msra.mxu1 %v9046_v51 }
 0x2ef   : > { %8338 = vmatprep.subr.bf16.mxu1 %v9047_v5 }
 0x2f2   : > { %8339 = vmatpush3.bf16.msra.mxu1 %v9047_v5 }
 0x2f3   : > { %8340 = vmatprep.subr.bf16.mxu1 %v9048_v25 }
 0x2f6   : > { %8341 = vmatpush3.bf16.msra.mxu1 %v9048_v25 }
 0x2f7   : > { %8350 = vmatprep.subr.bf16.mxu1 %v9049_v44 }
 0x2f9   : > { %8343 = vmatmul.mubr.bf16.vlgmr.msra.gmra.mrb[0].mxu1 %v10218_v58  ;;  %v9053_v58 = vld [vmem:[%s10846_s3 + $0x220] sm:$0xff]  }
 0x2fa   : > { %8346 = vmatprep.mubr.bf16.mxu1 %v10227_v47  ;;  %8351 = vmatpush3.bf16.msra.mxu1 %v9049_v44  ;;  %v9055_v47 = vld [vmem:[%s10846_s3 + $0x230] sm:$0xff]  }
 0x2fb   : > { %8352 = vmatprep.subr.bf16.mxu1 %v9050_v27 }
 0x2fe   : > { %8353 = vmatpush3.bf16.msra.mxu1 %v9050_v27 }
 0x2ff   : > { %8354 = vmatprep.subr.bf16.mxu1 %v9051_v12 }
 0x301   : > { %8347 = vmatmul.mubr.bf16.gmra.mrb[4].mxu1 %v4963_v36 }
 0x302   : > { %8355 = vmatpush3.bf16.msra.mxu1 %v9051_v12  ;;  %8366 = vmatprep.mubr.bf16.mxu1 %v10338_v29 }
 0x303   : > { %8356 = vmatprep.subr.bf16.mxu1 %v9052_v57 }
 0x306   : > { %8357 = vmatpush3.bf16.msra.mxu1 %v9052_v57 }
 0x307   : > { %8358 = vmatprep.subr.bf16.mxu1 %v9053_v58 }
 0x30a   : > { %8359 = vmatpush3.bf16.msra.mxu1 %v9053_v58 }
 0x30b   : > { %8360 = vmatprep.subr.bf16.mxu1 %v9054_v3 }
 0x30e   : > { %8361 = vmatpush3.bf16.msra.mxu1 %v9054_v3 }
 0x30f   : > { %8362 = vmatprep.subr.bf16.mxu1 %v9055_v47 }
 0x312   : > { %8363 = vmatpush3.bf16.msra.mxu1 %v9055_v47 }
 0x313   : > { %8364 = vmatprep.subr.bf16.mxu1 %v9056_v40 }
 0x316   : > { %8365 = vmatpush3.bf16.msra.mxu1 %v9056_v40 }
 0x317   : > { %8374 = vmatprep.subr.bf16.mxu1 %v9057_v28 }
 0x319   : > { %8367 = vmatmul.mubr.bf16.vlgmr.msra.gmra.mrb[0].mxu1 %v10343_v56 }
 0x31a   : > { %8370 = vmatprep.mubr.bf16.mxu1 %v10350_v4  ;;  %8375 = vmatpush3.bf16.msra.mxu1 %v9057_v28  ;;  %v5332_v4 = vld [vmem:[#allocation3 + $0x1] sm:$0xff] }
 0x31b   : > { %8376 = vmatprep.subr.bf16.mxu1 %v9058_v6 }
 0x31e   : > { %8377 = vmatpush3.bf16.msra.mxu1 %v9058_v6 }
 0x31f   : > { %8378 = vmatprep.subr.bf16.mxu1 %v9059_v34 }
 0x321   : > { %8371 = vmatmul.mubr.bf16.gmra.mrb[4].mxu1 %v5113_v45  ;;  %v9068_v45 = vld [vmem:[%s10848_s5 + $0x18] sm:$0xff]  }
 0x322   : > { %8379 = vmatpush3.bf16.msra.mxu1 %v9059_v34 }
 0x323   : > { %8380 = vmatprep.subr.bf16.mxu1 %v9060_v35 }
 0x326   : > { %8381 = vmatpush3.bf16.msra.mxu1 %v9060_v35 }
 0x327   : > { %8382 = vmatprep.subr.bf16.mxu1 %v9061_v1 }
 0x32a   : > { %8383 = vmatpush3.bf16.msra.mxu1 %v9061_v1 }
 0x32b   : > { %8384 = vmatprep.subr.bf16.mxu1 %v9062_v59 }
 0x32e   : > { %8385 = vmatpush3.bf16.msra.mxu1 %v9062_v59 }
 0x32f   : > { %8386 = vmatprep.subr.bf16.mxu1 %v9063_v55 }
 0x332   : > { %8387 = vmatpush3.bf16.msra.mxu1 %v9063_v55 }
 0x333   : > { %8388 = vmatprep.subr.bf16.mxu1 %v9064_v30 }
 0x336   : > { %8389 = vmatpush3.bf16.msra.mxu1 %v9064_v30  ;;  %v9069_v30 = vld [vmem:[%s10848_s5 + $0x20] sm:$0xff]  }
 0x337   : > { %8398 = vmatprep.subr.bf16.mxu1 %v9065_v61 }
 0x383   : > { %v8224_v26 = vpop.f32.mrb[8].mxu0 }
 0x384   : > { %v4312_v15 = vpop.f32.mrb[9].mxu0 }
 0x385   : > { %v8225_v20 = vpop.f32.mrb[10].mxu0 }
 0x386   : > { %v4315_v32 = vpop.f32.mrb[11].mxu0 }
 0x38b   : > { %v8228_v42 = vpop.f32.mrb[12].mxu0 }
 0x38c   : > { %v4328_v18 = vpop.f32.mrb[13].mxu0 }
 0x38d   : > { %v8229_v60 = vpop.f32.mrb[14].mxu0 }
 0x38e   : > { %v4331_v62 = vpop.f32.mrb[15].mxu0 }
 0x3ec   : > { %v8368_v10 = vpop.f32.mrb[0].mxu1 }
 0x3ed   : > { %v8590_v37 = vadd.f32 %v8368_v10, %v8224_v26  ;;  %v5213_v23 = vpop.f32.mrb[1].mxu1 }
 0x3ee   : > { %v8591_v41 = vadd.f32 %v5213_v23, %v4312_v15  ;;  %v8369_v48 = vpop.f32.mrb[2].mxu1 }
 0x3ef   : > { %v5261_v29 = vadd.f32 %v8590_v37, %v7362_v8  ;;  %v8592_v13 = vadd.f32 %v8369_v48, %v8225_v20  ;;  %v5216_v21 = vpop.f32.mrb[3].mxu1  ;;  %v9071_v20 = vld [vmem:[%s10848_s5 + $0x30] sm:$0xff]   ;;  %v9074_v37 = vld [vmem:[%s10848_s5 + $0x88] sm:$0xff]  }
 0x3f0   : > { %v5259_v56 = vadd.f32 %v8591_v41, %v7362_v8  ;;  %v8593_v24 = vadd.f32 %v5216_v21, %v4315_v32  ;;  %v9072_v32 = vld [vmem:[%s10848_s5 + $0x38] sm:$0xff]   ;;  %v9075_v41 = vld [vmem:[%s10848_s5 + $0x90] sm:$0xff]  }
 0x3f1   : > { %v10468_v43 = vmax.f32 %v5261_v29, 0.0  ;;  %v5262_v22 = vadd.f32 %v8592_v13, %v7362_v8  ;;  %v5587_v29 = vld [vmem:[#allocation3 + $0x2] sm:$0xff] }
 0x3f2   : > { %v10470_v38 = vmax.f32 %v5259_v56, 0.0  ;;  %v5260_v9 = vadd.f32 %v8593_v24, %v7362_v8  ;;  %v9076_v56 = vld [vmem:[%s10848_s5 + $0x98] sm:$0xff]  }
 0x3f3   : > { %5298 = vst [vmem:[#allocation3 + $0x31] sm:$0xff] %v10468_v43  ;;  %v10473_v53 = vmax.f32 %v5262_v22, 0.0  ;;  %v9077_v22 = vld [vmem:[%s10848_s5 + $0xa0] sm:$0xff]  }
 0x3f4   : > { %5296 = vst [vmem:[#allocation3 + $0x11] sm:$0xff] %v10470_v38  ;;  %v10476_v31 = vmax.f32 %v5260_v9, 0.0  ;;  %v8372_v54 = vpop.f32.mrb[4].mxu1  ;;  %v5340_v39 = vpack.c.bf16 %v10470_v38, %v5332_v4  ;;  %v9078_v4 = vld [vmem:[%s10848_s5 + $0xa8] sm:$0xff]   ;;  %v9079_v9 = vld [vmem:[%s10848_s5 + $0xb0] sm:$0xff]  }
 0x3f5   : > { %5299 = vst [vmem:[#allocation3 + $0x41] sm:$0xff] %v10473_v53  ;;  %v8594_v63 = vadd.f32 %v8372_v54, %v8228_v42  ;;  %v5229_v2 = vpop.f32.mrb[5].mxu1  ;;  %v5896_v0 = vpack.c.bf16 %v10473_v53, %v10468_v43  ;;  %v9073_v42 = vld [vmem:[%s10848_s5 + $0x80] sm:$0xff]   ;;  %v9080_v54 = vld [vmem:[%s10848_s5 + $0xb8] sm:$0xff]  }
 0x3f6   : > { %5297 = vst [vmem:[#allocation3 + $0x21] sm:$0xff] %v10476_v31  ;;  %v8595_v50 = vadd.f32 %v5229_v2, %v4328_v18  ;;  %v8373_v14 = vpop.f32.mrb[6].mxu1  ;;  %8390 = vmatprep.mubr.bf16.mxu1 %v5340_v39  ;;  %v10485_v19 = vpack.c.bf16 %v10468_v43, %v10476_v31  ;;  %v5895_v17 = vpack.c.bf16 %v10476_v31, %v10470_v38  ;;  %v9081_v39 = vld [vmem:[%s10848_s5 + $0xc0] sm:$0xff]   ;;  %v9082_v2 = vld [vmem:[%s10848_s5 + $0xc8] sm:$0xff]   ;;  %v9096_v38 = vld [vmem:[%s10848_s5 + $0x138] sm:$0xff]  }
 0x3f7   : > { %v5265_v16 = vadd.f32 %v8594_v63, %v7362_v8  ;;  %v8596_v46 = vadd.f32 %v8373_v14, %v8229_v60  ;;  %v5232_v52 = vpop.f32.mrb[7].mxu1  ;;  %v9083_v14 = vld [vmem:[%s10848_s5 + $0xd0] sm:$0xff]   ;;  %v9097_v31 = vld [vmem:[%s10848_s5 + $0x140] sm:$0xff]  }
 0x3f8   : > { %v5263_v51 = vadd.f32 %v8595_v50, %v7362_v8  ;;  %v8597_v5 = vadd.f32 %v5232_v52, %v4331_v62  ;;  %8391 = vmatmul.mubr.bf16.vlgmr.msra.gmra.mrb[8].mxu1 %v10485_v19  ;;  %v9101_v43 = vld [vmem:[%s10848_s5 + $0x160] sm:$0xff]  }
 0x3f9   : > { %v10493_v25 = vmax.f32 %v5265_v16, 0.0  ;;  %v5266_v44 = vadd.f32 %v8596_v46, %v7362_v8  ;;  %8399 = vmatpush3.bf16.msra.mxu1 %v9065_v61  ;;  %v9084_v46 = vld [vmem:[%s10848_s5 + $0xd8] sm:$0xff]  }
 0x3fa   : > { %v10495_v27 = vmax.f32 %v5263_v51, 0.0  ;;  %v5264_v12 = vadd.f32 %v8597_v5, %v7362_v8  ;;  %8400 = vmatprep.subr.bf16.mxu1 %v9066_v7  ;;  %v10512_v47 = vld [vmem:[#allocation3 + $0x32] sm:$0xff]  ;;  %v9085_v51 = vld [vmem:[%s10848_s5 + $0xe0] sm:$0xff]   ;;  %v9086_v5 = vld [vmem:[%s10848_s5 + $0xe8] sm:$0xff]  }
 0x3fb   : > { %5302 = vst [vmem:[#allocation3 + $0x71] sm:$0xff] %v10493_v25  ;;  %v10501_v36 = vmax.f32 %v5266_v44, 0.0  ;;  %v10510_v3 = vld [vmem:[#allocation3 + $0x10] sm:$0xff] }
 0x3fc   : > { %5300 = vst [vmem:[#allocation3 + $0x51] sm:$0xff] %v10495_v27  ;;  %v10504_v57 = vmax.f32 %v5264_v12, 0.0  ;;  %v10508_v58 = vpack.c.bf16 %v10495_v27, %v10473_v53  ;;  %v10514_v40 = vld [vmem:[#allocation3 + $0x42] sm:$0xff]  ;;  %v10532_v35 = vld [vmem:[#allocation3 + $0x12] sm:$0xff]  ;;  %v5312_v1 = vpack.c.bf16 %v10510_v3, %v9138_v49 }
 0x3fd   : > { %5303 = vst [vmem:[#allocation3 + $0x81] sm:$0xff] %v10501_v36  ;;  %8401 = vmatpush3.bf16.msra.mxu1 %v9066_v7  ;;  %v10517_v28 = vld [vmem:[#allocation3 + $0x22] sm:$0xff]  ;;  %v5898_v6 = vpack.c.bf16 %v10501_v36, %v10493_v25  ;;  %v6046_v34 = vpack.c.bf16 %v10514_v40, %v10512_v47  ;;  %v10564_v62 = vld [vmem:[#allocation3 + $0x30] sm:$0xff]  ;;  %v5595_v24 = vpack.c.bf16 %v10532_v35, %v5587_v29  ;;  %v9088_v12 = vld [vmem:[%s10848_s5 + $0xf8] sm:$0xff]  }
 0x3fe   : > { %5301 = vst [vmem:[#allocation3 + $0x61] sm:$0xff] %v10504_v57  ;;  %8394 = vmatprep.mubr.bf16.mxu1 %v10508_v58  ;;  %8402 = vmatprep.subr.bf16.mxu1 %v9067_v33  ;;  %v10527_v11 = vpack.c.bf16 %v10493_v25, %v10504_v57  ;;  %v5897_v59 = vpack.c.bf16 %v10504_v57, %v10495_v27  ;;  %v9070_v49 = vld [vmem:[%s10848_s5 + $0x28] sm:$0xff]   ;;  %v5306_v18 = vld [vmem:[#allocation3 + $0x20] sm:$0xff]  ;;  %v9087_v44 = vld [vmem:[%s10848_s5 + $0xf0] sm:$0xff]  }
 0x3ff   : > { %v6045_v55 = vpack.c.bf16 %v10517_v28, %v10532_v35  ;;  %v10567_v10 = vpack.c.bf16 %v10564_v62, %v5306_v18  ;;  %v10569_v8 = vld [vmem:[#allocation3 + $0x40] sm:$0xff]  ;;  %v10613_v63 = vpack.c.bf16 %v10512_v47, %v10517_v28  ;;  %v5745_v52 = vpack.c.bf16 %v5306_v18, %v10510_v3  ;;  %v9094_v18 = vld [vmem:[%s10848_s5 + $0x128] sm:$0xff]   ;;  %v9104_v25 = vld [vmem:[%s10848_s5 + $0x178] sm:$0xff]  }
 0x400   : > { %8395 = vmatmul.mubr.bf16.gmra.mrb[12].mxu1 %v10527_v11  ;;  %v5746_v3 = vpack.c.bf16 %v10569_v8, %v10564_v62  ;;  %v9099_v62 = vld [vmem:[%s10848_s5 + $0x150] sm:$0xff]   ;;  %v9102_v53 = vld [vmem:[%s10848_s5 + $0x168] sm:$0xff]   ;;  %v9105_v27 = vld [vmem:[%s10848_s5 + $0x180] sm:$0xff]  }
 0x401   : > { %8403 = vmatpush3.bf16.msra.mxu1 %v9067_v33  ;;  %8414 = vmatprep.mubr.bf16.mxu1 %v5312_v1  ;;  %v9089_v33 = vld [vmem:[%s10848_s5 + $0x100] sm:$0xff]   ;;  %v9106_v57 = vld [vmem:[%s10848_s5 + $0x188] sm:$0xff]   ;;  %v9107_v28 = vld [vmem:[%s10848_s5 + $0x190] sm:$0xff]  }
 0x402   : > { %8404 = vmatprep.subr.bf16.mxu1 %v9068_v45  ;;  %v10585_v13 = vld [vmem:[#allocation3 + $0x70] sm:$0xff]  ;;  %v9108_v47 = vld [vmem:[%s10848_s5 + $0x198] sm:$0xff]  }
 0x403   : > { %v10544_v61 = vld [vmem:[#allocation3 + $0x52] sm:$0xff] }
 0x404   : > { %v10562_v60 = vld [vmem:[#allocation3 + $0x50] sm:$0xff]  ;;  %v10620_v50 = vpack.c.bf16 %v10544_v61, %v10514_v40  ;;  %v9109_v40 = vld [vmem:[%s10848_s5 + $0x1a0] sm:$0xff]  }
 0x405   : > { %8405 = vmatpush3.bf16.msra.mxu1 %v9068_v45  ;;  %v10546_v26 = vld [vmem:[#allocation3 + $0x62] sm:$0xff]  ;;  %v10576_v23 = vpack.c.bf16 %v10562_v60, %v10569_v8  ;;  %v10627_v7 = vld [vmem:[#allocation3 + $0x72] sm:$0xff] }
 0x406   : > { %8406 = vmatprep.subr.bf16.mxu1 %v9069_v30  ;;  %v6047_v15 = vpack.c.bf16 %v10546_v26, %v10544_v61  ;;  %v10583_v48 = vld [vmem:[#allocation3 + $0x60] sm:$0xff]  ;;  %v10631_v16 = vpack.c.bf16 %v10627_v7, %v10546_v26  ;;  %v9090_v45 = vld [vmem:[%s10848_s5 + $0x108] sm:$0xff]   ;;  %v9100_v8 = vld [vmem:[%s10848_s5 + $0x158] sm:$0xff]  }
 0x407   : > { %v10589_v21 = vpack.c.bf16 %v10585_v13, %v10583_v48  ;;  %v5747_v1 = vpack.c.bf16 %v10583_v48, %v10562_v60  ;;  %v9095_v60 = vld [vmem:[%s10848_s5 + $0x130] sm:$0xff]   ;;  %v9113_v61 = vld [vmem:[%s10848_s5 + $0x1c0] sm:$0xff]   ;;  %v9114_v26 = vld [vmem:[%s10848_s5 + $0x1c8] sm:$0xff]  }
 0x408   : > { %v9118_v48 = vld [vmem:[%s10848_s5 + $0x1e8] sm:$0xff]   ;;  %v9119_v29 = vld [vmem:[%s10848_s5 + $0x1f0] sm:$0xff]  }
 0x409   : > { %8407 = vmatpush3.bf16.msra.mxu1 %v9069_v30  ;;  %v9091_v30 = vld [vmem:[%s10848_s5 + $0x110] sm:$0xff]  }
 0x40a   : > { %8408 = vmatprep.subr.bf16.mxu1 %v9070_v49 }
 0x40d   : > { %8409 = vmatpush3.bf16.msra.mxu1 %v9070_v49  ;;  %v10663_v49 = vld [vmem:[#allocation3 + $0x80] sm:$0xff] }
 0x40e   : > { %8410 = vmatprep.subr.bf16.mxu1 %v9071_v20 }
 0x411   : > { %8411 = vmatpush3.bf16.msra.mxu1 %v9071_v20  ;;  %v5748_v20 = vpack.c.bf16 %v10663_v49, %v10585_v13  ;;  %v9121_v13 = vld [vmem:[%s10848_s5 + $0x200] sm:$0xff]  }
 0x412   : > { %8412 = vmatprep.subr.bf16.mxu1 %v9072_v32 }
 0x415   : > { %8413 = vmatpush3.bf16.msra.mxu1 %v9072_v32  ;;  %v9092_v32 = vld [vmem:[%s10848_s5 + $0x118] sm:$0xff]  }
 0x416   : > { %8422 = vmatprep.subr.bf16.mxu1 %v9073_v42 }
 0x418   : > { %8415 = vmatmul.mubr.bf16.vlgmr.msra.gmra.mrb[8].mxu1 %v10567_v10 }
 0x419   : > { %8418 = vmatprep.mubr.bf16.mxu1 %v10576_v23  ;;  %8423 = vmatpush3.bf16.msra.mxu1 %v9073_v42  ;;  %v9093_v42 = vld [vmem:[%s10848_s5 + $0x120] sm:$0xff]  }
 0x41a   : > { %8424 = vmatprep.subr.bf16.mxu1 %v9074_v37 }
 0x41d   : > { %8425 = vmatpush3.bf16.msra.mxu1 %v9074_v37 }
 0x41e   : > { %8426 = vmatprep.subr.bf16.mxu1 %v9075_v41 }
 0x420   : > { %8419 = vmatmul.mubr.bf16.gmra.mrb[12].mxu1 %v10589_v21 }
 0x421   : > { %8427 = vmatpush3.bf16.msra.mxu1 %v9075_v41  ;;  %8438 = vmatprep.mubr.bf16.mxu1 %v5595_v24  ;;  %v9116_v41 = vld [vmem:[%s10848_s5 + $0x1d8] sm:$0xff]  }
 0x422   : > { %8428 = vmatprep.subr.bf16.mxu1 %v9076_v56  ;;  %v6345_v24 = vld [vmem:[#allocation3 + $0x91] sm:$0xff] }
 0x425   : > { %8429 = vmatpush3.bf16.msra.mxu1 %v9076_v56  ;;  %v9123_v56 = vld [vmem:[%s10848_s5 + $0x210] sm:$0xff]  }
 0x426   : > { %8430 = vmatprep.subr.bf16.mxu1 %v9077_v22 }
 0x429   : > { %8431 = vmatpush3.bf16.msra.mxu1 %v9077_v22  ;;  %v6349_v22 = vpack.c.bf16 %v6345_v24, %v10501_v36  ;;  %v9126_v36 = vld [vmem:[%s10848_s5 + $0x228] sm:$0xff]  }
 0x42a   : > { %8432 = vmatprep.subr.bf16.mxu1 %v9078_v4 }
 0x42d   : > { %8433 = vmatpush3.bf16.msra.mxu1 %v9078_v4  ;;  %v9124_v4 = vld [vmem:[%s10848_s5 + $0x218] sm:$0xff]  }
 0x42e   : > { %8434 = vmatprep.subr.bf16.mxu1 %v9079_v9 }
 0x431   : > { %8435 = vmatpush3.bf16.msra.mxu1 %v9079_v9  ;;  %v9128_v9 = vld [vmem:[%s10848_s5 + $0x238] sm:$0xff]  }
 0x432   : > { %8436 = vmatprep.subr.bf16.mxu1 %v9080_v54 }
 0x435   : > { %8437 = vmatpush3.bf16.msra.mxu1 %v9080_v54  ;;  %v6495_v54 = vld [vmem:[#allocation3 + $0x92] sm:$0xff] }
 0x436   : > { %8446 = vmatprep.subr.bf16.mxu1 %v9081_v39 }
 0x438   : > { %8439 = vmatmul.mubr.bf16.vlgmr.msra.gmra.mrb[8].mxu1 %v10613_v63 }
 0x439   : > { %8442 = vmatprep.mubr.bf16.mxu1 %v10620_v50  ;;  %8447 = vmatpush3.bf16.msra.mxu1 %v9081_v39 }
 0x43a   : > { %8448 = vmatprep.subr.bf16.mxu1 %v9082_v2 }
 0x43d   : > { %8449 = vmatpush3.bf16.msra.mxu1 %v9082_v2 }
 0x43e   : > { %8450 = vmatprep.subr.bf16.mxu1 %v9083_v14 }
 0x440   : > { %8443 = vmatmul.mubr.bf16.gmra.mrb[12].mxu1 %v10631_v16 }
 0x441   : > { %8451 = vmatpush3.bf16.msra.mxu1 %v9083_v14  ;;  %8462 = vmatprep.mubr.bf16.mxu1 %v5745_v52 }
 0x442   : > { %8452 = vmatprep.subr.bf16.mxu1 %v9084_v46 }
 0x445   : > { %8453 = vmatpush3.bf16.msra.mxu1 %v9084_v46  ;;  %v6655_v46 = vld [vmem:[#allocation2 + $0x31] sm:$0xff] }
 0x446   : > { %8454 = vmatprep.subr.bf16.mxu1 %v9085_v51 }
 0x449   : > { %8455 = vmatpush3.bf16.msra.mxu1 %v9085_v51 }
 0x44a   : > { %8456 = vmatprep.subr.bf16.mxu1 %v9086_v5 }
 0x44d   : > { %8457 = vmatpush3.bf16.msra.mxu1 %v9086_v5 }
 0x44e   : > { %8458 = vmatprep.subr.bf16.mxu1 %v9087_v44 }
 0x451   : > { %8459 = vmatpush3.bf16.msra.mxu1 %v9087_v44  ;;  %v6653_v44 = vld [vmem:[#allocation2 + $0x11] sm:$0xff] }
 0x452   : > { %8460 = vmatprep.subr.bf16.mxu1 %v9088_v12 }
 0x455   : > { %8461 = vmatpush3.bf16.msra.mxu1 %v9088_v12 }
 0x456   : > { %8470 = vmatprep.subr.bf16.mxu1 %v9089_v33 }
 0x458   : > { %8463 = vmatmul.mubr.bf16.vlgmr.msra.gmra.mrb[8].mxu1 %v5746_v3 }
 0x459   : > { %8466 = vmatprep.mubr.bf16.mxu1 %v5747_v1  ;;  %8471 = vmatpush3.bf16.msra.mxu1 %v9089_v33  ;;  %v6656_v33 = vld [vmem:[#allocation2 + $0x41] sm:$0xff] }
 0x45a   : > { %8472 = vmatprep.subr.bf16.mxu1 %v9090_v45 }
 0x45d   : > { %8473 = vmatpush3.bf16.msra.mxu1 %v9090_v45 }
 0x45e   : > { %8474 = vmatprep.subr.bf16.mxu1 %v9091_v30 }
 0x460   : > { %8467 = vmatmul.mubr.bf16.gmra.mrb[12].mxu1 %v5748_v20 }
 0x461   : > { %8475 = vmatpush3.bf16.msra.mxu1 %v9091_v30  ;;  %8486 = vmatprep.mubr.bf16.mxu1 %v5895_v17  ;;  %v9098_v17 = vld [vmem:[%s10848_s5 + $0x148] sm:$0xff]  }
 0x462   : > { %8476 = vmatprep.subr.bf16.mxu1 %v9092_v32  ;;  %v6654_v30 = vld [vmem:[#allocation2 + $0x21] sm:$0xff] }
 0x465   : > { %8477 = vmatpush3.bf16.msra.mxu1 %v9092_v32 }
 0x466   : > { %8478 = vmatprep.subr.bf16.mxu1 %v9093_v42 }
 0x469   : > { %8479 = vmatpush3.bf16.msra.mxu1 %v9093_v42 }
 0x46a   : > { %8480 = vmatprep.subr.bf16.mxu1 %v9094_v18 }
 0x46d   : > { %8481 = vmatpush3.bf16.msra.mxu1 %v9094_v18 }
 0x46e   : > { %8482 = vmatprep.subr.bf16.mxu1 %v9095_v60 }
 0x471   : > { %8483 = vmatpush3.bf16.msra.mxu1 %v9095_v60 }
 0x472   : > { %8484 = vmatprep.subr.bf16.mxu1 %v9096_v38 }
 0x475   : > { %8485 = vmatpush3.bf16.msra.mxu1 %v9096_v38 }
 0x476   : > { %8494 = vmatprep.subr.bf16.mxu1 %v9097_v31 }
 0x478   : > { %8487 = vmatmul.mubr.bf16.vlgmr.msra.gmra.mrb[8].mxu1 %v5896_v0  ;;  %v9103_v0 = vld [vmem:[%s10848_s5 + $0x170] sm:$0xff]  }
 0x479   : > { %8490 = vmatprep.mubr.bf16.mxu1 %v5897_v59  ;;  %8495 = vmatpush3.bf16.msra.mxu1 %v9097_v31  ;;  %v9111_v59 = vld [vmem:[%s10848_s5 + $0x1b0] sm:$0xff]  }
 0x47a   : > { %8496 = vmatprep.subr.bf16.mxu1 %v9098_v17  ;;  %v6659_v31 = vld [vmem:[#allocation2 + $0x71] sm:$0xff] }
 0x47d   : > { %8497 = vmatpush3.bf16.msra.mxu1 %v9098_v17 }
 0x47e   : > { %8498 = vmatprep.subr.bf16.mxu1 %v9099_v62 }
 0x480   : > { %8491 = vmatmul.mubr.bf16.gmra.mrb[12].mxu1 %v5898_v6  ;;  %v10736_v6 = vld [vmem:[#allocation3 + $0x82] sm:$0xff] }
 0x481   : > { %8499 = vmatpush3.bf16.msra.mxu1 %v9099_v62  ;;  %8510 = vmatprep.mubr.bf16.mxu1 %v6045_v55  ;;  %v6048_v35 = vpack.c.bf16 %v10736_v6, %v10627_v7  ;;  %v9112_v55 = vld [vmem:[%s10848_s5 + $0x1b8] sm:$0xff]   ;;  %v6499_v39 = vpack.c.bf16 %v6495_v54, %v10736_v6 }
 0x482   : > { %8500 = vmatprep.subr.bf16.mxu1 %v9100_v8 }
 0x485   : > { %8501 = vmatpush3.bf16.msra.mxu1 %v9100_v8 }
 0x486   : > { %8502 = vmatprep.subr.bf16.mxu1 %v9101_v43 }
 0x489   : > { %8503 = vmatpush3.bf16.msra.mxu1 %v9101_v43  ;;  %v6657_v43 = vld [vmem:[#allocation2 + $0x51] sm:$0xff] }
 0x48a   : > { %8504 = vmatprep.subr.bf16.mxu1 %v9102_v53 }
 0x48d   : > { %8505 = vmatpush3.bf16.msra.mxu1 %v9102_v53 }
 0x48e   : > { %8506 = vmatprep.subr.bf16.mxu1 %v9103_v0 }
 0x491   : > { %8507 = vmatpush3.bf16.msra.mxu1 %v9103_v0 }
 0x492   : > { %8508 = vmatprep.subr.bf16.mxu1 %v9104_v25 }
 0x495   : > { %8509 = vmatpush3.bf16.msra.mxu1 %v9104_v25 }
 0x496   : > { %8518 = vmatprep.subr.bf16.mxu1 %v9105_v27 }
 0x498   : > { %8511 = vmatmul.mubr.bf16.vlgmr.msra.gmra.mrb[8].mxu1 %v6046_v34  ;;  %v9110_v34 = vld [vmem:[%s10848_s5 + $0x1a8] sm:$0xff]  }
 0x499   : > { %8514 = vmatprep.mubr.bf16.mxu1 %v6047_v15  ;;  %8519 = vmatpush3.bf16.msra.mxu1 %v9105_v27  ;;  %v9115_v15 = vld [vmem:[%s10848_s5 + $0x1d0] sm:$0xff]   ;;  %v6660_v27 = vld [vmem:[#allocation2 + $0x81] sm:$0xff] }
 0x49a   : > { %8520 = vmatprep.subr.bf16.mxu1 %v9106_v57 }
 0x49d   : > { %8521 = vmatpush3.bf16.msra.mxu1 %v9106_v57 }
 0x49e   : > { %8522 = vmatprep.subr.bf16.mxu1 %v9107_v28 }
 0x4a0   : > { %8515 = vmatmul.mubr.bf16.gmra.mrb[12].mxu1 %v6048_v35  ;;  %v6658_v35 = vld [vmem:[#allocation2 + $0x61] sm:$0xff] }
 0x4a1   : > { %8523 = vmatpush3.bf16.msra.mxu1 %v9107_v28  ;;  %8534 = vmatprep.mubr.bf16.mxu1 %v10567_v10  ;;  %v9129_v10 = vld [vmem:[#allocation2] sm:$0xff] }
 0x4a2   : > { %8524 = vmatprep.subr.bf16.mxu1 %v9108_v47  ;;  %v6199_v37 = vpack.c.bf16 %v9129_v10, %v10663_v49 }
 0x4a5   : > { %8525 = vmatpush3.bf16.msra.mxu1 %v9108_v47 }
 0x4a6   : > { %8526 = vmatprep.subr.bf16.mxu1 %v9109_v40 }
 0x4a9   : > { %8527 = vmatpush3.bf16.msra.mxu1 %v9109_v40 }
 0x4aa   : > { %8528 = vmatprep.subr.bf16.mxu1 %v9110_v34 }
 0x4ad   : > { %8529 = vmatpush3.bf16.msra.mxu1 %v9110_v34 }
 0x4ae   : > { %8530 = vmatprep.subr.bf16.mxu1 %v9111_v59 }
 0x4b1   : > { %8531 = vmatpush3.bf16.msra.mxu1 %v9111_v59 }
 0x4b2   : > { %8532 = vmatprep.subr.bf16.mxu1 %v9112_v55 }
 0x4b5   : > { %8533 = vmatpush3.bf16.msra.mxu1 %v9112_v55 }
 0x4b6   : > { %8542 = vmatprep.subr.bf16.mxu1 %v9113_v61 }
 0x4b8   : > { %8535 = vmatmul.mubr.bf16.vlgmr.msra.gmra.mrb[8].mxu1 %v10576_v23  ;;  %v9117_v23 = vld [vmem:[%s10848_s5 + $0x1e0] sm:$0xff]  }
 0x4b9   : > { %8538 = vmatprep.mubr.bf16.mxu1 %v10589_v21  ;;  %8543 = vmatpush3.bf16.msra.mxu1 %v9113_v61  ;;  %v9122_v21 = vld [vmem:[%s10848_s5 + $0x208] sm:$0xff]  }
 0x4ba   : > { %8544 = vmatprep.subr.bf16.mxu1 %v9114_v26 }
 0x4bd   : > { %8545 = vmatpush3.bf16.msra.mxu1 %v9114_v26 }
 0x4be   : > { %8546 = vmatprep.subr.bf16.mxu1 %v9115_v15 }
 0x4c0   : > { %8539 = vmatmul.mubr.bf16.gmra.mrb[12].mxu1 %v6199_v37 }
 0x4c1   : > { %8547 = vmatpush3.bf16.msra.mxu1 %v9115_v15  ;;  %8558 = vmatprep.mubr.bf16.mxu1 %v10485_v19  ;;  %v9120_v19 = vld [vmem:[%s10848_s5 + $0x1f8] sm:$0xff]  }
 0x4c2   : > { %8548 = vmatprep.subr.bf16.mxu1 %v9116_v41 }
 0x4c5   : > { %8549 = vmatpush3.bf16.msra.mxu1 %v9116_v41 }
 0x4c6   : > { %8550 = vmatprep.subr.bf16.mxu1 %v9117_v23 }
 0x4c9   : > { %8551 = vmatpush3.bf16.msra.mxu1 %v9117_v23 }
 0x4ca   : > { %8552 = vmatprep.subr.bf16.mxu1 %v9118_v48 }
 0x4cd   : > { %8553 = vmatpush3.bf16.msra.mxu1 %v9118_v48 }
 0x4ce   : > { %8554 = vmatprep.subr.bf16.mxu1 %v9119_v29 }
 0x4d1   : > { %8555 = vmatpush3.bf16.msra.mxu1 %v9119_v29 }
 0x4d2   : > { %8556 = vmatprep.subr.bf16.mxu1 %v9120_v19 }
 0x4d5   : > { %8557 = vmatpush3.bf16.msra.mxu1 %v9120_v19 }
 0x4d6   : > { %8566 = vmatprep.subr.bf16.mxu1 %v9121_v13 }
 0x4d8   : > { %8559 = vmatmul.mubr.bf16.vlgmr.msra.gmra.mrb[8].mxu1 %v10508_v58  ;;  %v9125_v58 = vld [vmem:[%s10848_s5 + $0x220] sm:$0xff]  }
 0x4d9   : > { %8562 = vmatprep.mubr.bf16.mxu1 %v10527_v11  ;;  %8567 = vmatpush3.bf16.msra.mxu1 %v9121_v13  ;;  %v9127_v11 = vld [vmem:[%s10848_s5 + $0x230] sm:$0xff]  }
 0x4da   : > { %8568 = vmatprep.subr.bf16.mxu1 %v9122_v21 }
 0x4dd   : > { %8569 = vmatpush3.bf16.msra.mxu1 %v9122_v21 }
 0x4de   : > { %8570 = vmatprep.subr.bf16.mxu1 %v9123_v56 }
 0x4e0   : > { %8563 = vmatmul.mubr.bf16.gmra.mrb[12].mxu1 %v6349_v22 }
 0x4e1   : > { %8571 = vmatpush3.bf16.msra.mxu1 %v9123_v56  ;;  %8582 = vmatprep.mubr.bf16.mxu1 %v10613_v63  ;;  %v7563_v63 = vld [vmem:[%s10849_s6] ss:$0 sm:$0xff] }
 0x4e2   : > { %8572 = vmatprep.subr.bf16.mxu1 %v9124_v4 }
 0x4e5   : > { %8573 = vmatpush3.bf16.msra.mxu1 %v9124_v4 }
 0x4e6   : > { %8574 = vmatprep.subr.bf16.mxu1 %v9125_v58 }
 0x4e9   : > { %8575 = vmatpush3.bf16.msra.mxu1 %v9125_v58 }
 0x4ea   : > { %8576 = vmatprep.subr.bf16.mxu1 %v9126_v36 }
 0x4ed   : > { %8577 = vmatpush3.bf16.msra.mxu1 %v9126_v36 }
 0x4ee   : > { %8578 = vmatprep.subr.bf16.mxu1 %v9127_v11 }
 0x4f1   : > { %8579 = vmatpush3.bf16.msra.mxu1 %v9127_v11 }
 0x4f2   : > { %8580 = vmatprep.subr.bf16.mxu1 %v9128_v9 }
 0x4f5   : > { %8581 = vmatpush3.bf16.msra.mxu1 %v9128_v9 }
 0x4f8   : > { %8583 = vmatmul.mubr.bf16.vlgmr.msra.gmra.mrb[8].mxu1 %v10620_v50 }
 0x4f9   : > { %8586 = vmatprep.mubr.bf16.mxu1 %v10631_v16 }
 0x500   : > { %8587 = vmatmul.mubr.bf16.gmra.mrb[12].mxu1 %v6499_v39 }
 0x5cb   : > { %v8584_v2 = vpop.f32.mrb[8].mxu1 }
 0x5cc   : > { %v6647_v14 = vadd.f32 %v8584_v2, %v7563_v63  ;;  %v6599_v7 = vpop.f32.mrb[9].mxu1 }
 0x5cd   : > { %v6645_v52 = vadd.f32 %v7563_v63, %v6599_v7  ;;  %v8585_v51 = vpop.f32.mrb[10].mxu1 }
 0x5ce   : > { %v6663_v5 = vadd.f32 %v6655_v46, %v6647_v14  ;;  %v6648_v50 = vadd.f32 %v8585_v51, %v7563_v63  ;;  %v6602_v12 = vpop.f32.mrb[11].mxu1 }
 0x5cf   : > { %v6661_v16 = vadd.f32 %v6653_v44, %v6645_v52  ;;  %v6646_v3 = vadd.f32 %v7563_v63, %v6602_v12 }
 0x5d0   : > { %v6671_v45 = vmax.f32 %v6663_v5, 0.0  ;;  %v6664_v1 = vadd.f32 %v6656_v33, %v6648_v50 }
 0x5d1   : > { %v6669_v49 = vmax.f32 %v6661_v16, 0.0  ;;  %v6662_v20 = vadd.f32 %v6654_v30, %v6646_v3 }
 0x5d2   : > { %6680 = vst.msk [vmem:[%s10822_s20 + $0x10] sm:$0xff] %vm6677_vm4, %v6671_v45  ;;  %v6672_v32 = vmax.f32 %v6664_v1, 0.0 }
 0x5d3   : > { %6678 = vst.msk [vmem:[%s10822_s20] sm:$0xff] %vm6677_vm4, %v6669_v49  ;;  %v6670_v42 = vmax.f32 %v6662_v20, 0.0  ;;  %v8588_v18 = vpop.f32.mrb[12].mxu1 }
 0x5d4   : > { %6681 = vst.msk [vmem:[%s10822_s20 + $0x18] sm:$0xff] %vm6677_vm4, %v6672_v32  ;;  %v6651_v60 = vadd.f32 %v8588_v18, %v7563_v63  ;;  %v6615_v38 = vpop.f32.mrb[13].mxu1 }
 0x5d5   : > { %6679 = vst.msk [vmem:[%s10822_s20 + $0x8] sm:$0xff] %vm6677_vm4, %v6670_v42  ;;  %v6649_v17 = vadd.f32 %v7563_v63, %v6615_v38  ;;  %v8589_v62 = vpop.f32.mrb[14].mxu1 }
 0x5d6   : > { %v6667_v8 = vadd.f32 %v6659_v31, %v6651_v60  ;;  %v6652_v53 = vadd.f32 %v8589_v62, %v7563_v63  ;;  %v6618_v0 = vpop.f32.mrb[15].mxu1 }
 0x5d7   : > { %v6665_v25 = vadd.f32 %v6657_v43, %v6649_v17  ;;  %v6650_v57 = vadd.f32 %v7563_v63, %v6618_v0 }
 0x5d8   : > { %v6675_v28 = vmax.f32 %v6667_v8, 0.0  ;;  %v6668_v6 = vadd.f32 %v6660_v27, %v6652_v53 }
 0x5d9   : > { %v6673_v47 = vmax.f32 %v6665_v25, 0.0  ;;  %v6666_v40 = vadd.f32 %v6658_v35, %v6650_v57 }
 0x5da   : > { %6684 = vst.msk [vmem:[%s10822_s20 + $0x30] sm:$0xff] %vm6677_vm4, %v6675_v28  ;;  %v6676_v34 = vmax.f32 %v6668_v6, 0.0 }
 0x5db   : > { %6682 = vst.msk [vmem:[%s10822_s20 + $0x20] sm:$0xff] %vm6677_vm4, %v6673_v47  ;;  %v6674_v59 = vmax.f32 %v6666_v40, 0.0 }
 0x5dc   : > { %6685 = vst.msk [vmem:[%s10822_s20 + $0x38] sm:$0xff] %vm6677_vm4, %v6676_v34 }
 0x5dd   : > { %6683 = vst.msk [vmem:[%s10822_s20 + $0x28] sm:$0xff] %vm6677_vm4, %v6674_v59 }
 0x5de PF: > { %s17_s24 = sadd.s32 1, %s9136_s24  }
 0x5df   : > { %p14_p4 = scmp.ge.s32.totalorder %s17_s24, 4  }
 0x5e1   :  { %16 = sbr.rel (!%p14_p4) target bundleno = 1 (0x1), region = 131 }

</bundles_post_ra>
